<compile_context>
chip_gen: v6e
topology: v6e:2x2x1
jax: 0.10.0
libtpu: 0.0.40
codegen_flags: <defaults>
</compile_context>

<pallas_src>
import jax
import jax.numpy as jnp
from jax import lax
from jax.experimental import pallas as pl
from jax.experimental.pallas import tpu as pltpu

IMAGE_SIZE = 16        # small stand-in for 112 in the original module (must be % 4 == 0)
NUM_CLASSES = 36
HIDDEN = 128
C1 = 16                # conv1 output channels
C2 = 32                # conv2 output channels
NCP = 128              # classifier output padded to a full lane group


def _sigmoid(x):
    # exact logistic (f32 divide); avoids approx-reciprocal drift through the
    # recurrence (review correctness concern).
    return 1.0 / (1.0 + jnp.exp(-x))


# ------------------------------ fused kernel --------------------------------

def _fused_kernel(xrep_ref, w1t_ref, b1t_ref, w2_ref, b2_ref,
                  wih_ref, whh_ref, bl_ref, wfc_ref, bfc_ref,
                  o_ref, p1pad_ref, gx_ref):
    """Whole MiniCRNN forward for one batch block; intermediates stay in VMEM.

    xrep_ref : (2, 2, BB, S/2+1, (S/2+1)*C1) f32  padded input, parity-split,
               each pixel repeated C1 times along lanes
    w1t_ref  : (9, P1*C1) f32   conv1 weights tiled to the lane pattern
    b1t_ref  : (1, P1*C1) f32
    w2_ref   : (9*C1, C2) bf16, b2_ref: (1, C2) f32
    wih_ref  : (H2*C2, 4H) bf16 (rows ordered h2-major / c2-minor)
    whh_ref  : (H, 4H) bf16
    bl_ref   : (1, 4H) f32      b_ih + b_hh
    wfc_ref  : (H, NCP) f32 (cols >= NUM_CLASSES zero-padded), bfc_ref: (1, NCP)
    o_ref    : (BB, 1, NCP) f32
    scratch  : p1pad (BB, P1+2, P1+2, C1) f32 ; gx (BB, T, 4H) f32
    """
    BB = xrep_ref.shape[2]
    half = xrep_ref.shape[3]
    c1 = xrep_ref.shape[4] // half
    P1 = half - 1                      # spatial size after pool1 (S/2)
    H2 = P1 // 2                       # height after pool2 (S/4)
    T = P1 // 2                        # sequence length = width after pool2
    c2 = w2_ref.shape[1]
    H = whh_ref.shape[0]
    G = whh_ref.shape[1]               # 4*H
    M = BB * P1 * P1

    # ---- stage 1: conv1(3x3, Cin=1) + ReLU + 2x2 max-pool (lane-dense VPU) --
    # Pool-quadrant accumulation: conv output at (2i+dh, 2j+dw) reads padded
    # input rows/cols addressed through the parity split, so every tap is a
    # static window.  All tensors here are (BB, P1, P1*C1): 128-wide lanes.
    m = None
    for dh in range(2):
        for dw in range(2):
            acc = None
            for kh in range(3):
                for kw in range(3):
                    oh, ow = dh + kh, dw + kw
                    k = 3 * kh + kw
                    tap = xrep_ref[oh % 2, ow % 2, :,
                                   oh // 2:oh // 2 + P1,
                                   (ow // 2) * c1:(ow // 2) * c1 + P1 * c1]
                    contrib = tap * w1t_ref[k:k + 1, :]          # (BB, P1, P1*C1)
                    acc = contrib if acc is None else acc + contrib
            m = acc if m is None else jnp.maximum(m, acc)
    pooled1 = jnp.maximum(m + b1t_ref[...], 0.0)                 # (BB, P1, P1*C1)

    # One bounded relayout (lanes -> channels-minor) into the zero-padded
    # conv2 input scratch.  This is the only sub-128-lane store left; it
    # replaces per-MAC 16-lane work everywhere else.
    p1pad_ref[...] = jnp.zeros_like(p1pad_ref)
    for j in range(P1):
        p1pad_ref[:, 1:P1 + 1, j + 1, :] = pooled1[:, :, j * c1:(j + 1) * c1]

    # ---- stage 2: conv2(3x3, C1->C2) + ReLU + full 2x2 pool ----------------
    # im2col patches built as a VALUE (no scratch round trip): nine windows
    # lane-concatenated to (M, 9*C1), one bf16 cast, one MXU GEMM (f32 acc).
    windows = [p1pad_ref[:, kh:kh + P1, kw:kw + P1, :].reshape(M, c1)
               for kh in range(3) for kw in range(3)]
    patches = jnp.concatenate(windows, axis=-1).astype(jnp.bfloat16)   # (M, 9*C1)
    act2 = jnp.dot(patches, w2_ref[...], preferred_element_type=jnp.float32)
    act2 = jnp.maximum(act2 + b2_ref[...], 0.0)                        # (M, C2)

    # 2x2 max-pool: rows of act2 are ordered (b, h2, dh, t, dw).
    a = act2.reshape(BB, H2, 2, 2 * T, c2)
    vh = jnp.maximum(a[:, :, 0, :, :], a[:, :, 1, :, :])               # (BB, H2, 2T, C2)
    vw = vh.reshape(BB, H2, T, 2, c2)
    p2 = jnp.maximum(vw[:, :, :, 0, :], vw[:, :, :, 1, :])             # (BB, H2, T, C2)

    # ---- stage 3: LSTM input projection as ONE GEMM ------------------------
    # Feature rows are (b, t); lanes are (h2*C2 + c2) to match the wrapper's
    # W_ih layout.  Single (BB*T, H2*C2) @ (H2*C2, 4H) matmul, bias added once,
    # result parked in the gx scratch indexed by t.
    feat = jnp.concatenate([p2[:, h2, :, :].reshape(BB * T, c2) for h2 in range(H2)],
                           axis=-1).astype(jnp.bfloat16)               # (BB*T, H2*C2)
    gates = jnp.dot(feat, wih_ref[...],
                    preferred_element_type=jnp.float32) + bl_ref[...]  # (BB*T, 4H)
    gx_ref[...] = gates.reshape(BB, T, G)

    # ---- recurrence (batch_first, last hidden only) + classifier -----------
    # Only h @ Whh (bf16 weights, f32 accumulation) sits on the serial path.
    # Gate order follows PyTorch: i, f, g, o.
    # NOTE: at the full IMAGE_SIZE=112 (T=28) this static loop should become a
    # lax.fori_loop over gx_ref with (h, c) as carry to bound live ranges.
    whh = whh_ref[...]
    h = jnp.zeros((BB, H), jnp.float32)
    c = jnp.zeros((BB, H), jnp.float32)
    for t in range(T):
        g = gx_ref[:, t, :] + jnp.dot(h.astype(jnp.bfloat16), whh,
                                      preferred_element_type=jnp.float32)
        i_g = _sigmoid(g[:, 0 * H:1 * H])
        f_g = _sigmoid(g[:, 1 * H:2 * H])
        g_g = jnp.tanh(g[:, 2 * H:3 * H])
        o_g = _sigmoid(g[:, 3 * H:4 * H])
        c = f_g * c + i_g * g_g
        h = o_g * jnp.tanh(c)

    # fused classifier epilogue; output padded to 128 lanes -> full-width store
    logits = jnp.dot(h, wfc_ref[...], preferred_element_type=jnp.float32) + bfc_ref[...]
    o_ref[...] = logits.reshape(BB, 1, -1)


# ------------------------------ JAX wrapper ----------------------------------

def mini_crnn_forward(params, x, *, block_batch=1):
    """x: (B, 1, IMAGE_SIZE, IMAGE_SIZE) NCHW f32 -> logits (B, NUM_CLASSES)."""
    B, _, S, _ = x.shape
    P1, H2, T = S // 2, S // 4, S // 4
    half = S // 2 + 1
    G = 4 * HIDDEN
    BB = block_batch
    assert B % BB == 0

    # input prep: SAME-pad, split by pixel parity, repeat each pixel C1 times
    # along lanes so the in-kernel conv1 taps are lane-dense static windows.
    # (At full IMAGE_SIZE=112 the repeat would be done in-kernel instead to
    # avoid 16x input HBM traffic.)
    xp = jnp.pad(x[:, 0], ((0, 0), (1, 1), (1, 1)))                    # (B, S+2, S+2)
    xq = xp.reshape(B, half, 2, half, 2).transpose(2, 4, 0, 1, 3)      # (2, 2, B, half, half)
    xrep = jnp.repeat(xq, C1, axis=-1)                                 # (2, 2, B, half, half*C1)

    # one-time weight layout transforms
    w1 = params["conv1_w"].reshape(C1, 9).T                            # (9, C1)  [k, cout]
    w1t = jnp.tile(w1, (1, P1))                                        # (9, P1*C1) lane pattern
    b1t = jnp.tile(params["conv1_b"].reshape(1, C1), (1, P1))          # (1, P1*C1)
    w2 = (params["conv2_w"].transpose(2, 3, 1, 0)                      # (kh, kw, cin, cout)
          .reshape(9 * C1, C2).astype(jnp.bfloat16))                   # rows = (k, cin)
    b2 = params["conv2_b"].reshape(1, C2)
    # PyTorch flattens CNN features as d = c2*H2 + h2; reorder W_ih rows to
    # (h2*C2 + c2) so the kernel's feature concat matches, as ONE GEMM operand.
    wih = (params["w_ih"].T.reshape(C2, H2, G)
           .transpose(1, 0, 2).reshape(H2 * C2, G).astype(jnp.bfloat16))   # (H2*C2, 4H)
    whh = params["w_hh"].T.astype(jnp.bfloat16)                        # (HIDDEN, 4H) bf16
    bl = (params["b_ih"] + params["b_hh"]).reshape(1, G)
    wfc = jnp.zeros((HIDDEN, NCP), jnp.float32).at[:, :NUM_CLASSES].set(params["fc_w"].T)
    bfc = jnp.zeros((1, NCP), jnp.float32).at[:, :NUM_CLASSES].set(params["fc_b"])

    def full(a):
        return pl.BlockSpec(a.shape, lambda i, _nd=a.ndim: (0,) * _nd)

    out = pl.pallas_call(
        _fused_kernel,
        out_shape=jax.ShapeDtypeStruct((B, 1, NCP), jnp.float32),
        grid=(B // BB,),
        in_specs=[
            pl.BlockSpec((2, 2, BB, half, half * C1), lambda i: (0, 0, i, 0, 0)),
            full(w1t), full(b1t), full(w2), full(b2),
            full(wih), full(whh), full(bl), full(wfc), full(bfc),
        ],
        out_specs=pl.BlockSpec((BB, 1, NCP), lambda i: (i, 0, 0)),
        scratch_shapes=[
            pltpu.VMEM((BB, P1 + 2, P1 + 2, C1), jnp.float32),          # padded pool1 output
            pltpu.VMEM((BB, T, G), jnp.float32),                        # LSTM input projection
        ],
        compiler_params=pltpu.CompilerParams(
            dimension_semantics=("parallel",),      # batch tiles -> both v7x TCs
            vmem_limit_bytes=32 * 1024 * 1024,      # safe on v5e/v6e/v7x
        ),
    )(xrep, w1t, b1t, w2, b2, wih, whh, bl, wfc, bfc)
    # NOTE: at IMAGE_SIZE=112 / larger batch, pick block_batch so per-core
    # scratch fits v7x's 64 MiB VMEM and add an M-tiled grid axis for conv2.
    return out[:, 0, :NUM_CLASSES]


# ------------------------- deterministic parameters --------------------------

def init_params(key):
    D = C2 * (IMAGE_SIZE // 4)
    ks = jax.random.split(key, 9)

    def rnd(k, shape, scale):
        return jax.random.normal(k, shape, jnp.float32) * scale

    return {
        "conv1_w": rnd(ks[0], (C1, 1, 3, 3), 0.3),
        "conv1_b": rnd(ks[1], (C1,), 0.1),
        "conv2_w": rnd(ks[2], (C2, C1, 3, 3), 0.1),
        "conv2_b": rnd(ks[3], (C2,), 0.1),
        "w_ih": rnd(ks[4], (4 * HIDDEN, D), 0.05),
        "w_hh": rnd(ks[5], (4 * HIDDEN, HIDDEN), 0.05),
        "b_ih": rnd(ks[6], (4 * HIDDEN,), 0.05),
        "b_hh": rnd(ks[7], (4 * HIDDEN,), 0.05),
        "fc_w": rnd(ks[8], (NUM_CLASSES, HIDDEN), 0.05),
        "fc_b": jnp.zeros((NUM_CLASSES,), jnp.float32),
    }


# ------------------------------ pure-JAX reference ---------------------------

def reference_forward(params, x):
    def conv(x, w, b):
        y = lax.conv_general_dilated(
            x, w, window_strides=(1, 1), padding="SAME",
            dimension_numbers=("NCHW", "OIHW", "NCHW"))
        return jax.nn.relu(y + b.reshape(1, -1, 1, 1))

    def pool(x):
        N, C, H, W = x.shape
        return x.reshape(N, C, H // 2, 2, W // 2, 2).max(axis=(3, 5))

    x = pool(conv(x, params["conv1_w"], params["conv1_b"]))
    x = pool(conv(x, params["conv2_w"], params["conv2_b"]))
    B, C, Hp, Wp = x.shape
    seq = jnp.transpose(x, (0, 3, 1, 2)).reshape(B, Wp, C * Hp)
    h = jnp.zeros((B, HIDDEN), jnp.float32)
    c = jnp.zeros((B, HIDDEN), jnp.float32)
    bias = params["b_ih"] + params["b_hh"]
    for t in range(seq.shape[1]):
        g = seq[:, t, :] @ params["w_ih"].T + h @ params["w_hh"].T + bias
        i, f, gg, o = jnp.split(g, 4, axis=1)
        i, f, o = jax.nn.sigmoid(i), jax.nn.sigmoid(f), jax.nn.sigmoid(o)
        c = f * c + i * jnp.tanh(gg)
        h = o * jnp.tanh(c)
    return h @ params["fc_w"].T + params["fc_b"]


# ------------------------------------ main ------------------------------------

if __name__ == "__main__":
    key = jax.random.PRNGKey(0)
    pkey, xkey = jax.random.split(key)
    params = init_params(pkey)
    x = jax.random.normal(xkey, (2, 1, IMAGE_SIZE, IMAGE_SIZE), jnp.float32)

    fwd = jax.jit(mini_crnn_forward)
    out = jax.block_until_ready(fwd(params, x))
    ref = jax.block_until_ready(reference_forward(params, x))

    assert out.shape == (2, NUM_CLASSES), out.shape
    assert bool(jnp.all(jnp.isfinite(out)))
    err = float(jnp.max(jnp.abs(out - ref)))
    assert bool(jnp.allclose(out, ref, rtol=2e-2, atol=2e-2)), err
    print("KERNEL_OK")
</pallas_src>

<mosaic_0001>
module attributes {stable_mosaic.version = 11 : i64} {
  func.func @_fused_kernel(%arg0: i32, %arg1: memref<2x2x1x9x144xf32, #tpu.memory_space<vmem>>, %arg2: memref<9x128xf32, #tpu.memory_space<vmem>>, %arg3: memref<1x128xf32, #tpu.memory_space<vmem>>, %arg4: memref<144x32xbf16, #tpu.memory_space<vmem>>, %arg5: memref<1x32xf32, #tpu.memory_space<vmem>>, %arg6: memref<128x512xbf16, #tpu.memory_space<vmem>>, %arg7: memref<128x512xbf16, #tpu.memory_space<vmem>>, %arg8: memref<1x512xf32, #tpu.memory_space<vmem>>, %arg9: memref<128x128xf32, #tpu.memory_space<vmem>>, %arg10: memref<1x128xf32, #tpu.memory_space<vmem>>, %arg11: memref<1x1x128xf32, #tpu.memory_space<vmem>>, %arg12: memref<1x10x10x16xf32, #tpu.memory_space<vmem>>, %arg13: memref<1x4x512xf32, #tpu.memory_space<vmem>>) attributes {dimension_semantics = [#tpu.dimension_semantics<parallel>], iteration_bounds = array<i64: 2>, scalar_prefetch = 0 : i64, scratch_operands = 2 : i64, tpu.core_type = #tpu.core_type<tc>, window_params = [{transform_indices = @transform_0, window_bounds = array<i64: 2, 2, 1, 9, 144>}, {pipeline_mode = #tpu.pipeline_mode<synchronous>, transform_indices = @transform_1, window_bounds = array<i64: 9, 128>}, {pipeline_mode = #tpu.pipeline_mode<synchronous>, transform_indices = @transform_2, window_bounds = array<i64: 1, 128>}, {pipeline_mode = #tpu.pipeline_mode<synchronous>, transform_indices = @transform_3, window_bounds = array<i64: 144, 32>}, {pipeline_mode = #tpu.pipeline_mode<synchronous>, transform_indices = @transform_4, window_bounds = array<i64: 1, 32>}, {pipeline_mode = #tpu.pipeline_mode<synchronous>, transform_indices = @transform_5, window_bounds = array<i64: 128, 512>}, {pipeline_mode = #tpu.pipeline_mode<synchronous>, transform_indices = @transform_6, window_bounds = array<i64: 128, 512>}, {pipeline_mode = #tpu.pipeline_mode<synchronous>, transform_indices = @transform_7, window_bounds = array<i64: 1, 512>}, {pipeline_mode = #tpu.pipeline_mode<synchronous>, transform_indices = @transform_8, window_bounds = array<i64: 128, 128>}, {pipeline_mode = #tpu.pipeline_mode<synchronous>, transform_indices = @transform_9, window_bounds = array<i64: 1, 128>}, {transform_indices = @transform_10, window_bounds = array<i64: 1, 1, 128>}]} {
    %c0 = arith.constant 0 : index
    %c0_0 = arith.constant 0 : index
    %c0_1 = arith.constant 0 : index
    %c0_2 = arith.constant 0 : index
    %c0_3 = arith.constant 0 : index
    %0 = vector.load %arg1[%c0, %c0_0, %c0_1, %c0_2, %c0_3] : memref<2x2x1x9x144xf32, #tpu.memory_space<vmem>>, vector<1x1x1x8x128xf32>
    %1 = vector.shape_cast %0 : vector<1x1x1x8x128xf32> to vector<1x8x128xf32>
    %c0_4 = arith.constant 0 : index
    %c0_5 = arith.constant 0 : index
    %2 = vector.load %arg2[%c0_4, %c0_5] : memref<9x128xf32, #tpu.memory_space<vmem>>, vector<1x128xf32>
    %3 = vector.shape_cast %2 : vector<1x128xf32> to vector<1x1x128xf32>
    %4 = vector.broadcast %3 : vector<1x1x128xf32> to vector<1x8x128xf32>
    %5 = arith.mulf %1, %4 : vector<1x8x128xf32>
    %c0_6 = arith.constant 0 : index
    %c1 = arith.constant 1 : index
    %c0_7 = arith.constant 0 : index
    %c0_8 = arith.constant 0 : index
    %c0_9 = arith.constant 0 : index
    %6 = vector.load %arg1[%c0_6, %c1, %c0_7, %c0_8, %c0_9] : memref<2x2x1x9x144xf32, #tpu.memory_space<vmem>>, vector<1x1x1x8x128xf32>
    %7 = vector.shape_cast %6 : vector<1x1x1x8x128xf32> to vector<1x8x128xf32>
    %c1_10 = arith.constant 1 : index
    %c0_11 = arith.constant 0 : index
    %8 = vector.load %arg2[%c1_10, %c0_11] : memref<9x128xf32, #tpu.memory_space<vmem>>, vector<1x128xf32>
    %9 = vector.shape_cast %8 : vector<1x128xf32> to vector<1x1x128xf32>
    %10 = vector.broadcast %9 : vector<1x1x128xf32> to vector<1x8x128xf32>
    %11 = arith.mulf %7, %10 : vector<1x8x128xf32>
    %12 = arith.addf %5, %11 : vector<1x8x128xf32>
    %c0_12 = arith.constant 0 : index
    %c0_13 = arith.constant 0 : index
    %c0_14 = arith.constant 0 : index
    %c0_15 = arith.constant 0 : index
    %c16 = arith.constant 16 : index
    %13 = vector.load %arg1[%c0_12, %c0_13, %c0_14, %c0_15, %c16] : memref<2x2x1x9x144xf32, #tpu.memory_space<vmem>>, vector<1x1x1x8x128xf32>
    %14 = vector.shape_cast %13 : vector<1x1x1x8x128xf32> to vector<1x8x128xf32>
    %c2 = arith.constant 2 : index
    %c0_16 = arith.constant 0 : index
    %15 = vector.load %arg2[%c2, %c0_16] : memref<9x128xf32, #tpu.memory_space<vmem>>, vector<1x128xf32>
    %16 = vector.shape_cast %15 : vector<1x128xf32> to vector<1x1x128xf32>
    %17 = vector.broadcast %16 : vector<1x1x128xf32> to vector<1x8x128xf32>
    %18 = arith.mulf %14, %17 : vector<1x8x128xf32>
    %19 = arith.addf %12, %18 : vector<1x8x128xf32>
    %c1_17 = arith.constant 1 : index
    %c0_18 = arith.constant 0 : index
    %c0_19 = arith.constant 0 : index
    %c0_20 = arith.constant 0 : index
    %c0_21 = arith.constant 0 : index
    %20 = vector.load %arg1[%c1_17, %c0_18, %c0_19, %c0_20, %c0_21] : memref<2x2x1x9x144xf32, #tpu.memory_space<vmem>>, vector<1x1x1x8x128xf32>
    %21 = vector.shape_cast %20 : vector<1x1x1x8x128xf32> to vector<1x8x128xf32>
    %c3 = arith.constant 3 : index
    %c0_22 = arith.constant 0 : index
    %22 = vector.load %arg2[%c3, %c0_22] : memref<9x128xf32, #tpu.memory_space<vmem>>, vector<1x128xf32>
    %23 = vector.shape_cast %22 : vector<1x128xf32> to vector<1x1x128xf32>
    %24 = vector.broadcast %23 : vector<1x1x128xf32> to vector<1x8x128xf32>
    %25 = arith.mulf %21, %24 : vector<1x8x128xf32>
    %26 = arith.addf %19, %25 : vector<1x8x128xf32>
    %c1_23 = arith.constant 1 : index
    %c1_24 = arith.constant 1 : index
    %c0_25 = arith.constant 0 : index
    %c0_26 = arith.constant 0 : index
    %c0_27 = arith.constant 0 : index
    %27 = vector.load %arg1[%c1_23, %c1_24, %c0_25, %c0_26, %c0_27] : memref<2x2x1x9x144xf32, #tpu.memory_space<vmem>>, vector<1x1x1x8x128xf32>
    %28 = vector.shape_cast %27 : vector<1x1x1x8x128xf32> to vector<1x8x128xf32>
    %c4 = arith.constant 4 : index
    %c0_28 = arith.constant 0 : index
    %29 = vector.load %arg2[%c4, %c0_28] : memref<9x128xf32, #tpu.memory_space<vmem>>, vector<1x128xf32>
    %30 = vector.shape_cast %29 : vector<1x128xf32> to vector<1x1x128xf32>
    %31 = vector.broadcast %30 : vector<1x1x128xf32> to vector<1x8x128xf32>
    %32 = arith.mulf %28, %31 : vector<1x8x128xf32>
    %33 = arith.addf %26, %32 : vector<1x8x128xf32>
    %c1_29 = arith.constant 1 : index
    %c0_30 = arith.constant 0 : index
    %c0_31 = arith.constant 0 : index
    %c0_32 = arith.constant 0 : index
    %c16_33 = arith.constant 16 : index
    %34 = vector.load %arg1[%c1_29, %c0_30, %c0_31, %c0_32, %c16_33] : memref<2x2x1x9x144xf32, #tpu.memory_space<vmem>>, vector<1x1x1x8x128xf32>
    %35 = vector.shape_cast %34 : vector<1x1x1x8x128xf32> to vector<1x8x128xf32>
    %c5 = arith.constant 5 : index
    %c0_34 = arith.constant 0 : index
    %36 = vector.load %arg2[%c5, %c0_34] : memref<9x128xf32, #tpu.memory_space<vmem>>, vector<1x128xf32>
    %37 = vector.shape_cast %36 : vector<1x128xf32> to vector<1x1x128xf32>
    %38 = vector.broadcast %37 : vector<1x1x128xf32> to vector<1x8x128xf32>
    %39 = arith.mulf %35, %38 : vector<1x8x128xf32>
    %40 = arith.addf %33, %39 : vector<1x8x128xf32>
    %c0_35 = arith.constant 0 : index
    %c0_36 = arith.constant 0 : index
    %c0_37 = arith.constant 0 : index
    %c1_38 = arith.constant 1 : index
    %c0_39 = arith.constant 0 : index
    %41 = vector.load %arg1[%c0_35, %c0_36, %c0_37, %c1_38, %c0_39] : memref<2x2x1x9x144xf32, #tpu.memory_space<vmem>>, vector<1x1x1x8x128xf32>
    %42 = vector.shape_cast %41 : vector<1x1x1x8x128xf32> to vector<1x8x128xf32>
    %c6 = arith.constant 6 : index
    %c0_40 = arith.constant 0 : index
    %43 = vector.load %arg2[%c6, %c0_40] : memref<9x128xf32, #tpu.memory_space<vmem>>, vector<1x128xf32>
    %44 = vector.shape_cast %43 : vector<1x128xf32> to vector<1x1x128xf32>
    %45 = vector.broadcast %44 : vector<1x1x128xf32> to vector<1x8x128xf32>
    %46 = arith.mulf %42, %45 : vector<1x8x128xf32>
    %47 = arith.addf %40, %46 : vector<1x8x128xf32>
    %c0_41 = arith.constant 0 : index
    %c1_42 = arith.constant 1 : index
    %c0_43 = arith.constant 0 : index
    %c1_44 = arith.constant 1 : index
    %c0_45 = arith.constant 0 : index
    %48 = vector.load %arg1[%c0_41, %c1_42, %c0_43, %c1_44, %c0_45] : memref<2x2x1x9x144xf32, #tpu.memory_space<vmem>>, vector<1x1x1x8x128xf32>
    %49 = vector.shape_cast %48 : vector<1x1x1x8x128xf32> to vector<1x8x128xf32>
    %c7 = arith.constant 7 : index
    %c0_46 = arith.constant 0 : index
    %50 = vector.load %arg2[%c7, %c0_46] : memref<9x128xf32, #tpu.memory_space<vmem>>, vector<1x128xf32>
    %51 = vector.shape_cast %50 : vector<1x128xf32> to vector<1x1x128xf32>
    %52 = vector.broadcast %51 : vector<1x1x128xf32> to vector<1x8x128xf32>
    %53 = arith.mulf %49, %52 : vector<1x8x128xf32>
    %54 = arith.addf %47, %53 : vector<1x8x128xf32>
    %c0_47 = arith.constant 0 : index
    %c0_48 = arith.constant 0 : index
    %c0_49 = arith.constant 0 : index
    %c1_50 = arith.constant 1 : index
    %c16_51 = arith.constant 16 : index
    %55 = vector.load %arg1[%c0_47, %c0_48, %c0_49, %c1_50, %c16_51] : memref<2x2x1x9x144xf32, #tpu.memory_space<vmem>>, vector<1x1x1x8x128xf32>
    %56 = vector.shape_cast %55 : vector<1x1x1x8x128xf32> to vector<1x8x128xf32>
    %c8 = arith.constant 8 : index
    %c0_52 = arith.constant 0 : index
    %57 = vector.load %arg2[%c8, %c0_52] : memref<9x128xf32, #tpu.memory_space<vmem>>, vector<1x128xf32>
    %58 = vector.shape_cast %57 : vector<1x128xf32> to vector<1x1x128xf32>
    %59 = vector.broadcast %58 : vector<1x1x128xf32> to vector<1x8x128xf32>
    %60 = arith.mulf %56, %59 : vector<1x8x128xf32>
    %61 = arith.addf %54, %60 : vector<1x8x128xf32>
    %c0_53 = arith.constant 0 : index
    %c1_54 = arith.constant 1 : index
    %c0_55 = arith.constant 0 : index
    %c0_56 = arith.constant 0 : index
    %c0_57 = arith.constant 0 : index
    %62 = vector.load %arg1[%c0_53, %c1_54, %c0_55, %c0_56, %c0_57] : memref<2x2x1x9x144xf32, #tpu.memory_space<vmem>>, vector<1x1x1x8x128xf32>
    %63 = vector.shape_cast %62 : vector<1x1x1x8x128xf32> to vector<1x8x128xf32>
    %c0_58 = arith.constant 0 : index
    %c0_59 = arith.constant 0 : index
    %64 = vector.load %arg2[%c0_58, %c0_59] : memref<9x128xf32, #tpu.memory_space<vmem>>, vector<1x128xf32>
    %65 = vector.shape_cast %64 : vector<1x128xf32> to vector<1x1x128xf32>
    %66 = vector.broadcast %65 : vector<1x1x128xf32> to vector<1x8x128xf32>
    %67 = arith.mulf %63, %66 : vector<1x8x128xf32>
    %c0_60 = arith.constant 0 : index
    %c0_61 = arith.constant 0 : index
    %c0_62 = arith.constant 0 : index
    %c0_63 = arith.constant 0 : index
    %c16_64 = arith.constant 16 : index
    %68 = vector.load %arg1[%c0_60, %c0_61, %c0_62, %c0_63, %c16_64] : memref<2x2x1x9x144xf32, #tpu.memory_space<vmem>>, vector<1x1x1x8x128xf32>
    %69 = vector.shape_cast %68 : vector<1x1x1x8x128xf32> to vector<1x8x128xf32>
    %c1_65 = arith.constant 1 : index
    %c0_66 = arith.constant 0 : index
    %70 = vector.load %arg2[%c1_65, %c0_66] : memref<9x128xf32, #tpu.memory_space<vmem>>, vector<1x128xf32>
    %71 = vector.shape_cast %70 : vector<1x128xf32> to vector<1x1x128xf32>
    %72 = vector.broadcast %71 : vector<1x1x128xf32> to vector<1x8x128xf32>
    %73 = arith.mulf %69, %72 : vector<1x8x128xf32>
    %74 = arith.addf %67, %73 : vector<1x8x128xf32>
    %c0_67 = arith.constant 0 : index
    %c1_68 = arith.constant 1 : index
    %c0_69 = arith.constant 0 : index
    %c0_70 = arith.constant 0 : index
    %c16_71 = arith.constant 16 : index
    %75 = vector.load %arg1[%c0_67, %c1_68, %c0_69, %c0_70, %c16_71] : memref<2x2x1x9x144xf32, #tpu.memory_space<vmem>>, vector<1x1x1x8x128xf32>
    %76 = vector.shape_cast %75 : vector<1x1x1x8x128xf32> to vector<1x8x128xf32>
    %c2_72 = arith.constant 2 : index
    %c0_73 = arith.constant 0 : index
    %77 = vector.load %arg2[%c2_72, %c0_73] : memref<9x128xf32, #tpu.memory_space<vmem>>, vector<1x128xf32>
    %78 = vector.shape_cast %77 : vector<1x128xf32> to vector<1x1x128xf32>
    %79 = vector.broadcast %78 : vector<1x1x128xf32> to vector<1x8x128xf32>
    %80 = arith.mulf %76, %79 : vector<1x8x128xf32>
    %81 = arith.addf %74, %80 : vector<1x8x128xf32>
    %c1_74 = arith.constant 1 : index
    %c1_75 = arith.constant 1 : index
    %c0_76 = arith.constant 0 : index
    %c0_77 = arith.constant 0 : index
    %c0_78 = arith.constant 0 : index
    %82 = vector.load %arg1[%c1_74, %c1_75, %c0_76, %c0_77, %c0_78] : memref<2x2x1x9x144xf32, #tpu.memory_space<vmem>>, vector<1x1x1x8x128xf32>
    %83 = vector.shape_cast %82 : vector<1x1x1x8x128xf32> to vector<1x8x128xf32>
    %c3_79 = arith.constant 3 : index
    %c0_80 = arith.constant 0 : index
    %84 = vector.load %arg2[%c3_79, %c0_80] : memref<9x128xf32, #tpu.memory_space<vmem>>, vector<1x128xf32>
    %85 = vector.shape_cast %84 : vector<1x128xf32> to vector<1x1x128xf32>
    %86 = vector.broadcast %85 : vector<1x1x128xf32> to vector<1x8x128xf32>
    %87 = arith.mulf %83, %86 : vector<1x8x128xf32>
    %88 = arith.addf %81, %87 : vector<1x8x128xf32>
    %c1_81 = arith.constant 1 : index
    %c0_82 = arith.constant 0 : index
    %c0_83 = arith.constant 0 : index
    %c0_84 = arith.constant 0 : index
    %c16_85 = arith.constant 16 : index
    %89 = vector.load %arg1[%c1_81, %c0_82, %c0_83, %c0_84, %c16_85] : memref<2x2x1x9x144xf32, #tpu.memory_space<vmem>>, vector<1x1x1x8x128xf32>
    %90 = vector.shape_cast %89 : vector<1x1x1x8x128xf32> to vector<1x8x128xf32>
    %c4_86 = arith.constant 4 : index
    %c0_87 = arith.constant 0 : index
    %91 = vector.load %arg2[%c4_86, %c0_87] : memref<9x128xf32, #tpu.memory_space<vmem>>, vector<1x128xf32>
    %92 = vector.shape_cast %91 : vector<1x128xf32> to vector<1x1x128xf32>
    %93 = vector.broadcast %92 : vector<1x1x128xf32> to vector<1x8x128xf32>
    %94 = arith.mulf %90, %93 : vector<1x8x128xf32>
    %95 = arith.addf %88, %94 : vector<1x8x128xf32>
    %c1_88 = arith.constant 1 : index
    %c1_89 = arith.constant 1 : index
    %c0_90 = arith.constant 0 : index
    %c0_91 = arith.constant 0 : index
    %c16_92 = arith.constant 16 : index
    %96 = vector.load %arg1[%c1_88, %c1_89, %c0_90, %c0_91, %c16_92] : memref<2x2x1x9x144xf32, #tpu.memory_space<vmem>>, vector<1x1x1x8x128xf32>
    %97 = vector.shape_cast %96 : vector<1x1x1x8x128xf32> to vector<1x8x128xf32>
    %c5_93 = arith.constant 5 : index
    %c0_94 = arith.constant 0 : index
    %98 = vector.load %arg2[%c5_93, %c0_94] : memref<9x128xf32, #tpu.memory_space<vmem>>, vector<1x128xf32>
    %99 = vector.shape_cast %98 : vector<1x128xf32> to vector<1x1x128xf32>
    %100 = vector.broadcast %99 : vector<1x1x128xf32> to vector<1x8x128xf32>
    %101 = arith.mulf %97, %100 : vector<1x8x128xf32>
    %102 = arith.addf %95, %101 : vector<1x8x128xf32>
    %c0_95 = arith.constant 0 : index
    %c1_96 = arith.constant 1 : index
    %c0_97 = arith.constant 0 : index
    %c1_98 = arith.constant 1 : index
    %c0_99 = arith.constant 0 : index
    %103 = vector.load %arg1[%c0_95, %c1_96, %c0_97, %c1_98, %c0_99] : memref<2x2x1x9x144xf32, #tpu.memory_space<vmem>>, vector<1x1x1x8x128xf32>
    %104 = vector.shape_cast %103 : vector<1x1x1x8x128xf32> to vector<1x8x128xf32>
    %c6_100 = arith.constant 6 : index
    %c0_101 = arith.constant 0 : index
    %105 = vector.load %arg2[%c6_100, %c0_101] : memref<9x128xf32, #tpu.memory_space<vmem>>, vector<1x128xf32>
    %106 = vector.shape_cast %105 : vector<1x128xf32> to vector<1x1x128xf32>
    %107 = vector.broadcast %106 : vector<1x1x128xf32> to vector<1x8x128xf32>
    %108 = arith.mulf %104, %107 : vector<1x8x128xf32>
    %109 = arith.addf %102, %108 : vector<1x8x128xf32>
    %c0_102 = arith.constant 0 : index
    %c0_103 = arith.constant 0 : index
    %c0_104 = arith.constant 0 : index
    %c1_105 = arith.constant 1 : index
    %c16_106 = arith.constant 16 : index
    %110 = vector.load %arg1[%c0_102, %c0_103, %c0_104, %c1_105, %c16_106] : memref<2x2x1x9x144xf32, #tpu.memory_space<vmem>>, vector<1x1x1x8x128xf32>
    %111 = vector.shape_cast %110 : vector<1x1x1x8x128xf32> to vector<1x8x128xf32>
    %c7_107 = arith.constant 7 : index
    %c0_108 = arith.constant 0 : index
    %112 = vector.load %arg2[%c7_107, %c0_108] : memref<9x128xf32, #tpu.memory_space<vmem>>, vector<1x128xf32>
    %113 = vector.shape_cast %112 : vector<1x128xf32> to vector<1x1x128xf32>
    %114 = vector.broadcast %113 : vector<1x1x128xf32> to vector<1x8x128xf32>
    %115 = arith.mulf %111, %114 : vector<1x8x128xf32>
    %116 = arith.addf %109, %115 : vector<1x8x128xf32>
    %c0_109 = arith.constant 0 : index
    %c1_110 = arith.constant 1 : index
    %c0_111 = arith.constant 0 : index
    %c1_112 = arith.constant 1 : index
    %c16_113 = arith.constant 16 : index
    %117 = vector.load %arg1[%c0_109, %c1_110, %c0_111, %c1_112, %c16_113] : memref<2x2x1x9x144xf32, #tpu.memory_space<vmem>>, vector<1x1x1x8x128xf32>
    %118 = vector.shape_cast %117 : vector<1x1x1x8x128xf32> to vector<1x8x128xf32>
    %c8_114 = arith.constant 8 : index
    %c0_115 = arith.constant 0 : index
    %119 = vector.load %arg2[%c8_114, %c0_115] : memref<9x128xf32, #tpu.memory_space<vmem>>, vector<1x128xf32>
    %120 = vector.shape_cast %119 : vector<1x128xf32> to vector<1x1x128xf32>
    %121 = vector.broadcast %120 : vector<1x1x128xf32> to vector<1x8x128xf32>
    %122 = arith.mulf %118, %121 : vector<1x8x128xf32>
    %123 = arith.addf %116, %122 : vector<1x8x128xf32>
    %124 = arith.maximumf %61, %123 : vector<1x8x128xf32>
    %c1_116 = arith.constant 1 : index
    %c0_117 = arith.constant 0 : index
    %c0_118 = arith.constant 0 : index
    %c0_119 = arith.constant 0 : index
    %c0_120 = arith.constant 0 : index
    %125 = vector.load %arg1[%c1_116, %c0_117, %c0_118, %c0_119, %c0_120] : memref<2x2x1x9x144xf32, #tpu.memory_space<vmem>>, vector<1x1x1x8x128xf32>
    %126 = vector.shape_cast %125 : vector<1x1x1x8x128xf32> to vector<1x8x128xf32>
    %c0_121 = arith.constant 0 : index
    %c0_122 = arith.constant 0 : index
    %127 = vector.load %arg2[%c0_121, %c0_122] : memref<9x128xf32, #tpu.memory_space<vmem>>, vector<1x128xf32>
    %128 = vector.shape_cast %127 : vector<1x128xf32> to vector<1x1x128xf32>
    %129 = vector.broadcast %128 : vector<1x1x128xf32> to vector<1x8x128xf32>
    %130 = arith.mulf %126, %129 : vector<1x8x128xf32>
    %c1_123 = arith.constant 1 : index
    %c1_124 = arith.constant 1 : index
    %c0_125 = arith.constant 0 : index
    %c0_126 = arith.constant 0 : index
    %c0_127 = arith.constant 0 : index
    %131 = vector.load %arg1[%c1_123, %c1_124, %c0_125, %c0_126, %c0_127] : memref<2x2x1x9x144xf32, #tpu.memory_space<vmem>>, vector<1x1x1x8x128xf32>
    %132 = vector.shape_cast %131 : vector<1x1x1x8x128xf32> to vector<1x8x128xf32>
    %c1_128 = arith.constant 1 : index
    %c0_129 = arith.constant 0 : index
    %133 = vector.load %arg2[%c1_128, %c0_129] : memref<9x128xf32, #tpu.memory_space<vmem>>, vector<1x128xf32>
    %134 = vector.shape_cast %133 : vector<1x128xf32> to vector<1x1x128xf32>
    %135 = vector.broadcast %134 : vector<1x1x128xf32> to vector<1x8x128xf32>
    %136 = arith.mulf %132, %135 : vector<1x8x128xf32>
    %137 = arith.addf %130, %136 : vector<1x8x128xf32>
    %c1_130 = arith.constant 1 : index
    %c0_131 = arith.constant 0 : index
    %c0_132 = arith.constant 0 : index
    %c0_133 = arith.constant 0 : index
    %c16_134 = arith.constant 16 : index
    %138 = vector.load %arg1[%c1_130, %c0_131, %c0_132, %c0_133, %c16_134] : memref<2x2x1x9x144xf32, #tpu.memory_space<vmem>>, vector<1x1x1x8x128xf32>
    %139 = vector.shape_cast %138 : vector<1x1x1x8x128xf32> to vector<1x8x128xf32>
    %c2_135 = arith.constant 2 : index
    %c0_136 = arith.constant 0 : index
    %140 = vector.load %arg2[%c2_135, %c0_136] : memref<9x128xf32, #tpu.memory_space<vmem>>, vector<1x128xf32>
    %141 = vector.shape_cast %140 : vector<1x128xf32> to vector<1x1x128xf32>
    %142 = vector.broadcast %141 : vector<1x1x128xf32> to vector<1x8x128xf32>
    %143 = arith.mulf %139, %142 : vector<1x8x128xf32>
    %144 = arith.addf %137, %143 : vector<1x8x128xf32>
    %c0_137 = arith.constant 0 : index
    %c0_138 = arith.constant 0 : index
    %c0_139 = arith.constant 0 : index
    %c1_140 = arith.constant 1 : index
    %c0_141 = arith.constant 0 : index
    %145 = vector.load %arg1[%c0_137, %c0_138, %c0_139, %c1_140, %c0_141] : memref<2x2x1x9x144xf32, #tpu.memory_space<vmem>>, vector<1x1x1x8x128xf32>
    %146 = vector.shape_cast %145 : vector<1x1x1x8x128xf32> to vector<1x8x128xf32>
    %c3_142 = arith.constant 3 : index
    %c0_143 = arith.constant 0 : index
    %147 = vector.load %arg2[%c3_142, %c0_143] : memref<9x128xf32, #tpu.memory_space<vmem>>, vector<1x128xf32>
    %148 = vector.shape_cast %147 : vector<1x128xf32> to vector<1x1x128xf32>
    %149 = vector.broadcast %148 : vector<1x1x128xf32> to vector<1x8x128xf32>
    %150 = arith.mulf %146, %149 : vector<1x8x128xf32>
    %151 = arith.addf %144, %150 : vector<1x8x128xf32>
    %c0_144 = arith.constant 0 : index
    %c1_145 = arith.constant 1 : index
    %c0_146 = arith.constant 0 : index
    %c1_147 = arith.constant 1 : index
    %c0_148 = arith.constant 0 : index
    %152 = vector.load %arg1[%c0_144, %c1_145, %c0_146, %c1_147, %c0_148] : memref<2x2x1x9x144xf32, #tpu.memory_space<vmem>>, vector<1x1x1x8x128xf32>
    %153 = vector.shape_cast %152 : vector<1x1x1x8x128xf32> to vector<1x8x128xf32>
    %c4_149 = arith.constant 4 : index
    %c0_150 = arith.constant 0 : index
    %154 = vector.load %arg2[%c4_149, %c0_150] : memref<9x128xf32, #tpu.memory_space<vmem>>, vector<1x128xf32>
    %155 = vector.shape_cast %154 : vector<1x128xf32> to vector<1x1x128xf32>
    %156 = vector.broadcast %155 : vector<1x1x128xf32> to vector<1x8x128xf32>
    %157 = arith.mulf %153, %156 : vector<1x8x128xf32>
    %158 = arith.addf %151, %157 : vector<1x8x128xf32>
    %c0_151 = arith.constant 0 : index
    %c0_152 = arith.constant 0 : index
    %c0_153 = arith.constant 0 : index
    %c1_154 = arith.constant 1 : index
    %c16_155 = arith.constant 16 : index
    %159 = vector.load %arg1[%c0_151, %c0_152, %c0_153, %c1_154, %c16_155] : memref<2x2x1x9x144xf32, #tpu.memory_space<vmem>>, vector<1x1x1x8x128xf32>
    %160 = vector.shape_cast %159 : vector<1x1x1x8x128xf32> to vector<1x8x128xf32>
    %c5_156 = arith.constant 5 : index
    %c0_157 = arith.constant 0 : index
    %161 = vector.load %arg2[%c5_156, %c0_157] : memref<9x128xf32, #tpu.memory_space<vmem>>, vector<1x128xf32>
    %162 = vector.shape_cast %161 : vector<1x128xf32> to vector<1x1x128xf32>
    %163 = vector.broadcast %162 : vector<1x1x128xf32> to vector<1x8x128xf32>
    %164 = arith.mulf %160, %163 : vector<1x8x128xf32>
    %165 = arith.addf %158, %164 : vector<1x8x128xf32>
    %c1_158 = arith.constant 1 : index
    %c0_159 = arith.constant 0 : index
    %c0_160 = arith.constant 0 : index
    %c1_161 = arith.constant 1 : index
    %c0_162 = arith.constant 0 : index
    %166 = vector.load %arg1[%c1_158, %c0_159, %c0_160, %c1_161, %c0_162] : memref<2x2x1x9x144xf32, #tpu.memory_space<vmem>>, vector<1x1x1x8x128xf32>
    %167 = vector.shape_cast %166 : vector<1x1x1x8x128xf32> to vector<1x8x128xf32>
    %c6_163 = arith.constant 6 : index
    %c0_164 = arith.constant 0 : index
    %168 = vector.load %arg2[%c6_163, %c0_164] : memref<9x128xf32, #tpu.memory_space<vmem>>, vector<1x128xf32>
    %169 = vector.shape_cast %168 : vector<1x128xf32> to vector<1x1x128xf32>
    %170 = vector.broadcast %169 : vector<1x1x128xf32> to vector<1x8x128xf32>
    %171 = arith.mulf %167, %170 : vector<1x8x128xf32>
    %172 = arith.addf %165, %171 : vector<1x8x128xf32>
    %c1_165 = arith.constant 1 : index
    %c1_166 = arith.constant 1 : index
    %c0_167 = arith.constant 0 : index
    %c1_168 = arith.constant 1 : index
    %c0_169 = arith.constant 0 : index
    %173 = vector.load %arg1[%c1_165, %c1_166, %c0_167, %c1_168, %c0_169] : memref<2x2x1x9x144xf32, #tpu.memory_space<vmem>>, vector<1x1x1x8x128xf32>
    %174 = vector.shape_cast %173 : vector<1x1x1x8x128xf32> to vector<1x8x128xf32>
    %c7_170 = arith.constant 7 : index
    %c0_171 = arith.constant 0 : index
    %175 = vector.load %arg2[%c7_170, %c0_171] : memref<9x128xf32, #tpu.memory_space<vmem>>, vector<1x128xf32>
    %176 = vector.shape_cast %175 : vector<1x128xf32> to vector<1x1x128xf32>
    %177 = vector.broadcast %176 : vector<1x1x128xf32> to vector<1x8x128xf32>
    %178 = arith.mulf %174, %177 : vector<1x8x128xf32>
    %179 = arith.addf %172, %178 : vector<1x8x128xf32>
    %c1_172 = arith.constant 1 : index
    %c0_173 = arith.constant 0 : index
    %c0_174 = arith.constant 0 : index
    %c1_175 = arith.constant 1 : index
    %c16_176 = arith.constant 16 : index
    %180 = vector.load %arg1[%c1_172, %c0_173, %c0_174, %c1_175, %c16_176] : memref<2x2x1x9x144xf32, #tpu.memory_space<vmem>>, vector<1x1x1x8x128xf32>
    %181 = vector.shape_cast %180 : vector<1x1x1x8x128xf32> to vector<1x8x128xf32>
    %c8_177 = arith.constant 8 : index
    %c0_178 = arith.constant 0 : index
    %182 = vector.load %arg2[%c8_177, %c0_178] : memref<9x128xf32, #tpu.memory_space<vmem>>, vector<1x128xf32>
    %183 = vector.shape_cast %182 : vector<1x128xf32> to vector<1x1x128xf32>
    %184 = vector.broadcast %183 : vector<1x1x128xf32> to vector<1x8x128xf32>
    %185 = arith.mulf %181, %184 : vector<1x8x128xf32>
    %186 = arith.addf %179, %185 : vector<1x8x128xf32>
    %187 = arith.maximumf %124, %186 : vector<1x8x128xf32>
    %c1_179 = arith.constant 1 : index
    %c1_180 = arith.constant 1 : index
    %c0_181 = arith.constant 0 : index
    %c0_182 = arith.constant 0 : index
    %c0_183 = arith.constant 0 : index
    %188 = vector.load %arg1[%c1_179, %c1_180, %c0_181, %c0_182, %c0_183] : memref<2x2x1x9x144xf32, #tpu.memory_space<vmem>>, vector<1x1x1x8x128xf32>
    %189 = vector.shape_cast %188 : vector<1x1x1x8x128xf32> to vector<1x8x128xf32>
    %c0_184 = arith.constant 0 : index
    %c0_185 = arith.constant 0 : index
    %190 = vector.load %arg2[%c0_184, %c0_185] : memref<9x128xf32, #tpu.memory_space<vmem>>, vector<1x128xf32>
    %191 = vector.shape_cast %190 : vector<1x128xf32> to vector<1x1x128xf32>
    %192 = vector.broadcast %191 : vector<1x1x128xf32> to vector<1x8x128xf32>
    %193 = arith.mulf %189, %192 : vector<1x8x128xf32>
    %c1_186 = arith.constant 1 : index
    %c0_187 = arith.constant 0 : index
    %c0_188 = arith.constant 0 : index
    %c0_189 = arith.constant 0 : index
    %c16_190 = arith.constant 16 : index
    %194 = vector.load %arg1[%c1_186, %c0_187, %c0_188, %c0_189, %c16_190] : memref<2x2x1x9x144xf32, #tpu.memory_space<vmem>>, vector<1x1x1x8x128xf32>
    %195 = vector.shape_cast %194 : vector<1x1x1x8x128xf32> to vector<1x8x128xf32>
    %c1_191 = arith.constant 1 : index
    %c0_192 = arith.constant 0 : index
    %196 = vector.load %arg2[%c1_191, %c0_192] : memref<9x128xf32, #tpu.memory_space<vmem>>, vector<1x128xf32>
    %197 = vector.shape_cast %196 : vector<1x128xf32> to vector<1x1x128xf32>
    %198 = vector.broadcast %197 : vector<1x1x128xf32> to vector<1x8x128xf32>
    %199 = arith.mulf %195, %198 : vector<1x8x128xf32>
    %200 = arith.addf %193, %199 : vector<1x8x128xf32>
    %c1_193 = arith.constant 1 : index
    %c1_194 = arith.constant 1 : index
    %c0_195 = arith.constant 0 : index
    %c0_196 = arith.constant 0 : index
    %c16_197 = arith.constant 16 : index
    %201 = vector.load %arg1[%c1_193, %c1_194, %c0_195, %c0_196, %c16_197] : memref<2x2x1x9x144xf32, #tpu.memory_space<vmem>>, vector<1x1x1x8x128xf32>
    %202 = vector.shape_cast %201 : vector<1x1x1x8x128xf32> to vector<1x8x128xf32>
    %c2_198 = arith.constant 2 : index
    %c0_199 = arith.constant 0 : index
    %203 = vector.load %arg2[%c2_198, %c0_199] : memref<9x128xf32, #tpu.memory_space<vmem>>, vector<1x128xf32>
    %204 = vector.shape_cast %203 : vector<1x128xf32> to vector<1x1x128xf32>
    %205 = vector.broadcast %204 : vector<1x1x128xf32> to vector<1x8x128xf32>
    %206 = arith.mulf %202, %205 : vector<1x8x128xf32>
    %207 = arith.addf %200, %206 : vector<1x8x128xf32>
    %c0_200 = arith.constant 0 : index
    %c1_201 = arith.constant 1 : index
    %c0_202 = arith.constant 0 : index
    %c1_203 = arith.constant 1 : index
    %c0_204 = arith.constant 0 : index
    %208 = vector.load %arg1[%c0_200, %c1_201, %c0_202, %c1_203, %c0_204] : memref<2x2x1x9x144xf32, #tpu.memory_space<vmem>>, vector<1x1x1x8x128xf32>
    %209 = vector.shape_cast %208 : vector<1x1x1x8x128xf32> to vector<1x8x128xf32>
    %c3_205 = arith.constant 3 : index
    %c0_206 = arith.constant 0 : index
    %210 = vector.load %arg2[%c3_205, %c0_206] : memref<9x128xf32, #tpu.memory_space<vmem>>, vector<1x128xf32>
    %211 = vector.shape_cast %210 : vector<1x128xf32> to vector<1x1x128xf32>
    %212 = vector.broadcast %211 : vector<1x1x128xf32> to vector<1x8x128xf32>
    %213 = arith.mulf %209, %212 : vector<1x8x128xf32>
    %214 = arith.addf %207, %213 : vector<1x8x128xf32>
    %c0_207 = arith.constant 0 : index
    %c0_208 = arith.constant 0 : index
    %c0_209 = arith.constant 0 : index
    %c1_210 = arith.constant 1 : index
    %c16_211 = arith.constant 16 : index
    %215 = vector.load %arg1[%c0_207, %c0_208, %c0_209, %c1_210, %c16_211] : memref<2x2x1x9x144xf32, #tpu.memory_space<vmem>>, vector<1x1x1x8x128xf32>
    %216 = vector.shape_cast %215 : vector<1x1x1x8x128xf32> to vector<1x8x128xf32>
    %c4_212 = arith.constant 4 : index
    %c0_213 = arith.constant 0 : index
    %217 = vector.load %arg2[%c4_212, %c0_213] : memref<9x128xf32, #tpu.memory_space<vmem>>, vector<1x128xf32>
    %218 = vector.shape_cast %217 : vector<1x128xf32> to vector<1x1x128xf32>
    %219 = vector.broadcast %218 : vector<1x1x128xf32> to vector<1x8x128xf32>
    %220 = arith.mulf %216, %219 : vector<1x8x128xf32>
    %221 = arith.addf %214, %220 : vector<1x8x128xf32>
    %c0_214 = arith.constant 0 : index
    %c1_215 = arith.constant 1 : index
    %c0_216 = arith.constant 0 : index
    %c1_217 = arith.constant 1 : index
    %c16_218 = arith.constant 16 : index
    %222 = vector.load %arg1[%c0_214, %c1_215, %c0_216, %c1_217, %c16_218] : memref<2x2x1x9x144xf32, #tpu.memory_space<vmem>>, vector<1x1x1x8x128xf32>
    %223 = vector.shape_cast %222 : vector<1x1x1x8x128xf32> to vector<1x8x128xf32>
    %c5_219 = arith.constant 5 : index
    %c0_220 = arith.constant 0 : index
    %224 = vector.load %arg2[%c5_219, %c0_220] : memref<9x128xf32, #tpu.memory_space<vmem>>, vector<1x128xf32>
    %225 = vector.shape_cast %224 : vector<1x128xf32> to vector<1x1x128xf32>
    %226 = vector.broadcast %225 : vector<1x1x128xf32> to vector<1x8x128xf32>
    %227 = arith.mulf %223, %226 : vector<1x8x128xf32>
    %228 = arith.addf %221, %227 : vector<1x8x128xf32>
    %c1_221 = arith.constant 1 : index
    %c1_222 = arith.constant 1 : index
    %c0_223 = arith.constant 0 : index
    %c1_224 = arith.constant 1 : index
    %c0_225 = arith.constant 0 : index
    %229 = vector.load %arg1[%c1_221, %c1_222, %c0_223, %c1_224, %c0_225] : memref<2x2x1x9x144xf32, #tpu.memory_space<vmem>>, vector<1x1x1x8x128xf32>
    %230 = vector.shape_cast %229 : vector<1x1x1x8x128xf32> to vector<1x8x128xf32>
    %c6_226 = arith.constant 6 : index
    %c0_227 = arith.constant 0 : index
    %231 = vector.load %arg2[%c6_226, %c0_227] : memref<9x128xf32, #tpu.memory_space<vmem>>, vector<1x128xf32>
    %232 = vector.shape_cast %231 : vector<1x128xf32> to vector<1x1x128xf32>
    %233 = vector.broadcast %232 : vector<1x1x128xf32> to vector<1x8x128xf32>
    %234 = arith.mulf %230, %233 : vector<1x8x128xf32>
    %235 = arith.addf %228, %234 : vector<1x8x128xf32>
    %c1_228 = arith.constant 1 : index
    %c0_229 = arith.constant 0 : index
    %c0_230 = arith.constant 0 : index
    %c1_231 = arith.constant 1 : index
    %c16_232 = arith.constant 16 : index
    %236 = vector.load %arg1[%c1_228, %c0_229, %c0_230, %c1_231, %c16_232] : memref<2x2x1x9x144xf32, #tpu.memory_space<vmem>>, vector<1x1x1x8x128xf32>
    %237 = vector.shape_cast %236 : vector<1x1x1x8x128xf32> to vector<1x8x128xf32>
    %c7_233 = arith.constant 7 : index
    %c0_234 = arith.constant 0 : index
    %238 = vector.load %arg2[%c7_233, %c0_234] : memref<9x128xf32, #tpu.memory_space<vmem>>, vector<1x128xf32>
    %239 = vector.shape_cast %238 : vector<1x128xf32> to vector<1x1x128xf32>
    %240 = vector.broadcast %239 : vector<1x1x128xf32> to vector<1x8x128xf32>
    %241 = arith.mulf %237, %240 : vector<1x8x128xf32>
    %242 = arith.addf %235, %241 : vector<1x8x128xf32>
    %c1_235 = arith.constant 1 : index
    %c1_236 = arith.constant 1 : index
    %c0_237 = arith.constant 0 : index
    %c1_238 = arith.constant 1 : index
    %c16_239 = arith.constant 16 : index
    %243 = vector.load %arg1[%c1_235, %c1_236, %c0_237, %c1_238, %c16_239] : memref<2x2x1x9x144xf32, #tpu.memory_space<vmem>>, vector<1x1x1x8x128xf32>
    %244 = vector.shape_cast %243 : vector<1x1x1x8x128xf32> to vector<1x8x128xf32>
    %c8_240 = arith.constant 8 : index
    %c0_241 = arith.constant 0 : index
    %245 = vector.load %arg2[%c8_240, %c0_241] : memref<9x128xf32, #tpu.memory_space<vmem>>, vector<1x128xf32>
    %246 = vector.shape_cast %245 : vector<1x128xf32> to vector<1x1x128xf32>
    %247 = vector.broadcast %246 : vector<1x1x128xf32> to vector<1x8x128xf32>
    %248 = arith.mulf %244, %247 : vector<1x8x128xf32>
    %249 = arith.addf %242, %248 : vector<1x8x128xf32>
    %250 = arith.maximumf %187, %249 : vector<1x8x128xf32>
    %c0_242 = arith.constant 0 : index
    %c0_243 = arith.constant 0 : index
    %251 = vector.load %arg3[%c0_242, %c0_243] : memref<1x128xf32, #tpu.memory_space<vmem>>, vector<1x128xf32>
    %252 = vector.shape_cast %251 : vector<1x128xf32> to vector<1x1x128xf32>
    %253 = vector.broadcast %252 : vector<1x1x128xf32> to vector<1x8x128xf32>
    %254 = arith.addf %250, %253 : vector<1x8x128xf32>
    %cst = arith.constant 0.000000e+00 : f32
    %255 = vector.broadcast %cst : f32 to vector<1x8x128xf32>
    %256 = arith.maximumf %254, %255 : vector<1x8x128xf32>
    %cst_244 = arith.constant 0.000000e+00 : f32
    %257 = vector.broadcast %cst_244 : f32 to vector<1x10x10x16xf32>
    %c0_245 = arith.constant 0 : index
    %c0_246 = arith.constant 0 : index
    %c0_247 = arith.constant 0 : index
    %c0_248 = arith.constant 0 : index
    %258 = vector.load %arg12[%c0_245, %c0_246, %c0_247, %c0_248] : memref<1x10x10x16xf32, #tpu.memory_space<vmem>>, vector<1x10x10x16xf32>
    tpu.vector_store %arg12[%c0_245, %c0_246, %c0_247, %c0_248], %257 {strides = array<i32>} : memref<1x10x10x16xf32, #tpu.memory_space<vmem>>, vector<1x10x10x16xf32>,
    %259 = vector.extract_strided_slice %256 {offsets = [0, 0, 0], sizes = [1, 8, 16], strides = [1, 1, 1]} : vector<1x8x128xf32> to vector<1x8x16xf32>
    %c0_249 = arith.constant 0 : index
    %c1_250 = arith.constant 1 : index
    %c1_251 = arith.constant 1 : index
    %c0_252 = arith.constant 0 : index
    %260 = vector.load %arg12[%c0_249, %c1_250, %c1_251, %c0_252] : memref<1x10x10x16xf32, #tpu.memory_space<vmem>>, vector<1x8x1x16xf32>
    %261 = vector.shape_cast %260 : vector<1x8x1x16xf32> to vector<1x8x16xf32>
    %262 = vector.shape_cast %259 : vector<1x8x16xf32> to vector<1x8x1x16xf32>
    tpu.vector_store %arg12[%c0_249, %c1_250, %c1_251, %c0_252], %262 {strides = array<i32>} : memref<1x10x10x16xf32, #tpu.memory_space<vmem>>, vector<1x8x1x16xf32>,
    %263 = vector.extract_strided_slice %256 {offsets = [0, 0, 16], sizes = [1, 8, 16], strides = [1, 1, 1]} : vector<1x8x128xf32> to vector<1x8x16xf32>
    %c0_253 = arith.constant 0 : index
    %c1_254 = arith.constant 1 : index
    %c2_255 = arith.constant 2 : index
    %c0_256 = arith.constant 0 : index
    %264 = vector.load %arg12[%c0_253, %c1_254, %c2_255, %c0_256] : memref<1x10x10x16xf32, #tpu.memory_space<vmem>>, vector<1x8x1x16xf32>
    %265 = vector.shape_cast %264 : vector<1x8x1x16xf32> to vector<1x8x16xf32>
    %266 = vector.shape_cast %263 : vector<1x8x16xf32> to vector<1x8x1x16xf32>
    tpu.vector_store %arg12[%c0_253, %c1_254, %c2_255, %c0_256], %266 {strides = array<i32>} : memref<1x10x10x16xf32, #tpu.memory_space<vmem>>, vector<1x8x1x16xf32>,
    %267 = vector.extract_strided_slice %256 {offsets = [0, 0, 32], sizes = [1, 8, 16], strides = [1, 1, 1]} : vector<1x8x128xf32> to vector<1x8x16xf32>
    %c0_257 = arith.constant 0 : index
    %c1_258 = arith.constant 1 : index
    %c3_259 = arith.constant 3 : index
    %c0_260 = arith.constant 0 : index
    %268 = vector.load %arg12[%c0_257, %c1_258, %c3_259, %c0_260] : memref<1x10x10x16xf32, #tpu.memory_space<vmem>>, vector<1x8x1x16xf32>
    %269 = vector.shape_cast %268 : vector<1x8x1x16xf32> to vector<1x8x16xf32>
    %270 = vector.shape_cast %267 : vector<1x8x16xf32> to vector<1x8x1x16xf32>
    tpu.vector_store %arg12[%c0_257, %c1_258, %c3_259, %c0_260], %270 {strides = array<i32>} : memref<1x10x10x16xf32, #tpu.memory_space<vmem>>, vector<1x8x1x16xf32>,
    %271 = vector.extract_strided_slice %256 {offsets = [0, 0, 48], sizes = [1, 8, 16], strides = [1, 1, 1]} : vector<1x8x128xf32> to vector<1x8x16xf32>
    %c0_261 = arith.constant 0 : index
    %c1_262 = arith.constant 1 : index
    %c4_263 = arith.constant 4 : index
    %c0_264 = arith.constant 0 : index
    %272 = vector.load %arg12[%c0_261, %c1_262, %c4_263, %c0_264] : memref<1x10x10x16xf32, #tpu.memory_space<vmem>>, vector<1x8x1x16xf32>
    %273 = vector.shape_cast %272 : vector<1x8x1x16xf32> to vector<1x8x16xf32>
    %274 = vector.shape_cast %271 : vector<1x8x16xf32> to vector<1x8x1x16xf32>
    tpu.vector_store %arg12[%c0_261, %c1_262, %c4_263, %c0_264], %274 {strides = array<i32>} : memref<1x10x10x16xf32, #tpu.memory_space<vmem>>, vector<1x8x1x16xf32>,
    %275 = vector.extract_strided_slice %256 {offsets = [0, 0, 64], sizes = [1, 8, 16], strides = [1, 1, 1]} : vector<1x8x128xf32> to vector<1x8x16xf32>
    %c0_265 = arith.constant 0 : index
    %c1_266 = arith.constant 1 : index
    %c5_267 = arith.constant 5 : index
    %c0_268 = arith.constant 0 : index
    %276 = vector.load %arg12[%c0_265, %c1_266, %c5_267, %c0_268] : memref<1x10x10x16xf32, #tpu.memory_space<vmem>>, vector<1x8x1x16xf32>
    %277 = vector.shape_cast %276 : vector<1x8x1x16xf32> to vector<1x8x16xf32>
    %278 = vector.shape_cast %275 : vector<1x8x16xf32> to vector<1x8x1x16xf32>
    tpu.vector_store %arg12[%c0_265, %c1_266, %c5_267, %c0_268], %278 {strides = array<i32>} : memref<1x10x10x16xf32, #tpu.memory_space<vmem>>, vector<1x8x1x16xf32>,
    %279 = vector.extract_strided_slice %256 {offsets = [0, 0, 80], sizes = [1, 8, 16], strides = [1, 1, 1]} : vector<1x8x128xf32> to vector<1x8x16xf32>
    %c0_269 = arith.constant 0 : index
    %c1_270 = arith.constant 1 : index
    %c6_271 = arith.constant 6 : index
    %c0_272 = arith.constant 0 : index
    %280 = vector.load %arg12[%c0_269, %c1_270, %c6_271, %c0_272] : memref<1x10x10x16xf32, #tpu.memory_space<vmem>>, vector<1x8x1x16xf32>
    %281 = vector.shape_cast %280 : vector<1x8x1x16xf32> to vector<1x8x16xf32>
    %282 = vector.shape_cast %279 : vector<1x8x16xf32> to vector<1x8x1x16xf32>
    tpu.vector_store %arg12[%c0_269, %c1_270, %c6_271, %c0_272], %282 {strides = array<i32>} : memref<1x10x10x16xf32, #tpu.memory_space<vmem>>, vector<1x8x1x16xf32>,
    %283 = vector.extract_strided_slice %256 {offsets = [0, 0, 96], sizes = [1, 8, 16], strides = [1, 1, 1]} : vector<1x8x128xf32> to vector<1x8x16xf32>
    %c0_273 = arith.constant 0 : index
    %c1_274 = arith.constant 1 : index
    %c7_275 = arith.constant 7 : index
    %c0_276 = arith.constant 0 : index
    %284 = vector.load %arg12[%c0_273, %c1_274, %c7_275, %c0_276] : memref<1x10x10x16xf32, #tpu.memory_space<vmem>>, vector<1x8x1x16xf32>
    %285 = vector.shape_cast %284 : vector<1x8x1x16xf32> to vector<1x8x16xf32>
    %286 = vector.shape_cast %283 : vector<1x8x16xf32> to vector<1x8x1x16xf32>
    tpu.vector_store %arg12[%c0_273, %c1_274, %c7_275, %c0_276], %286 {strides = array<i32>} : memref<1x10x10x16xf32, #tpu.memory_space<vmem>>, vector<1x8x1x16xf32>,
    %287 = vector.extract_strided_slice %256 {offsets = [0, 0, 112], sizes = [1, 8, 16], strides = [1, 1, 1]} : vector<1x8x128xf32> to vector<1x8x16xf32>
    %c0_277 = arith.constant 0 : index
    %c1_278 = arith.constant 1 : index
    %c8_279 = arith.constant 8 : index
    %c0_280 = arith.constant 0 : index
    %288 = vector.load %arg12[%c0_277, %c1_278, %c8_279, %c0_280] : memref<1x10x10x16xf32, #tpu.memory_space<vmem>>, vector<1x8x1x16xf32>
    %289 = vector.shape_cast %288 : vector<1x8x1x16xf32> to vector<1x8x16xf32>
    %290 = vector.shape_cast %287 : vector<1x8x16xf32> to vector<1x8x1x16xf32>
    tpu.vector_store %arg12[%c0_277, %c1_278, %c8_279, %c0_280], %290 {strides = array<i32>} : memref<1x10x10x16xf32, #tpu.memory_space<vmem>>, vector<1x8x1x16xf32>,
    %c0_281 = arith.constant 0 : index
    %c0_282 = arith.constant 0 : index
    %c0_283 = arith.constant 0 : index
    %c0_284 = arith.constant 0 : index
    %291 = vector.load %arg12[%c0_281, %c0_282, %c0_283, %c0_284] : memref<1x10x10x16xf32, #tpu.memory_space<vmem>>, vector<1x8x8x16xf32>
    %292 = vector.shape_cast %291 : vector<1x8x8x16xf32> to vector<64x16xf32>
    %c0_285 = arith.constant 0 : index
    %c0_286 = arith.constant 0 : index
    %c1_287 = arith.constant 1 : index
    %c0_288 = arith.constant 0 : index
    %293 = vector.load %arg12[%c0_285, %c0_286, %c1_287, %c0_288] : memref<1x10x10x16xf32, #tpu.memory_space<vmem>>, vector<1x8x8x16xf32>
    %294 = vector.shape_cast %293 : vector<1x8x8x16xf32> to vector<64x16xf32>
    %c0_289 = arith.constant 0 : index
    %c0_290 = arith.constant 0 : index
    %c2_291 = arith.constant 2 : index
    %c0_292 = arith.constant 0 : index
    %295 = vector.load %arg12[%c0_289, %c0_290, %c2_291, %c0_292] : memref<1x10x10x16xf32, #tpu.memory_space<vmem>>, vector<1x8x8x16xf32>
    %296 = vector.shape_cast %295 : vector<1x8x8x16xf32> to vector<64x16xf32>
    %c0_293 = arith.constant 0 : index
    %c1_294 = arith.constant 1 : index
    %c0_295 = arith.constant 0 : index
    %c0_296 = arith.constant 0 : index
    %297 = vector.load %arg12[%c0_293, %c1_294, %c0_295, %c0_296] : memref<1x10x10x16xf32, #tpu.memory_space<vmem>>, vector<1x8x8x16xf32>
    %298 = vector.shape_cast %297 : vector<1x8x8x16xf32> to vector<64x16xf32>
    %c0_297 = arith.constant 0 : index
    %c1_298 = arith.constant 1 : index
    %c1_299 = arith.constant 1 : index
    %c0_300 = arith.constant 0 : index
    %299 = vector.load %arg12[%c0_297, %c1_298, %c1_299, %c0_300] : memref<1x10x10x16xf32, #tpu.memory_space<vmem>>, vector<1x8x8x16xf32>
    %300 = vector.shape_cast %299 : vector<1x8x8x16xf32> to vector<64x16xf32>
    %c0_301 = arith.constant 0 : index
    %c1_302 = arith.constant 1 : index
    %c2_303 = arith.constant 2 : index
    %c0_304 = arith.constant 0 : index
    %301 = vector.load %arg12[%c0_301, %c1_302, %c2_303, %c0_304] : memref<1x10x10x16xf32, #tpu.memory_space<vmem>>, vector<1x8x8x16xf32>
    %302 = vector.shape_cast %301 : vector<1x8x8x16xf32> to vector<64x16xf32>
    %c0_305 = arith.constant 0 : index
    %c2_306 = arith.constant 2 : index
    %c0_307 = arith.constant 0 : index
    %c0_308 = arith.constant 0 : index
    %303 = vector.load %arg12[%c0_305, %c2_306, %c0_307, %c0_308] : memref<1x10x10x16xf32, #tpu.memory_space<vmem>>, vector<1x8x8x16xf32>
    %304 = vector.shape_cast %303 : vector<1x8x8x16xf32> to vector<64x16xf32>
    %c0_309 = arith.constant 0 : index
    %c2_310 = arith.constant 2 : index
    %c1_311 = arith.constant 1 : index
    %c0_312 = arith.constant 0 : index
    %305 = vector.load %arg12[%c0_309, %c2_310, %c1_311, %c0_312] : memref<1x10x10x16xf32, #tpu.memory_space<vmem>>, vector<1x8x8x16xf32>
    %306 = vector.shape_cast %305 : vector<1x8x8x16xf32> to vector<64x16xf32>
    %c0_313 = arith.constant 0 : index
    %c2_314 = arith.constant 2 : index
    %c2_315 = arith.constant 2 : index
    %c0_316 = arith.constant 0 : index
    %307 = vector.load %arg12[%c0_313, %c2_314, %c2_315, %c0_316] : memref<1x10x10x16xf32, #tpu.memory_space<vmem>>, vector<1x8x8x16xf32>
    %308 = vector.shape_cast %307 : vector<1x8x8x16xf32> to vector<64x16xf32>
    %309 = tpu.concatenate %292, %294, %296, %298, %300, %302, %304, %306, %308 in 1 : vector<64x16xf32>, vector<64x16xf32>, vector<64x16xf32>, vector<64x16xf32>, vector<64x16xf32>, vector<64x16xf32>, vector<64x16xf32>, vector<64x16xf32>, vector<64x16xf32> -> vector<64x144xf32>
    %310 = arith.truncf %309 : vector<64x144xf32> to vector<64x144xbf16>
    %c0_317 = arith.constant 0 : index
    %c0_318 = arith.constant 0 : index
    %311 = vector.load %arg4[%c0_317, %c0_318] : memref<144x32xbf16, #tpu.memory_space<vmem>>, vector<144x32xbf16>
    %cst_319 = arith.constant dense<0.000000e+00> : vector<64x32xf32>
    %312 = tpu.matmul %310, %311, %cst_319 {dimension_numbers = #tpu.dot_dimension_numbers<[1], [0], [0], [1], [0, 0, 1, 1], [], []>} : vector<64x144xbf16>, vector<144x32xbf16>, vector<64x32xf32> -> vector<64x32xf32>
    %c0_320 = arith.constant 0 : index
    %c0_321 = arith.constant 0 : index
    %313 = vector.load %arg5[%c0_320, %c0_321] : memref<1x32xf32, #tpu.memory_space<vmem>>, vector<1x32xf32>
    %314 = vector.broadcast %313 : vector<1x32xf32> to vector<64x32xf32>
    %315 = arith.addf %312, %314 : vector<64x32xf32>
    %cst_322 = arith.constant 0.000000e+00 : f32
    %316 = vector.broadcast %cst_322 : f32 to vector<64x32xf32>
    %317 = arith.maximumf %315, %316 : vector<64x32xf32>
    %318 = vector.shape_cast %317 : vector<64x32xf32> to vector<1x4x2x8x32xf32>
    %319 = vector.extract_strided_slice %318 {offsets = [0, 0, 0, 0, 0], sizes = [1, 4, 1, 8, 32], strides = [1, 1, 1, 1, 1]} : vector<1x4x2x8x32xf32> to vector<1x4x1x8x32xf32>
    %320 = vector.shape_cast %319 : vector<1x4x1x8x32xf32> to vector<1x4x8x32xf32>
    %321 = vector.extract_strided_slice %318 {offsets = [0, 0, 1, 0, 0], sizes = [1, 4, 1, 8, 32], strides = [1, 1, 1, 1, 1]} : vector<1x4x2x8x32xf32> to vector<1x4x1x8x32xf32>
    %322 = vector.shape_cast %321 : vector<1x4x1x8x32xf32> to vector<1x4x8x32xf32>
    %323 = arith.maximumf %320, %322 : vector<1x4x8x32xf32>
    %324 = vector.shape_cast %323 : vector<1x4x8x32xf32> to vector<1x4x4x2x32xf32>
    %325 = vector.extract_strided_slice %324 {offsets = [0, 0, 0, 0, 0], sizes = [1, 4, 4, 1, 32], strides = [1, 1, 1, 1, 1]} : vector<1x4x4x2x32xf32> to vector<1x4x4x1x32xf32>
    %326 = vector.shape_cast %325 : vector<1x4x4x1x32xf32> to vector<1x4x4x32xf32>
    %327 = vector.extract_strided_slice %324 {offsets = [0, 0, 0, 1, 0], sizes = [1, 4, 4, 1, 32], strides = [1, 1, 1, 1, 1]} : vector<1x4x4x2x32xf32> to vector<1x4x4x1x32xf32>
    %328 = vector.shape_cast %327 : vector<1x4x4x1x32xf32> to vector<1x4x4x32xf32>
    %329 = arith.maximumf %326, %328 : vector<1x4x4x32xf32>
    %330 = vector.extract_strided_slice %329 {offsets = [0, 0, 0, 0], sizes = [1, 1, 4, 32], strides = [1, 1, 1, 1]} : vector<1x4x4x32xf32> to vector<1x1x4x32xf32>
    %331 = vector.shape_cast %330 : vector<1x1x4x32xf32> to vector<1x4x32xf32>
    %332 = vector.shape_cast %331 : vector<1x4x32xf32> to vector<4x32xf32>
    %333 = vector.extract_strided_slice %329 {offsets = [0, 1, 0, 0], sizes = [1, 1, 4, 32], strides = [1, 1, 1, 1]} : vector<1x4x4x32xf32> to vector<1x1x4x32xf32>
    %334 = vector.shape_cast %333 : vector<1x1x4x32xf32> to vector<1x4x32xf32>
    %335 = vector.shape_cast %334 : vector<1x4x32xf32> to vector<4x32xf32>
    %336 = vector.extract_strided_slice %329 {offsets = [0, 2, 0, 0], sizes = [1, 1, 4, 32], strides = [1, 1, 1, 1]} : vector<1x4x4x32xf32> to vector<1x1x4x32xf32>
    %337 = vector.shape_cast %336 : vector<1x1x4x32xf32> to vector<1x4x32xf32>
    %338 = vector.shape_cast %337 : vector<1x4x32xf32> to vector<4x32xf32>
    %339 = vector.extract_strided_slice %329 {offsets = [0, 3, 0, 0], sizes = [1, 1, 4, 32], strides = [1, 1, 1, 1]} : vector<1x4x4x32xf32> to vector<1x1x4x32xf32>
    %340 = vector.shape_cast %339 : vector<1x1x4x32xf32> to vector<1x4x32xf32>
    %341 = vector.shape_cast %340 : vector<1x4x32xf32> to vector<4x32xf32>
    %342 = tpu.concatenate %332, %335, %338, %341 in 1 : vector<4x32xf32>, vector<4x32xf32>, vector<4x32xf32>, vector<4x32xf32> -> vector<4x128xf32>
    %343 = arith.truncf %342 : vector<4x128xf32> to vector<4x128xbf16>
    %c0_323 = arith.constant 0 : index
    %c0_324 = arith.constant 0 : index
    %344 = vector.load %arg6[%c0_323, %c0_324] : memref<128x512xbf16, #tpu.memory_space<vmem>>, vector<128x512xbf16>
    %cst_325 = arith.constant dense<0.000000e+00> : vector<4x512xf32>
    %345 = tpu.matmul %343, %344, %cst_325 {dimension_numbers = #tpu.dot_dimension_numbers<[1], [0], [0], [1], [0, 0, 1, 1], [], []>} : vector<4x128xbf16>, vector<128x512xbf16>, vector<4x512xf32> -> vector<4x512xf32>
    %c0_326 = arith.constant 0 : index
    %c0_327 = arith.constant 0 : index
    %346 = vector.load %arg8[%c0_326, %c0_327] : memref<1x512xf32, #tpu.memory_space<vmem>>, vector<1x512xf32>
    %347 = vector.broadcast %346 : vector<1x512xf32> to vector<4x512xf32>
    %348 = arith.addf %345, %347 : vector<4x512xf32>
    %349 = vector.shape_cast %348 : vector<4x512xf32> to vector<1x4x512xf32>
    %c0_328 = arith.constant 0 : index
    %c0_329 = arith.constant 0 : index
    %c0_330 = arith.constant 0 : index
    %350 = vector.load %arg13[%c0_328, %c0_329, %c0_330] : memref<1x4x512xf32, #tpu.memory_space<vmem>>, vector<1x4x512xf32>
    tpu.vector_store %arg13[%c0_328, %c0_329, %c0_330], %349 {strides = array<i32>} : memref<1x4x512xf32, #tpu.memory_space<vmem>>, vector<1x4x512xf32>,
    %c0_331 = arith.constant 0 : index
    %c0_332 = arith.constant 0 : index
    %351 = vector.load %arg7[%c0_331, %c0_332] : memref<128x512xbf16, #tpu.memory_space<vmem>>, vector<128x512xbf16>
    %cst_333 = arith.constant 0.000000e+00 : f32
    %352 = vector.broadcast %cst_333 : f32 to vector<1x128xf32>
    %cst_334 = arith.constant 0.000000e+00 : f32
    %353 = vector.broadcast %cst_334 : f32 to vector<1x128xf32>
    %c0_335 = arith.constant 0 : index
    %c0_336 = arith.constant 0 : index
    %c0_337 = arith.constant 0 : index
    %354 = vector.load %arg13[%c0_335, %c0_336, %c0_337] : memref<1x4x512xf32, #tpu.memory_space<vmem>>, vector<1x1x512xf32>
    %355 = vector.shape_cast %354 : vector<1x1x512xf32> to vector<1x512xf32>
    %356 = arith.truncf %352 : vector<1x128xf32> to vector<1x128xbf16>
    %cst_338 = arith.constant dense<0.000000e+00> : vector<1x512xf32>
    %357 = tpu.matmul %356, %351, %cst_338 {dimension_numbers = #tpu.dot_dimension_numbers<[1], [0], [0], [1], [0, 0, 1, 1], [], []>} : vector<1x128xbf16>, vector<128x512xbf16>, vector<1x512xf32> -> vector<1x512xf32>
    %358 = arith.addf %355, %357 : vector<1x512xf32>
    %359 = vector.extract_strided_slice %358 {offsets = [0, 0], sizes = [1, 128], strides = [1, 1]} : vector<1x512xf32> to vector<1x128xf32>
    %cst_339 = arith.constant 0.000000e+00 : f32
    %360 = vector.broadcast %cst_339 : f32 to vector<1x128xf32>
    %361 = arith.subf %360, %359 : vector<1x128xf32>
    %362 = math.exp %361 : vector<1x128xf32>
    %cst_340 = arith.constant 1.000000e+00 : f32
    %363 = vector.broadcast %cst_340 : f32 to vector<1x128xf32>
    %364 = arith.addf %363, %362 : vector<1x128xf32>
    %cst_341 = arith.constant 1.000000e+00 : f32
    %365 = vector.broadcast %cst_341 : f32 to vector<1x128xf32>
    %366 = arith.divf %365, %364 : vector<1x128xf32>
    %367 = vector.extract_strided_slice %358 {offsets = [0, 128], sizes = [1, 128], strides = [1, 1]} : vector<1x512xf32> to vector<1x128xf32>
    %cst_342 = arith.constant 0.000000e+00 : f32
    %368 = vector.broadcast %cst_342 : f32 to vector<1x128xf32>
    %369 = arith.subf %368, %367 : vector<1x128xf32>
    %370 = math.exp %369 : vector<1x128xf32>
    %cst_343 = arith.constant 1.000000e+00 : f32
    %371 = vector.broadcast %cst_343 : f32 to vector<1x128xf32>
    %372 = arith.addf %371, %370 : vector<1x128xf32>
    %cst_344 = arith.constant 1.000000e+00 : f32
    %373 = vector.broadcast %cst_344 : f32 to vector<1x128xf32>
    %374 = arith.divf %373, %372 : vector<1x128xf32>
    %375 = vector.extract_strided_slice %358 {offsets = [0, 256], sizes = [1, 128], strides = [1, 1]} : vector<1x512xf32> to vector<1x128xf32>
    %376 = math.tanh %375 : vector<1x128xf32>
    %377 = vector.extract_strided_slice %358 {offsets = [0, 384], sizes = [1, 128], strides = [1, 1]} : vector<1x512xf32> to vector<1x128xf32>
    %cst_345 = arith.constant 0.000000e+00 : f32
    %378 = vector.broadcast %cst_345 : f32 to vector<1x128xf32>
    %379 = arith.subf %378, %377 : vector<1x128xf32>
    %380 = math.exp %379 : vector<1x128xf32>
    %cst_346 = arith.constant 1.000000e+00 : f32
    %381 = vector.broadcast %cst_346 : f32 to vector<1x128xf32>
    %382 = arith.addf %381, %380 : vector<1x128xf32>
    %cst_347 = arith.constant 1.000000e+00 : f32
    %383 = vector.broadcast %cst_347 : f32 to vector<1x128xf32>
    %384 = arith.divf %383, %382 : vector<1x128xf32>
    %385 = arith.mulf %374, %353 : vector<1x128xf32>
    %386 = arith.mulf %366, %376 : vector<1x128xf32>
    %387 = arith.addf %385, %386 : vector<1x128xf32>
    %388 = math.tanh %387 : vector<1x128xf32>
    %389 = arith.mulf %384, %388 : vector<1x128xf32>
    %c0_348 = arith.constant 0 : index
    %c1_349 = arith.constant 1 : index
    %c0_350 = arith.constant 0 : index
    %390 = vector.load %arg13[%c0_348, %c1_349, %c0_350] : memref<1x4x512xf32, #tpu.memory_space<vmem>>, vector<1x1x512xf32>
    %391 = vector.shape_cast %390 : vector<1x1x512xf32> to vector<1x512xf32>
    %392 = arith.truncf %389 : vector<1x128xf32> to vector<1x128xbf16>
    %cst_351 = arith.constant dense<0.000000e+00> : vector<1x512xf32>
    %393 = tpu.matmul %392, %351, %cst_351 {dimension_numbers = #tpu.dot_dimension_numbers<[1], [0], [0], [1], [0, 0, 1, 1], [], []>} : vector<1x128xbf16>, vector<128x512xbf16>, vector<1x512xf32> -> vector<1x512xf32>
    %394 = arith.addf %391, %393 : vector<1x512xf32>
    %395 = vector.extract_strided_slice %394 {offsets = [0, 0], sizes = [1, 128], strides = [1, 1]} : vector<1x512xf32> to vector<1x128xf32>
    %cst_352 = arith.constant 0.000000e+00 : f32
    %396 = vector.broadcast %cst_352 : f32 to vector<1x128xf32>
    %397 = arith.subf %396, %395 : vector<1x128xf32>
    %398 = math.exp %397 : vector<1x128xf32>
    %cst_353 = arith.constant 1.000000e+00 : f32
    %399 = vector.broadcast %cst_353 : f32 to vector<1x128xf32>
    %400 = arith.addf %399, %398 : vector<1x128xf32>
    %cst_354 = arith.constant 1.000000e+00 : f32
    %401 = vector.broadcast %cst_354 : f32 to vector<1x128xf32>
    %402 = arith.divf %401, %400 : vector<1x128xf32>
    %403 = vector.extract_strided_slice %394 {offsets = [0, 128], sizes = [1, 128], strides = [1, 1]} : vector<1x512xf32> to vector<1x128xf32>
    %cst_355 = arith.constant 0.000000e+00 : f32
    %404 = vector.broadcast %cst_355 : f32 to vector<1x128xf32>
    %405 = arith.subf %404, %403 : vector<1x128xf32>
    %406 = math.exp %405 : vector<1x128xf32>
    %cst_356 = arith.constant 1.000000e+00 : f32
    %407 = vector.broadcast %cst_356 : f32 to vector<1x128xf32>
    %408 = arith.addf %407, %406 : vector<1x128xf32>
    %cst_357 = arith.constant 1.000000e+00 : f32
    %409 = vector.broadcast %cst_357 : f32 to vector<1x128xf32>
    %410 = arith.divf %409, %408 : vector<1x128xf32>
    %411 = vector.extract_strided_slice %394 {offsets = [0, 256], sizes = [1, 128], strides = [1, 1]} : vector<1x512xf32> to vector<1x128xf32>
    %412 = math.tanh %411 : vector<1x128xf32>
    %413 = vector.extract_strided_slice %394 {offsets = [0, 384], sizes = [1, 128], strides = [1, 1]} : vector<1x512xf32> to vector<1x128xf32>
    %cst_358 = arith.constant 0.000000e+00 : f32
    %414 = vector.broadcast %cst_358 : f32 to vector<1x128xf32>
    %415 = arith.subf %414, %413 : vector<1x128xf32>
    %416 = math.exp %415 : vector<1x128xf32>
    %cst_359 = arith.constant 1.000000e+00 : f32
    %417 = vector.broadcast %cst_359 : f32 to vector<1x128xf32>
    %418 = arith.addf %417, %416 : vector<1x128xf32>
    %cst_360 = arith.constant 1.000000e+00 : f32
    %419 = vector.broadcast %cst_360 : f32 to vector<1x128xf32>
    %420 = arith.divf %419, %418 : vector<1x128xf32>
    %421 = arith.mulf %410, %387 : vector<1x128xf32>
    %422 = arith.mulf %402, %412 : vector<1x128xf32>
    %423 = arith.addf %421, %422 : vector<1x128xf32>
    %424 = math.tanh %423 : vector<1x128xf32>
    %425 = arith.mulf %420, %424 : vector<1x128xf32>
    %c0_361 = arith.constant 0 : index
    %c2_362 = arith.constant 2 : index
    %c0_363 = arith.constant 0 : index
    %426 = vector.load %arg13[%c0_361, %c2_362, %c0_363] : memref<1x4x512xf32, #tpu.memory_space<vmem>>, vector<1x1x512xf32>
    %427 = vector.shape_cast %426 : vector<1x1x512xf32> to vector<1x512xf32>
    %428 = arith.truncf %425 : vector<1x128xf32> to vector<1x128xbf16>
    %cst_364 = arith.constant dense<0.000000e+00> : vector<1x512xf32>
    %429 = tpu.matmul %428, %351, %cst_364 {dimension_numbers = #tpu.dot_dimension_numbers<[1], [0], [0], [1], [0, 0, 1, 1], [], []>} : vector<1x128xbf16>, vector<128x512xbf16>, vector<1x512xf32> -> vector<1x512xf32>
    %430 = arith.addf %427, %429 : vector<1x512xf32>
    %431 = vector.extract_strided_slice %430 {offsets = [0, 0], sizes = [1, 128], strides = [1, 1]} : vector<1x512xf32> to vector<1x128xf32>
    %cst_365 = arith.constant 0.000000e+00 : f32
    %432 = vector.broadcast %cst_365 : f32 to vector<1x128xf32>
    %433 = arith.subf %432, %431 : vector<1x128xf32>
    %434 = math.exp %433 : vector<1x128xf32>
    %cst_366 = arith.constant 1.000000e+00 : f32
    %435 = vector.broadcast %cst_366 : f32 to vector<1x128xf32>
    %436 = arith.addf %435, %434 : vector<1x128xf32>
    %cst_367 = arith.constant 1.000000e+00 : f32
    %437 = vector.broadcast %cst_367 : f32 to vector<1x128xf32>
    %438 = arith.divf %437, %436 : vector<1x128xf32>
    %439 = vector.extract_strided_slice %430 {offsets = [0, 128], sizes = [1, 128], strides = [1, 1]} : vector<1x512xf32> to vector<1x128xf32>
    %cst_368 = arith.constant 0.000000e+00 : f32
    %440 = vector.broadcast %cst_368 : f32 to vector<1x128xf32>
    %441 = arith.subf %440, %439 : vector<1x128xf32>
    %442 = math.exp %441 : vector<1x128xf32>
    %cst_369 = arith.constant 1.000000e+00 : f32
    %443 = vector.broadcast %cst_369 : f32 to vector<1x128xf32>
    %444 = arith.addf %443, %442 : vector<1x128xf32>
    %cst_370 = arith.constant 1.000000e+00 : f32
    %445 = vector.broadcast %cst_370 : f32 to vector<1x128xf32>
    %446 = arith.divf %445, %444 : vector<1x128xf32>
    %447 = vector.extract_strided_slice %430 {offsets = [0, 256], sizes = [1, 128], strides = [1, 1]} : vector<1x512xf32> to vector<1x128xf32>
    %448 = math.tanh %447 : vector<1x128xf32>
    %449 = vector.extract_strided_slice %430 {offsets = [0, 384], sizes = [1, 128], strides = [1, 1]} : vector<1x512xf32> to vector<1x128xf32>
    %cst_371 = arith.constant 0.000000e+00 : f32
    %450 = vector.broadcast %cst_371 : f32 to vector<1x128xf32>
    %451 = arith.subf %450, %449 : vector<1x128xf32>
    %452 = math.exp %451 : vector<1x128xf32>
    %cst_372 = arith.constant 1.000000e+00 : f32
    %453 = vector.broadcast %cst_372 : f32 to vector<1x128xf32>
    %454 = arith.addf %453, %452 : vector<1x128xf32>
    %cst_373 = arith.constant 1.000000e+00 : f32
    %455 = vector.broadcast %cst_373 : f32 to vector<1x128xf32>
    %456 = arith.divf %455, %454 : vector<1x128xf32>
    %457 = arith.mulf %446, %423 : vector<1x128xf32>
    %458 = arith.mulf %438, %448 : vector<1x128xf32>
    %459 = arith.addf %457, %458 : vector<1x128xf32>
    %460 = math.tanh %459 : vector<1x128xf32>
    %461 = arith.mulf %456, %460 : vector<1x128xf32>
    %c0_374 = arith.constant 0 : index
    %c3_375 = arith.constant 3 : index
    %c0_376 = arith.constant 0 : index
    %462 = vector.load %arg13[%c0_374, %c3_375, %c0_376] : memref<1x4x512xf32, #tpu.memory_space<vmem>>, vector<1x1x512xf32>
    %463 = vector.shape_cast %462 : vector<1x1x512xf32> to vector<1x512xf32>
    %464 = arith.truncf %461 : vector<1x128xf32> to vector<1x128xbf16>
    %cst_377 = arith.constant dense<0.000000e+00> : vector<1x512xf32>
    %465 = tpu.matmul %464, %351, %cst_377 {dimension_numbers = #tpu.dot_dimension_numbers<[1], [0], [0], [1], [0, 0, 1, 1], [], []>} : vector<1x128xbf16>, vector<128x512xbf16>, vector<1x512xf32> -> vector<1x512xf32>
    %466 = arith.addf %463, %465 : vector<1x512xf32>
    %467 = vector.extract_strided_slice %466 {offsets = [0, 0], sizes = [1, 128], strides = [1, 1]} : vector<1x512xf32> to vector<1x128xf32>
    %cst_378 = arith.constant 0.000000e+00 : f32
    %468 = vector.broadcast %cst_378 : f32 to vector<1x128xf32>
    %469 = arith.subf %468, %467 : vector<1x128xf32>
    %470 = math.exp %469 : vector<1x128xf32>
    %cst_379 = arith.constant 1.000000e+00 : f32
    %471 = vector.broadcast %cst_379 : f32 to vector<1x128xf32>
    %472 = arith.addf %471, %470 : vector<1x128xf32>
    %cst_380 = arith.constant 1.000000e+00 : f32
    %473 = vector.broadcast %cst_380 : f32 to vector<1x128xf32>
    %474 = arith.divf %473, %472 : vector<1x128xf32>
    %475 = vector.extract_strided_slice %466 {offsets = [0, 128], sizes = [1, 128], strides = [1, 1]} : vector<1x512xf32> to vector<1x128xf32>
    %cst_381 = arith.constant 0.000000e+00 : f32
    %476 = vector.broadcast %cst_381 : f32 to vector<1x128xf32>
    %477 = arith.subf %476, %475 : vector<1x128xf32>
    %478 = math.exp %477 : vector<1x128xf32>
    %cst_382 = arith.constant 1.000000e+00 : f32
    %479 = vector.broadcast %cst_382 : f32 to vector<1x128xf32>
    %480 = arith.addf %479, %478 : vector<1x128xf32>
    %cst_383 = arith.constant 1.000000e+00 : f32
    %481 = vector.broadcast %cst_383 : f32 to vector<1x128xf32>
    %482 = arith.divf %481, %480 : vector<1x128xf32>
    %483 = vector.extract_strided_slice %466 {offsets = [0, 256], sizes = [1, 128], strides = [1, 1]} : vector<1x512xf32> to vector<1x128xf32>
    %484 = math.tanh %483 : vector<1x128xf32>
    %485 = vector.extract_strided_slice %466 {offsets = [0, 384], sizes = [1, 128], strides = [1, 1]} : vector<1x512xf32> to vector<1x128xf32>
    %cst_384 = arith.constant 0.000000e+00 : f32
    %486 = vector.broadcast %cst_384 : f32 to vector<1x128xf32>
    %487 = arith.subf %486, %485 : vector<1x128xf32>
    %488 = math.exp %487 : vector<1x128xf32>
    %cst_385 = arith.constant 1.000000e+00 : f32
    %489 = vector.broadcast %cst_385 : f32 to vector<1x128xf32>
    %490 = arith.addf %489, %488 : vector<1x128xf32>
    %cst_386 = arith.constant 1.000000e+00 : f32
    %491 = vector.broadcast %cst_386 : f32 to vector<1x128xf32>
    %492 = arith.divf %491, %490 : vector<1x128xf32>
    %493 = arith.mulf %482, %459 : vector<1x128xf32>
    %494 = arith.mulf %474, %484 : vector<1x128xf32>
    %495 = arith.addf %493, %494 : vector<1x128xf32>
    %496 = math.tanh %495 : vector<1x128xf32>
    %497 = arith.mulf %492, %496 : vector<1x128xf32>
    %c0_387 = arith.constant 0 : index
    %c0_388 = arith.constant 0 : index
    %498 = vector.load %arg9[%c0_387, %c0_388] : memref<128x128xf32, #tpu.memory_space<vmem>>, vector<128x128xf32>
    %cst_389 = arith.constant dense<0.000000e+00> : vector<1x128xf32>
    %499 = tpu.matmul %497, %498, %cst_389 {dimension_numbers = #tpu.dot_dimension_numbers<[1], [0], [0], [1], [0, 0, 1, 1], [], []>} : vector<1x128xf32>, vector<128x128xf32>, vector<1x128xf32> -> vector<1x128xf32>
    %c0_390 = arith.constant 0 : index
    %c0_391 = arith.constant 0 : index
    %500 = vector.load %arg10[%c0_390, %c0_391] : memref<1x128xf32, #tpu.memory_space<vmem>>, vector<1x128xf32>
    %501 = arith.addf %499, %500 : vector<1x128xf32>
    %502 = vector.shape_cast %501 : vector<1x128xf32> to vector<1x1x128xf32>
    %c0_392 = arith.constant 0 : index
    %c0_393 = arith.constant 0 : index
    %c0_394 = arith.constant 0 : index
    %503 = vector.load %arg11[%c0_392, %c0_393, %c0_394] : memref<1x1x128xf32, #tpu.memory_space<vmem>>, vector<1x1x128xf32>
    tpu.vector_store %arg11[%c0_392, %c0_393, %c0_394], %502 {strides = array<i32>} : memref<1x1x128xf32, #tpu.memory_space<vmem>>, vector<1x1x128xf32>,
    return
  }
  func.func @transform_0(%arg0: i32) -> (i32, i32, i32, i32, i32) {
    %c0_i32 = arith.constant 0 : i32
    %c0_i32_0 = arith.constant 0 : i32
    %c0_i32_1 = arith.constant 0 : i32
    %c0_i32_2 = arith.constant 0 : i32
    %c0_i32_3 = arith.constant 0 : i32
    return %c0_i32, %c0_i32_0, %arg0, %c0_i32_1, %c0_i32_2 : i32, i32, i32, i32, i32
  }
  func.func @transform_1(%arg0: i32) -> (i32, i32) {
    %c0_i32 = arith.constant 0 : i32
    %c0_i32_0 = arith.constant 0 : i32
    %c0_i32_1 = arith.constant 0 : i32
    return %c0_i32, %c0_i32_0 : i32, i32
  }
  func.func @transform_2(%arg0: i32) -> (i32, i32) {
    %c0_i32 = arith.constant 0 : i32
    %c0_i32_0 = arith.constant 0 : i32
    %c0_i32_1 = arith.constant 0 : i32
    return %c0_i32, %c0_i32_0 : i32, i32
  }
  func.func @transform_3(%arg0: i32) -> (i32, i32) {
    %c0_i32 = arith.constant 0 : i32
    %c0_i32_0 = arith.constant 0 : i32
    %c0_i32_1 = arith.constant 0 : i32
    return %c0_i32, %c0_i32_0 : i32, i32
  }
  func.func @transform_4(%arg0: i32) -> (i32, i32) {
    %c0_i32 = arith.constant 0 : i32
    %c0_i32_0 = arith.constant 0 : i32
    %c0_i32_1 = arith.constant 0 : i32
    return %c0_i32, %c0_i32_0 : i32, i32
  }
  func.func @transform_5(%arg0: i32) -> (i32, i32) {
    %c0_i32 = arith.constant 0 : i32
    %c0_i32_0 = arith.constant 0 : i32
    %c0_i32_1 = arith.constant 0 : i32
    return %c0_i32, %c0_i32_0 : i32, i32
  }
  func.func @transform_6(%arg0: i32) -> (i32, i32) {
    %c0_i32 = arith.constant 0 : i32
    %c0_i32_0 = arith.constant 0 : i32
    %c0_i32_1 = arith.constant 0 : i32
    return %c0_i32, %c0_i32_0 : i32, i32
  }
  func.func @transform_7(%arg0: i32) -> (i32, i32) {
    %c0_i32 = arith.constant 0 : i32
    %c0_i32_0 = arith.constant 0 : i32
    %c0_i32_1 = arith.constant 0 : i32
    return %c0_i32, %c0_i32_0 : i32, i32
  }
  func.func @transform_8(%arg0: i32) -> (i32, i32) {
    %c0_i32 = arith.constant 0 : i32
    %c0_i32_0 = arith.constant 0 : i32
    %c0_i32_1 = arith.constant 0 : i32
    return %c0_i32, %c0_i32_0 : i32, i32
  }
  func.func @transform_9(%arg0: i32) -> (i32, i32) {
    %c0_i32 = arith.constant 0 : i32
    %c0_i32_0 = arith.constant 0 : i32
    %c0_i32_1 = arith.constant 0 : i32
    return %c0_i32, %c0_i32_0 : i32, i32
  }
  func.func @transform_10(%arg0: i32) -> (i32, i32, i32) {
    %c0_i32 = arith.constant 0 : i32
    %c0_i32_0 = arith.constant 0 : i32
    %c0_i32_1 = arith.constant 0 : i32
    return %arg0, %c0_i32, %c0_i32_0 : i32, i32, i32
  }
}

</mosaic_0001>

<bundles_post_ra>
// kernel: tile.13
= control target key start
LH: loop header
LB: loop body
LE: loop exit
PB: predicated region body
PF: predicated region fallthrough
CT: control target
= control target key end

     0   :  { %vm4_vm0 = vcmask 1047556   ;;  %s169_s14 = smov 96   ;;  %s170_s15 = smov 112   ;;  %vm6_vm1 = vcmask 130048   ;;  %vm21_vm2 = vcmask 1048448   ;;  %vm38_vm3 = vcmask 917248   ;;  %s314_s0 = inlined_call_operand.vmem [shape: f32[9,8,16], index: 0, kind: input, shape index: {}]   ;;  %s315_s1 = inlined_call_operand.vmem [shape: f32[9,128], index: 1, kind: output, shape index: {}]  }
   0x1   :  { %v138_v0 = vld [vmem:[%s314_s0 + $0x6] ss:$8 sm:$0xf]   ;;  %v134_v3 = vld [vmem:[%s314_s0 + $0x7] ss:$8 sm:$0xf]  }
   0x2   :  { %v139_v1 = vld [vmem:[%s314_s0 + $0x6] ss:$8 sm:$0xf0]   ;;  %v135_v4 = vld [vmem:[%s314_s0 + $0x7] ss:$8 sm:$0xf0]  }
   0x3   :  { %v35_v2 = vsel %vm4_vm0, %v139_v1, %v138_v0  ;;  %v18_v5 = vsel %vm4_vm0, %v135_v4, %v134_v3  ;;  %v140_v6 = vld [vmem:[%s314_s0 + $0x46] sm:$0x1]   ;;  %v136_v7 = vld [vmem:[%s314_s0 + $0x47] sm:$0x1]   ;;  %v144_v10 = vld [vmem:[%s314_s0 + $0x45] sm:$0x1]  }
   0x4   :  { %36 = vrot.lane.b32.xlu1 %v35_v2, %s169_s14  ;;  %19 = vrot.lane.b32.xlu0 %v18_v5, %s170_s15  ;;  %v142_v8 = vld [vmem:[%s314_s0 + $0x5] ss:$8 sm:$0xf]   ;;  %v146_v12 = vld [vmem:[%s314_s0 + $0x4] ss:$8 sm:$0xf]  }
   0x5   :  { %v143_v9 = vld [vmem:[%s314_s0 + $0x5] ss:$8 sm:$0xf0]   ;;  %v147_v13 = vld [vmem:[%s314_s0 + $0x4] ss:$8 sm:$0xf0]  }
   0x6   :  { %v52_v11 = vsel %vm4_vm0, %v143_v9, %v142_v8  ;;  %s171_s30 = smov 80   ;;  %v148_v14 = vld [vmem:[%s314_s0 + $0x44] sm:$0x1]   ;;  %v2_v15 = vld [vmem:[%s314_s0] ss:$8 sm:$0xf]   ;;  %v69_v18 = vsel %vm4_vm0, %v147_v13, %v146_v12 }
   0x7   :  { %v3_v16 = vld [vmem:[%s314_s0] ss:$8 sm:$0xf0]   ;;  %v150_v20 = vld [vmem:[%s314_s0 + $0x3] ss:$8 sm:$0xf]  }
   0x8   :  { %42 = vrot.lane.b32.xlu1 %v140_v6, %s169_s14  ;;  %25 = vrot.lane.b32.xlu0 %v136_v7, %s170_s15  ;;  %v132_v17 = vld [vmem:[%s314_s0 + $0x40] sm:$0x1]   ;;  %v5_v19 = vsel %vm4_vm0, %v3_v16, %v2_v15  ;;  %v151_v21 = vld [vmem:[%s314_s0 + $0x3] ss:$8 sm:$0xf0]   ;;  %s172_s18 = smov 64  }
   0x9   :  { %133 = vst.msk [vmem:[%s315_s1 + $0x8] sm:$0x1] %vm6_vm1, %v132_v17   ;;  %7 = vst.msk [vmem:[%s315_s1] sm:$0xff] %vm6_vm1, %v5_v19   ;;  %v152_v22 = vld [vmem:[%s314_s0 + $0x43] sm:$0x1]   ;;  %v86_v23 = vsel %vm4_vm0, %v151_v21, %v150_v20  ;;  %s173_s25 = smov 48  }
   0xa   :  { %v154_v24 = vld [vmem:[%s314_s0 + $0x2] ss:$8 sm:$0xf]   ;;  %v158_v28 = vld [vmem:[%s314_s0 + $0x1] ss:$8 sm:$0xf]  }
   0xb   :  { %v155_v25 = vld [vmem:[%s314_s0 + $0x2] ss:$8 sm:$0xf0]   ;;  %v159_v29 = vld [vmem:[%s314_s0 + $0x1] ss:$8 sm:$0xf0]  }
   0xc   :  { %59 = vrot.lane.b32.xlu1 %v144_v10, %s171_s30  ;;  %53 = vrot.lane.b32.xlu0 %v52_v11, %s171_s30  ;;  %v156_v26 = vld [vmem:[%s314_s0 + $0x42] sm:$0x1]   ;;  %v103_v27 = vsel %vm4_vm0, %v155_v25, %v154_v24  ;;  %s174_s3 = smov 32   ;;  %v160_v30 = vld [vmem:[%s314_s0 + $0x41] sm:$0x1]   ;;  %v120_v31 = vsel %vm4_vm0, %v159_v29, %v158_v28  ;;  %s175_s0 = smov 16  }
   0xd   :  { %vm55_vm4 = vcmask 786048   ;;  %vm72_vm5 = vcmask 654848   ;;  %vm89_vm6 = vcmask 523648   ;;  %vm106_vm7 = vcmask 392448  }
   0xe   :  { %vm123_vm8 = vcmask 261248  }
  0x10   :  { %76 = vrot.lane.b32.xlu1 %v148_v14, %s172_s18  ;;  %70 = vrot.lane.b32.xlu0 %v69_v18, %s172_s18 }
  0x14   :  { %93 = vrot.lane.b32.xlu1 %v152_v22, %s173_s25  ;;  %87 = vrot.lane.b32.xlu0 %v86_v23, %s173_s25 }
  0x18   :  { %110 = vrot.lane.b32.xlu1 %v156_v26, %s174_s3  ;;  %104 = vrot.lane.b32.xlu0 %v103_v27, %s174_s3 }
  0x1c   :  { %127 = vrot.lane.b32.xlu1 %v160_v30, %s175_s0  ;;  %121 = vrot.lane.b32.xlu0 %v120_v31, %s175_s0 }
  0x76   :  { %v37_v32 = vpop.permute.xlu1 %36   ;;  %v20_v33 = vpop.permute.xlu0 %19  }
  0x77   :  { %22 = vst.msk [vmem:[%s315_s1] sm:$0xff] %vm21_vm2, %v20_v33  }
  0x78   :  { %39 = vst.msk [vmem:[%s315_s1] sm:$0xff] %vm38_vm3, %v37_v32  }
  0x7a   :  { %v43_v34 = vpop.permute.xlu1 %42   ;;  %v26_v35 = vpop.permute.xlu0 %25  }
  0x7b   :  { %137 = vst.msk [vmem:[%s315_s1 + $0x8] sm:$0x1] %vm21_vm2, %v26_v35  }
  0x7c   :  { %141 = vst.msk [vmem:[%s315_s1 + $0x8] sm:$0x1] %vm38_vm3, %v43_v34  }
  0x7e   :  { %v60_v36 = vpop.permute.xlu1 %59   ;;  %v54_v37 = vpop.permute.xlu0 %53  }
  0x7f   :  { %145 = vst.msk [vmem:[%s315_s1 + $0x8] sm:$0x1] %vm55_vm4, %v60_v36   ;;  %56 = vst.msk [vmem:[%s315_s1] sm:$0xff] %vm55_vm4, %v54_v37  }
  0x82   :  { %v77_v38 = vpop.permute.xlu1 %76   ;;  %v71_v39 = vpop.permute.xlu0 %70  }
  0x83   :  { %149 = vst.msk [vmem:[%s315_s1 + $0x8] sm:$0x1] %vm72_vm5, %v77_v38   ;;  %73 = vst.msk [vmem:[%s315_s1] sm:$0xff] %vm72_vm5, %v71_v39  }
  0x86   :  { %v94_v40 = vpop.permute.xlu1 %93   ;;  %v88_v41 = vpop.permute.xlu0 %87  }
  0x87   :  { %153 = vst.msk [vmem:[%s315_s1 + $0x8] sm:$0x1] %vm89_vm6, %v94_v40   ;;  %90 = vst.msk [vmem:[%s315_s1] sm:$0xff] %vm89_vm6, %v88_v41  }
  0x8a   :  { %v111_v42 = vpop.permute.xlu1 %110   ;;  %v105_v43 = vpop.permute.xlu0 %104  }
  0x8b   :  { %157 = vst.msk [vmem:[%s315_s1 + $0x8] sm:$0x1] %vm106_vm7, %v111_v42   ;;  %107 = vst.msk [vmem:[%s315_s1] sm:$0xff] %vm106_vm7, %v105_v43  }
  0x8e   :  { %v128_v44 = vpop.permute.xlu1 %127   ;;  %v122_v45 = vpop.permute.xlu0 %121  }
  0x8f   :  { %161 = vst.msk [vmem:[%s315_s1 + $0x8] sm:$0x1] %vm123_vm8, %v128_v44   ;;  %124 = vst.msk [vmem:[%s315_s1] sm:$0xff] %vm123_vm8, %v122_v45  }

// kernel: mini_crnn_forward.1
= control target key start
LH: loop header
LB: loop body
LE: loop exit
PB: predicated region body
PF: predicated region fallthrough
CT: control target
= control target key end

     0   :  { %15 = vsyncpa [#allocation6], 0  ;;  %s5330_s0 = inlined_call_operand.vmem [shape: f32[2,2,2,9,144], index: 0, kind: input, shape index: {}]   ;;  %s5331_s1 = inlined_call_operand.vmem [shape: f32[9,128], index: 1, kind: input, shape index: {}]   ;;  %s5332_s2 = inlined_call_operand.vmem [shape: f32[1,128], index: 2, kind: input, shape index: {}]   ;;  %s5333_s3 = inlined_call_operand.vmem [shape: bf16[144,32], index: 3, kind: input, shape index: {}]   ;;  %s5334_s4 = inlined_call_operand.vmem [shape: f32[1,32], index: 4, kind: input, shape index: {}]   ;;  %s5335_s5 = inlined_call_operand.vmem [shape: bf16[128,512], index: 5, kind: input, shape index: {}]   ;;  %s5336_s6 = inlined_call_operand.vmem [shape: bf16[128,512], index: 6, kind: input, shape index: {}]   ;;  %s5337_s7 = inlined_call_operand.vmem [shape: f32[1,512], index: 7, kind: input, shape index: {}]   ;;  %s5338_s8 = inlined_call_operand.vmem [shape: f32[128,128], index: 8, kind: input, shape index: {}]   ;;  %s5339_s9 = inlined_call_operand.vmem [shape: f32[1,128], index: 9, kind: input, shape index: {}]   ;;  %s5340_s10 = inlined_call_operand.hbm [shape: f32[2,1,128], index: 10, kind: output, shape index: {}]  }
   0x1   :  { %17 = vsyncpa [#allocation6 + $0x1], 0  ;;  %s3960_s13 = smov 0   ;;  %s3962_s14 = smov 0  }
   0x2   :  { %s3964_s15 = smov 0   ;;  %s3966_s16 = smov 0  }
   0x3 LB: > { %s5341_s17 = sadd.s32 4294967295, %s3890_s16   ;;  %s3284_s18 = sadd.s32 4294967294, %s3890_s16   ;;  %s3890_s16 = sphi %s3966_s16, %s5348_s16   ;;  %s3886_s15 = sphi %s3964_s15, %s5347_s15   ;;  %s3882_s14 = sphi %s3962_s14, %s5346_s14   ;;  %s3878_s13 = sphi %s3960_s13, %s5345_s13  }
   0x4   : > { %s3983_s19 = sadd.s32 1, %s3890_s16   ;;  %s30_s20 = sadd.s32 1, %s3886_s15 }
   0x5   : > { %s27_s21 = ssub.s32 %s3890_s16, %s3983_s19  ;;  %p37_p0 = scmp.ne.s32.totalorder %s3886_s15, %s3882_s14 }
   0x6   : > { %p28_p1 = scmp.eq.s32.totalorder %s27_s21, 0  ;;  %p38_p2 = scmp.eq.s32.totalorder %s3890_s16, 0 }
   0x7   : > { %p256_p3 = scmp.eq.s32.totalorder %s5341_s17, 1  ;;  %p261_p4 = scmp.ne.s32.totalorder %s3882_s14, %s3878_s13 }
   0x8   : > { %s3996_s22 = scalar_select %p28_p1, %s3886_s15, %s30_s20  }
   0x9   : > { %p39_p5 = por %p38_p2, %p37_p0  ;;  %p3998_p6 = por %p256_p3, %p37_p0 }
   0xa   : > { %p262_p7 = scmp.eq.s32.totalorder %s3284_s18, 1  ;;  %p3286_p9 = scmp.ge.s32.totalorder %s3890_s16, 2 }
   0xc   : > { %p4002_p8 = por %p262_p7, %p261_p4  ;;  %305 = sbr.rel (%p3286_p9) target bundleno = 29 (0x1d), region = 52 }
  0x11   : > { %308 = sbr.rel (!%p39_p5) target bundleno = 29 (0x1d), region = 56  ;;  %s310_s25 = sand.u32 (%p39_p5), 1, %s3886_s15  }
  0x12   : > { %s3417_s26 = sshll.u32 (%p39_p5), %s3890_s16, 5  ;;  %s3287_s27 = sshll.u32 (%p39_p5), %s310_s25, 7 }
  0x13   : > { %s4014_s30 = scalar_lea.vmem (%p39_p5), %s5330_s0, %s3417_s26  ;;  %s312_s11 = scalar_lea.vmem (%p39_p5), [#allocation4], %s3287_s27 }
  0x14   : > { %v328_v0 = vld [vmem:[%s4014_s30] sm:$0xff] (%p39_p5)  ;;  %v330_v1 = vld [vmem:[%s4014_s30 + $0x8] sm:$0xff] (%p39_p5)  ;;  %v332_v2 = vld [vmem:[%s4014_s30 + $0x10] sm:$0xff] (%p39_p5) }
  0x15   : > { %329 = vst [vmem:[%s312_s11] sm:$0xff] (%p39_p5), %v328_v0  ;;  %331 = vst [vmem:[%s312_s11 + $0x8] sm:$0xff] (%p39_p5), %v330_v1  ;;  %v334_v3 = vld [vmem:[%s4014_s30 + $0x18] sm:$0xff] (%p39_p5)  ;;  %v336_v4 = vld [vmem:[%s4014_s30 + $0x40] sm:$0xff] (%p39_p5) }
  0x16   : > { %333 = vst [vmem:[%s312_s11 + $0x10] sm:$0xff] %v332_v2  ;;  %v338_v5 = vld [vmem:[%s4014_s30 + $0x48] sm:$0xff]  ;;  %335 = vst [vmem:[%s312_s11 + $0x18] sm:$0xff] %v334_v3  ;;  %v340_v6 = vld [vmem:[%s4014_s30 + $0x50] sm:$0xff] }
  0x17   : > { %337 = vst [vmem:[%s312_s11 + $0x20] sm:$0xff] %v336_v4  ;;  %339 = vst [vmem:[%s312_s11 + $0x28] sm:$0xff] %v338_v5  ;;  %v342_v7 = vld [vmem:[%s4014_s30 + $0x58] sm:$0xff]  ;;  %v344_v8 = vld [vmem:[%s4014_s30 + $0x80] sm:$0xff] }
  0x18   : > { %341 = vst [vmem:[%s312_s11 + $0x30] sm:$0xff] %v340_v6  ;;  %343 = vst [vmem:[%s312_s11 + $0x38] sm:$0xff] %v342_v7  ;;  %v346_v9 = vld [vmem:[%s4014_s30 + $0x88] sm:$0xff]  ;;  %v348_v10 = vld [vmem:[%s4014_s30 + $0x90] sm:$0xff] }
  0x19   : > { %345 = vst [vmem:[%s312_s11 + $0x40] sm:$0xff] %v344_v8  ;;  %v350_v11 = vld [vmem:[%s4014_s30 + $0x98] sm:$0xff]  ;;  %347 = vst [vmem:[%s312_s11 + $0x48] sm:$0xff] %v346_v9  ;;  %v352_v12 = vld [vmem:[%s4014_s30 + $0xc0] sm:$0xff] }
  0x1a   : > { %349 = vst [vmem:[%s312_s11 + $0x50] sm:$0xff] %v348_v10  ;;  %351 = vst [vmem:[%s312_s11 + $0x58] sm:$0xff] %v350_v11  ;;  %v354_v13 = vld [vmem:[%s4014_s30 + $0xc8] sm:$0xff]  ;;  %v356_v14 = vld [vmem:[%s4014_s30 + $0xd0] sm:$0xff] }
  0x1b   : > { %353 = vst [vmem:[%s312_s11 + $0x60] sm:$0xff] %v352_v12  ;;  %355 = vst [vmem:[%s312_s11 + $0x68] sm:$0xff] %v354_v13  ;;  %v358_v15 = vld [vmem:[%s4014_s30 + $0xd8] sm:$0xff] }
  0x1c   : > { %357 = vst [vmem:[%s312_s11 + $0x70] sm:$0xff] %v356_v14  ;;  %359 = vst [vmem:[%s312_s11 + $0x78] sm:$0xff] %v358_v15 }
  0x1d PF: > { %p3290_p10 = scmp.ge.s32.totalorder %s3890_s16, 1  ;;  %p364_p11 = scmp.lt.s32.totalorder %s3890_s16, 3 }
  0x1f   : > { %p365_p12 = pnand %p3290_p10, %p364_p11 }
  0x20   : > { %s3892_s20 = smov (!%p365_p12), 16   ;;  %s4065_s21 = sand.u32 (!%p365_p12), 1, %s3882_s14  }
  0x21   : > { %368 = sbr.rel (%p365_p12) target bundleno = 2373 (0x945), region = 79  ;;  %s3291_s25 = sshll.u32 (!%p365_p12), %s4065_s21, 7 }
  0x22   : > { %s4068_s26 = scalar_lea.vmem (!%p365_p12), [#allocation4], %s3291_s25  ;;  %s3893_s29 = smov (!%p365_p12), 112  }
  0x23   : > { %s3896_s27 = smov (!%p365_p12), 96   ;;  %s3897_s28 = smov (!%p365_p12), 64  }
  0x24   : > { %s3898_s30 = smov (!%p365_p12), 80   ;;  %s3899_s11 = smov (!%p365_p12), 32  }
  0x25   : > { %s3900_s12 = smov (!%p365_p12), 48   ;;  %s3211_s18 = scalar_lea.sflag (!%p365_p12), [#allocation6], %s4065_s21 }
  0x26   : > { %v3294_v16 = vld [vmem:[%s5331_s1 + $0x1] ss:$0 sm:$0xff]  ;;  %v4041_v17 = vld [vmem:[%s5331_s1 + $0x4] ss:$0 sm:$0xff]  ;;  %v3295_v18 = vld [vmem:[%s5331_s1 + $0x2] ss:$0 sm:$0xff] }
  0x27   : > { %552 = vrot.lane.b32.xlu0 %v3294_v16, %s3892_s20  ;;  %581 = vrot.lane.b32.xlu1 %v4041_v17, %s3892_s20  ;;  %v3301_v19 = vld [vmem:[%s5331_s1 + $0x5] ss:$0 sm:$0xff]  ;;  %v4055_v20 = vld [vmem:[%s5331_s1 + $0x7] ss:$0 sm:$0xff]  ;;  %vm496_vm0 = vcmask 1046528   ;;  %vm901_vm1 = vcmask 130048  }
  0x28   : > { %v3306_v21 = vld [vmem:[%s5331_s1 + $0x8] ss:$0 sm:$0xff]  ;;  %v4071_v22 = vld [vmem:[%s4068_s26 + $0x20] sm:$0xff]  ;;  %v4078_v25 = vld [vmem:[%s5331_s1] ss:$0 sm:$0xff]  ;;  %vm442_vm2 = vcmask 916480  }
  0x29   : > { %v422_v23 = vmul.f32 %v3294_v16, %v4071_v22  ;;  %v408_v24 = vld [vmem:[%s4068_s26] sm:$0xff]  ;;  %v424_v29 = vld [vmem:[%s4068_s26 + $0x8] sm:$0xff]  ;;  %v4118_v53 = vld [vmem:[%s5331_s1 + $0x3] ss:$0 sm:$0xff]  ;;  %vm982_vm3 = vcmask 122880   ;;  %vm903_vm4 = vcmask 123904  }
  0x2a   : > { %v414_v26 = vmul.f32 %v4078_v25, %v408_v24  ;;  %v4084_v28 = vld [vmem:[%s4068_s26 + $0x60] sm:$0xff]  ;;  %v3307_v40 = vld [vmem:[%s4068_s26 + $0x28] sm:$0xff]  ;;  %v4123_v54 = vld [vmem:[%s4068_s26 + $0x10] sm:$0x1]  ;;  %vm1552_vm5 = vcmask 261120   ;;  %vm1561_vm6 = vcmask 392192  }
  0x2b   : > { %431 = vrot.lane.b32.xlu0 %v3295_v18, %s3892_s20  ;;  %471 = vrot.lane.b32.xlu1 %v3301_v19, %s3892_s20  ;;  %v666_v30 = vmul.f32 %v4084_v28, %v3294_v16  ;;  %v4089_v31 = vld [vmem:[%s4068_s26 + $0x40] sm:$0xff]  ;;  %v3300_v43 = vld [vmem:[%s4068_s26 + $0x48] sm:$0xff]  ;;  %v680_v57 = vmul.f32 %v4118_v53, %v4123_v54  ;;  %vm1570_vm7 = vcmask 523264   ;;  %vm1579_vm8 = vcmask 654336   ;;  %s3904_s17 = smov [#allocation5]  }
  0x2c   : > { %v4081_v27 = vadd.f32 %v422_v23, %v414_v26  ;;  %v665_v33 = vmul.f32 %v4089_v31, %v4078_v25  ;;  %v3308_v51 = vld [vmem:[%s4068_s26 + $0x68] sm:$0xff]  ;;  %v4113_v52 = vld [vmem:[%s4068_s26] sm:$0xfe]  ;;  %v4138_v61 = vld [vmem:[%s5331_s1 + $0x6] ss:$0 sm:$0xff]  ;;  %vm1588_vm9 = vcmask 785408  }
  0x2d   : > { %v679_v55 = vmul.f32 %v4118_v53, %v4113_v52  ;;  %v4133_v60 = vld [vmem:[%s4068_s26 + $0x8] sm:$0xfe]  ;;  %v4146_v1 = vld [vmem:[%s4068_s26 + $0x18] sm:$0x1]  ;;  %v684_v3 = vrot.slane %v680_v57, 1  ;;  %v492_v7 = vmul.f32 %v4138_v61, %v4113_v52  ;;  %v493_v8 = vmul.f32 %v4138_v61, %v4123_v54  ;;  %s3834_s25 = sshll.u32 %s3904_s17, 4  ;;  %s3835_s25 = int_to_ptr.vmem [resolvable:$false] %s3834_s25 }
  0x2e   : > { %v4095_v36 = vadd.f32 %v666_v30, %v665_v33  ;;  %v4156_v6 = vld [vmem:[%s4068_s26 + $0x40] sm:$0xfe]  ;;  %v4167_v11 = vld [vmem:[%s4068_s26 + $0x50] sm:$0x1]  ;;  %vm1953_vm10 = vcmask 1041409   ;;  %vm1955_vm11 = vcmask 1042434  }
  0x2f   : > { %617 = vrot.lane.b32.xlu0 %v4055_v20, %s3892_s20  ;;  %526 = vrot.lane.b32.xlu1 %v3306_v21, %s3892_s20  ;;  %v683_v0 = vrot.slane %v679_v55, 1  ;;  %v720_v13 = vmul.f32 %v4156_v6, %v4138_v61  ;;  %v497_v15 = vrot.slane %v492_v7, 1  ;;  %v498_v16 = vrot.slane %v493_v8, 1 }
  0x30   : > { %v721_v18 = vmul.f32 %v4167_v11, %v4138_v61  ;;  %vm1957_vm12 = vcmask 1043459   ;;  %vm3903_vm13 = vmmov 0  }
  0x31   : > { %v4170_v12 = vsel %vm496_vm0, %v683_v0, %v684_v3  ;;  %v4191_v33 = vsel %vm496_vm0, %v497_v15, %v498_v16  ;;  %v3310_v0 = vld [vmem:[%s4068_s26 + $0x38] sm:$0x1]  ;;  %v4225_v3 = vld [vmem:[%s4068_s26 + $0x30] sm:$0x1] }
  0x99   : > { %v553_v32 = vpop.permute.xlu0 %552  ;;  %v582_v46 = vpop.permute.xlu1 %581 }
  0x9a   : > { %v556_v34 = vmul.f32 %v553_v32, %v424_v29  ;;  %v555_v35 = vmul.f32 %v553_v32, %v408_v24  ;;  %v766_v47 = vmul.f32 %v3300_v43, %v553_v32  ;;  %v765_v48 = vmul.f32 %v4089_v31, %v553_v32  ;;  %v4188_v32 = vld [vmem:[%s4068_s26 + $0x60] sm:$0xfe] }
  0x9b   : > { %v585_v49 = vmul.f32 %v3300_v43, %v582_v46  ;;  %v584_v50 = vmul.f32 %v4089_v31, %v582_v46  ;;  %v4149_v2 = vmul.f32 %v582_v46, %v4133_v60  ;;  %v799_v14 = vmul.f32 %v582_v46, %v4146_v1 }
  0x9c   : > { %561 = vrot.lane.b32.xlu1 %v556_v34, %s3893_s29  ;;  %559 = vrot.lane.b32.xlu0 %v555_v35, %s3893_s29  ;;  %v796_v21 = vmul.f32 %v582_v46, %v4113_v52  ;;  %v798_v23 = vmul.f32 %v582_v46, %v4123_v54  ;;  %v725_v34 = vrot.slane %v721_v18, 1 }
  0x9d   : > { %v432_v37 = vpop.permute.xlu0 %431  ;;  %v4127_v56 = vpop.permute.xlu1 %471  ;;  %v807_v19 = vrot.slane %v4149_v2, 1  ;;  %v4222_v2 = vld [vmem:[%s4068_s26 + $0x20] sm:$0xfe] }
  0x9e   : > { %v435_v38 = vmul.f32 %v432_v37, %v424_v29  ;;  %v434_v39 = vmul.f32 %v432_v37, %v408_v24  ;;  %v568_v41 = vmul.f32 %v3307_v40, %v432_v37  ;;  %v567_v42 = vmul.f32 %v4071_v22, %v432_v37  ;;  %v4194_v40 = vld [vmem:[%s4068_s26 + $0x70] sm:$0x1] }
  0x9f   : > { %v669_v44 = vmul.f32 %v3300_v43, %v432_v37  ;;  %v668_v45 = vmul.f32 %v4089_v31, %v432_v37  ;;  %v777_v58 = vmul.f32 %v3308_v51, %v432_v37  ;;  %v776_v59 = vmul.f32 %v4084_v28, %v432_v37 }
  0xa0   : > { %440 = vrot.lane.b32.xlu1 %v435_v38, %s3893_s29  ;;  %438 = vrot.lane.b32.xlu0 %v434_v39, %s3893_s29  ;;  %v475_v62 = vmul.f32 %v3300_v43, %v4127_v56  ;;  %v474_v63 = vmul.f32 %v4089_v31, %v4127_v56  ;;  %v698_v4 = vmul.f32 %v4133_v60, %v4127_v56  ;;  %v724_v24 = vrot.slane %v720_v13, 1 }
  0xa1   : > { %v700_v5 = vmul.f32 %v4146_v1, %v4127_v56  ;;  %v697_v9 = vmul.f32 %v4113_v52, %v4127_v56  ;;  %v699_v10 = vmul.f32 %v4123_v54, %v4127_v56  ;;  %v597_v26 = vmul.f32 %v3308_v51, %v4127_v56  ;;  %v4185_v30 = vpop.permute.xlu0 %617 }
  0xa2   : > { %v596_v29 = vmul.f32 %v4084_v28, %v4127_v56  ;;  %v708_v35 = vrot.slane %v698_v4, 1  ;;  %v731_v43 = vmul.f32 %v4188_v32, %v4055_v20  ;;  %v623_v46 = vmul.f32 %v4185_v30, %v4146_v1 }
  0xa3   : > { %v709_v37 = vrot.slane %v700_v5, 1  ;;  %v705_v38 = vrot.slane %v697_v9, 1  ;;  %v706_v39 = vrot.slane %v699_v10, 1  ;;  %v838_v51 = vmul.f32 %v4188_v32, %v4138_v61 }
  0xa4   : > { %573 = vrot.lane.b32.xlu1 %v568_v41, %s3893_s29  ;;  %571 = vrot.lane.b32.xlu0 %v567_v42, %s3893_s29  ;;  %v808_v41 = vrot.slane %v799_v14, 1  ;;  %v4199_v42 = vsel %vm496_vm0, %v724_v24, %v725_v34  ;;  %v839_v55 = vmul.f32 %v4194_v40, %v4138_v61  ;;  %v632_v9 = vrot.slane %v623_v46, 1  ;;  %v4232_v14 = vpop.permute.xlu1 %526 }
  0xa5   : > { %v710_v57 = vsel %vm496_vm0, %v708_v35, %v709_v37  ;;  %v842_v5 = vrot.slane %v838_v51, 1  ;;  %v820_v16 = vmul.f32 %v3310_v0, %v4127_v56  ;;  %v817_v24 = vmul.f32 %v4222_v2, %v4127_v56  ;;  %v3315_v51 = vld [vmem:[%s4068_s26 + $0x48] sm:$0xfe] }
  0xa6   : > { %v843_v7 = vrot.slane %v839_v55, 1  ;;  %v532_v34 = vmul.f32 %v4232_v14, %v4146_v1  ;;  %v529_v37 = vmul.f32 %v4232_v14, %v4113_v52  ;;  %v3316_v55 = vld [vmem:[%s4068_s26 + $0x58] sm:$0x1] }
  0xa8   : > { %674 = vrot.lane.b32.xlu1 %v669_v44, %s3893_s29  ;;  %672 = vrot.lane.b32.xlu0 %v668_v45, %s3893_s29  ;;  %v732_v44 = vmul.f32 %v4194_v40, %v4055_v20  ;;  %v621_v45 = vmul.f32 %v4185_v30, %v4133_v60  ;;  %v4237_v18 = vsel %vm496_vm0, %v842_v5, %v843_v7  ;;  %v541_v1 = vrot.slane %v532_v34, 1  ;;  %v3317_v34 = vld [vmem:[%s4068_s26 + $0x68] sm:$0xfe] }
  0xaa   : > { %v631_v8 = vrot.slane %v621_v45, 1 }
  0xac   : > { %771 = vrot.lane.b32.xlu1 %v766_v47, %s3893_s29  ;;  %769 = vrot.lane.b32.xlu0 %v765_v48, %s3893_s29  ;;  %v620_v47 = vmul.f32 %v4185_v30, %v4113_v52  ;;  %v622_v48 = vmul.f32 %v4185_v30, %v4123_v54 }
  0xae   : > { %v628_v10 = vrot.slane %v620_v47, 1  ;;  %v629_v13 = vrot.slane %v622_v48, 1  ;;  %v646_v47 = vmul.f32 %v3310_v0, %v4232_v14  ;;  %v643_v48 = vmul.f32 %v4222_v2, %v4232_v14 }
  0xb0   : > { %590 = vrot.lane.b32.xlu1 %v585_v49, %s3893_s29  ;;  %588 = vrot.lane.b32.xlu0 %v584_v50, %s3893_s29  ;;  %v735_v49 = vrot.slane %v731_v43, 1  ;;  %v736_v50 = vrot.slane %v732_v44, 1  ;;  %v630_v35 = vsel %vm496_vm0, %v628_v10, %v629_v13  ;;  %v537_v44 = vrot.slane %v529_v37, 1 }
  0xb1   : > { %v655_v5 = vrot.slane %v646_v47, 1  ;;  %v651_v7 = vrot.slane %v643_v48, 1 }
  0xb2   : > { %v4230_v4 = vsel %vm496_vm0, %v735_v49, %v736_v50  ;;  %v645_v49 = vmul.f32 %v4225_v3, %v4232_v14 }
  0xb4   : > { %782 = vrot.lane.b32.xlu1 %v777_v58, %s3893_s29  ;;  %780 = vrot.lane.b32.xlu0 %v776_v59, %s3893_s29  ;;  %v707_v58 = vsel %vm496_vm0, %v705_v38, %v706_v39  ;;  %v804_v59 = vrot.slane %v796_v21, 1  ;;  %v809_v21 = vsel %vm496_vm0, %v807_v19, %v808_v41  ;;  %v633_v19 = vsel %vm496_vm0, %v631_v8, %v632_v9 }
  0xb5   : > { %v829_v39 = vrot.slane %v820_v16, 1  ;;  %v825_v41 = vrot.slane %v817_v24, 1  ;;  %v652_v8 = vrot.slane %v645_v49, 1  ;;  %v453_v49 = vmul.f32 %v4118_v53, %v4089_v31 }
  0xb7   : > { %v653_v24 = vsel %vm496_vm0, %v651_v7, %v652_v8 }
  0xb8   : > { %480 = vrot.lane.b32.xlu1 %v475_v62, %s3893_s29  ;;  %478 = vrot.lane.b32.xlu0 %v474_v63, %s3893_s29  ;;  %v805_v62 = vrot.slane %v798_v23, 1  ;;  %v3309_v63 = vld [vmem:[%s4068_s26 + $0x28] sm:$0xfe] }
  0xb9   : > { %v818_v15 = vmul.f32 %v3309_v63, %v4127_v56  ;;  %v644_v52 = vmul.f32 %v3309_v63, %v4232_v14  ;;  %v744_v63 = vmul.f32 %v4167_v11, %v4232_v14 }
  0xba   : > { %v806_v23 = vsel %vm496_vm0, %v804_v59, %v805_v62  ;;  %v745_v59 = vmul.f32 %v3316_v55, %v4232_v14  ;;  %v742_v62 = vmul.f32 %v4156_v6, %v4232_v14 }
  0xbb   : > { %v828_v38 = vrot.slane %v818_v15, 1  ;;  %v654_v0 = vrot.slane %v644_v52, 1  ;;  %v848_v15 = vmul.f32 %v3315_v51, %v4185_v30  ;;  %v751_v16 = vrot.slane %v744_v63, 1 }
  0xbc   : > { %602 = vrot.lane.b32.xlu1 %v597_v26, %s3893_s29  ;;  %600 = vrot.lane.b32.xlu0 %v596_v29, %s3893_s29  ;;  %v819_v26 = vmul.f32 %v4225_v3, %v4127_v56  ;;  %v530_v29 = vmul.f32 %v4232_v14, %v4133_v60  ;;  %v531_v56 = vmul.f32 %v4232_v14, %v4123_v54  ;;  %v754_v10 = vrot.slane %v745_v59, 1 }
  0xbd   : > { %v830_v46 = vsel %vm496_vm0, %v828_v38, %v829_v39  ;;  %v750_v13 = vrot.slane %v742_v62, 1 }
  0xbe   : > { %v826_v43 = vrot.slane %v819_v26, 1  ;;  %v540_v60 = vrot.slane %v530_v29, 1  ;;  %v538_v45 = vrot.slane %v531_v56, 1  ;;  %v847_v26 = vmul.f32 %v4156_v6, %v4185_v30 }
  0xbf   : > { %v849_v29 = vmul.f32 %v4167_v11, %v4185_v30  ;;  %v858_v11 = vrot.slane %v848_v15, 1  ;;  %v871_v56 = vmul.f32 %v3317_v34, %v4232_v14 }
  0xc0   : > { %713 = vrot.lane.b32.xlu1 %v710_v57, %s3893_s29  ;;  %711 = vrot.lane.b32.xlu0 %v707_v58, %s3893_s29  ;;  %v827_v54 = vsel %vm496_vm0, %v825_v41, %v826_v43  ;;  %v542_v50 = vsel %vm496_vm0, %v540_v60, %v541_v1  ;;  %v539_v57 = vsel %vm496_vm0, %v537_v44, %v538_v45  ;;  %v855_v39 = vrot.slane %v847_v26, 1 }
  0xc1   : > { %v743_v58 = vmul.f32 %v3315_v51, %v4232_v14  ;;  %v856_v41 = vrot.slane %v849_v29, 1  ;;  %v870_v43 = vmul.f32 %v4188_v32, %v4232_v14  ;;  %v872_v60 = vmul.f32 %v4194_v40, %v4232_v14 }
  0xc2   : > { %v881_v44 = vrot.slane %v871_v56, 1  ;;  %v510_v26 = vmul.f32 %v4055_v20, %v4225_v3 }
  0xc3   : > { %v753_v9 = vrot.slane %v743_v58, 1  ;;  %v857_v45 = vsel %vm496_vm0, %v855_v39, %v856_v41  ;;  %v878_v52 = vrot.slane %v870_v43, 1  ;;  %v689_v58 = vmul.f32 %v4225_v3, %v4041_v17 }
  0xc4   : > { %812 = vrot.lane.b32.xlu1 %v809_v21, %s3893_s29  ;;  %810 = vrot.lane.b32.xlu0 %v806_v23, %s3893_s29  ;;  %v850_v21 = vmul.f32 %v3316_v55, %v4185_v30  ;;  %v656_v23 = vsel %vm496_vm0, %v654_v0, %v655_v5  ;;  %v752_v30 = vsel %vm496_vm0, %v750_v13, %v751_v16 }
  0xc5   : > { %v755_v6 = vsel %vm496_vm0, %v753_v9, %v754_v10  ;;  %v693_v5 = vrot.slane %v689_v58, 1 }
  0xc6   : > { %v859_v37 = vrot.slane %v850_v21, 1 }
  0xc8   : > { %636 = vrot.lane.b32.xlu1 %v633_v19, %s3893_s29  ;;  %634 = vrot.lane.b32.xlu0 %v630_v35, %s3893_s29  ;;  %v3318_v19 = vld [vmem:[%s4068_s26 + $0x78] sm:$0x1]  ;;  %v3894_v35 = vmov 0.0   ;;  %v860_v1 = vsel %vm496_vm0, %v858_v11, %v859_v37 }
  0xc9   : > { %905 = vst.msk [vmem:[#allocation2 + $0x10] sm:$0xff] %vm901_vm1, %v3894_v35  ;;  %907 = vst.msk [vmem:[#allocation2 + $0x20] sm:$0xff] %vm901_vm1, %v3894_v35  ;;  %v873_v38 = vmul.f32 %v3318_v19, %v4232_v14 }
  0xca   : > { %909 = vst.msk [vmem:[#allocation2 + $0x30] sm:$0xff] %vm901_vm1, %v3894_v35  ;;  %911 = vst.msk [vmem:[#allocation2 + $0x40] sm:$0xff] %vm901_vm1, %v3894_v35 }
  0xcb   : > { %913 = vst.msk [vmem:[#allocation2 + $0x50] sm:$0xff] %vm901_vm1, %v3894_v35  ;;  %915 = vst.msk [vmem:[#allocation2 + $0x60] sm:$0xff] %vm901_vm1, %v3894_v35 }
  0xcc   : > { %833 = vrot.lane.b32.xlu1 %v830_v46, %s3893_s29  ;;  %831 = vrot.lane.b32.xlu0 %v827_v54, %s3893_s29  ;;  %917 = vst.msk [vmem:[#allocation2 + $0x70] sm:$0xff] %vm901_vm1, %v3894_v35  ;;  %902 = vst.msk [vmem:[#allocation2] sm:$0xff] %vm901_vm1, %v3894_v35  ;;  %v882_v46 = vrot.slane %v873_v38, 1  ;;  %v879_v54 = vrot.slane %v872_v60, 1  ;;  %v787_v60 = vmul.f32 %v4222_v2, %v4118_v53 }
  0xcd   : > { %919 = vst.msk [vmem:[#allocation2 + $0x80] sm:$0xff] %vm901_vm1, %v3894_v35  ;;  %921 = vst.msk [vmem:[#allocation2 + $0x90] sm:$0xff] %vm901_vm1, %v3894_v35 }
  0xce   : > { %v883_v32 = vsel %vm496_vm0, %v881_v44, %v882_v46  ;;  %v880_v40 = vsel %vm496_vm0, %v878_v52, %v879_v54  ;;  %v764_v44 = vmul.f32 %v4084_v28, %v4078_v25  ;;  %906 = vst.msk [vmem:[#allocation2 + $0x18] sm:$0x3] %vm903_vm4, %v3894_v35  ;;  %904 = vst.msk [vmem:[#allocation2 + $0x8] sm:$0x3] %vm903_vm4, %v3894_v35 }
  0xcf   : > { %908 = vst.msk [vmem:[#allocation2 + $0x28] sm:$0x3] %vm903_vm4, %v3894_v35  ;;  %910 = vst.msk [vmem:[#allocation2 + $0x38] sm:$0x3] %vm903_vm4, %v3894_v35 }
  0xd0   : > { %545 = vrot.lane.b32.xlu1 %v542_v50, %s3893_s29  ;;  %543 = vrot.lane.b32.xlu0 %v539_v57, %s3893_s29  ;;  %v688_v57 = vmul.f32 %v4222_v2, %v4041_v17  ;;  %912 = vst.msk [vmem:[#allocation2 + $0x48] sm:$0x3] %vm903_vm4, %v3894_v35  ;;  %914 = vst.msk [vmem:[#allocation2 + $0x58] sm:$0x3] %vm903_vm4, %v3894_v35 }
  0xd1   : > { %916 = vst.msk [vmem:[#allocation2 + $0x68] sm:$0x3] %vm903_vm4, %v3894_v35  ;;  %918 = vst.msk [vmem:[#allocation2 + $0x78] sm:$0x3] %vm903_vm4, %v3894_v35 }
  0xd2   : > { %v692_v0 = vrot.slane %v688_v57, 1  ;;  %920 = vst.msk [vmem:[#allocation2 + $0x88] sm:$0x3] %vm903_vm4, %v3894_v35  ;;  %922 = vst.msk [vmem:[#allocation2 + $0x98] sm:$0x3] %vm903_vm4, %v3894_v35 }
  0xd4   : > { %659 = vrot.lane.b32.xlu1 %v656_v23, %s3893_s29  ;;  %657 = vrot.lane.b32.xlu0 %v653_v24, %s3893_s29  ;;  %v694_v10 = vsel %vm496_vm0, %v692_v0, %v693_v5  ;;  %v509_v24 = vmul.f32 %v4055_v20, %v4222_v2 }
  0xd6   : > { %v513_v19 = vrot.slane %v509_v24, 1 }
  0xd8   : > { %758 = vrot.lane.b32.xlu1 %v755_v6, %s3893_s29  ;;  %756 = vrot.lane.b32.xlu0 %v752_v30, %s3893_s29  ;;  %v514_v6 = vrot.slane %v510_v26, 1 }
  0xda   : > { %v515_v38 = vsel %vm496_vm0, %v513_v19, %v514_v6 }
  0xdc   : > { %863 = vrot.lane.b32.xlu1 %v860_v1, %s3893_s29  ;;  %861 = vrot.lane.b32.xlu0 %v857_v45, %s3893_s29  ;;  %v550_v1 = vmul.f32 %v4071_v22, %v4078_v25 }
  0xe0   : > { %886 = vrot.lane.b32.xlu1 %v883_v32, %s3893_s29  ;;  %884 = vrot.lane.b32.xlu0 %v880_v40, %s3893_s29 }
 0x10e   : > { %v562_v14 = vpop.permute.xlu1 %561  ;;  %v560_v47 = vpop.permute.xlu0 %559 }
 0x10f   : > { %v563_v52 = vsel %vm442_vm2, %v560_v47, %v562_v14  ;;  %v578_v14 = vmul.f32 %v4084_v28, %v4118_v53 }
 0x112   : > { %v441_v48 = vpop.permute.xlu1 %440  ;;  %v439_v50 = vpop.permute.xlu0 %438 }
 0x113   : > { %v443_v51 = vsel %vm442_vm2, %v439_v50, %v441_v48 }
 0x114   : > { %v445_v55 = vadd.f32 %v443_v51, %v4081_v27  ;;  %v565_v51 = vadd.f32 %v563_v52, %v550_v1  ;;  %v3895_v1 = vmov 1966171168  }
 0x116   : > { %v454_v59 = vadd.f32 %v453_v49, %v445_v55  ;;  %v574_v62 = vpop.permute.xlu1 %573  ;;  %v572_v63 = vpop.permute.xlu0 %571  ;;  %v791_v49 = vrot.slane %v787_v60, 1 }
 0x117   : > { %v575_v40 = vsel %vm442_vm2, %v572_v63, %v574_v62  ;;  %v607_v62 = vmul.f32 %v4222_v2, %v4138_v61  ;;  %v608_v63 = vmul.f32 %v4225_v3, %v4138_v61 }
 0x118   : > { %v577_v58 = vadd.f32 %v575_v40, %v565_v51 }
 0x11a   : > { %v675_v7 = vpop.permute.xlu1 %674  ;;  %v673_v8 = vpop.permute.xlu0 %672 }
 0x11b   : > { %v676_v31 = vsel %vm442_vm2, %v673_v8, %v675_v7 }
 0x11c   : > { %v678_v9 = vadd.f32 %v676_v31, %v4095_v36  ;;  %v462_v36 = vmul.f32 %v4041_v17, %v4084_v28  ;;  %v788_v17 = vmul.f32 %v4225_v3, %v4118_v53  ;;  %v579_v31 = vadd.f32 %v578_v14, %v577_v58 }
 0x11d   : > { %v611_v53 = vrot.slane %v607_v62, 1 }
 0x11e   : > { %v687_v27 = vadd.f32 %v4170_v12, %v678_v9  ;;  %v772_v13 = vpop.permute.xlu1 %771  ;;  %v770_v15 = vpop.permute.xlu0 %769  ;;  %v463_v30 = vadd.f32 %v462_v36, %v454_v59  ;;  %v792_v50 = vrot.slane %v788_v17, 1 }
 0x120   : > { %v696_v16 = vadd.f32 %v694_v10, %v687_v27  ;;  %v793_v0 = vsel %vm496_vm0, %v791_v49, %v792_v50 }
 0x122   : > { %v591_v21 = vpop.permute.xlu1 %590  ;;  %v589_v23 = vpop.permute.xlu0 %588 }
 0x126   : > { %v783_v29 = vpop.permute.xlu1 %782  ;;  %v781_v34 = vpop.permute.xlu0 %780 }
 0x127   : > { %v784_v48 = vsel %vm442_vm2, %v781_v34, %v783_v29 }
 0x12a   : > { %v481_v11 = vpop.permute.xlu1 %480  ;;  %v479_v12 = vpop.permute.xlu0 %478 }
 0x12b   : > { %v482_v37 = vsel %vm442_vm2, %v479_v12, %v481_v11 }
 0x12c   : > { %v484_v56 = vadd.f32 %v482_v37, %v463_v30 }
 0x12e   : > { %v501_v39 = vadd.f32 %v4191_v33, %v484_v56  ;;  %v603_v41 = vpop.permute.xlu1 %602  ;;  %v601_v43 = vpop.permute.xlu0 %600  ;;  %v773_v33 = vsel %vm442_vm2, %v770_v15, %v772_v13 }
 0x12f   : > { %v775_v22 = vadd.f32 %v773_v33, %v764_v44  ;;  %v604_v28 = vsel %vm442_vm2, %v601_v43, %v603_v41  ;;  %v926_v44 = vunpack.c.l.s4 %v3895_v1  ;;  %v3666_v1 = vld [vmem:[%s5333_s3 + $0x10] sm:$0xff]  }
 0x130   : > { %v517_v20 = vadd.f32 %v515_v38, %v501_v39 }
 0x131   : > { %v786_v47 = vadd.f32 %v784_v48, %v775_v22  ;;  %v3319_v48 = vld [vmem:[%s5332_s2] ss:$0 sm:$0xff] }
 0x132   : > { %v714_v45 = vpop.permute.xlu1 %713  ;;  %v712_v46 = vpop.permute.xlu0 %711 }
 0x133   : > { %v715_v54 = vsel %vm442_vm2, %v712_v46, %v714_v45  ;;  %v795_v9 = vadd.f32 %v793_v0, %v786_v47  ;;  %v928_v45 = vlaneseq }
 0x134   : > { %v717_v32 = vadd.f32 %v715_v54, %v696_v16  ;;  %v927_v54 = vunpack.c.0.s8 %v926_v44 }
 0x136   : > { %v728_v55 = vadd.f32 %v4199_v42, %v717_v32  ;;  %v813_v25 = vpop.permute.xlu1 %812  ;;  %v811_v57 = vpop.permute.xlu0 %810  ;;  %v592_v42 = vsel %vm442_vm2, %v589_v23, %v591_v21  ;;  %v4386_v32 = vshrl.u32 %v928_v45, 7 }
 0x137   : > { %v814_v8 = vsel %vm442_vm2, %v811_v57, %v813_v25  ;;  %v594_v10 = vadd.f32 %v592_v42, %v579_v31 }
 0x138   : > { %v739_v59 = vadd.f32 %v4230_v4, %v728_v55  ;;  %v612_v4 = vrot.slane %v608_v63, 1  ;;  %v816_v27 = vadd.f32 %v814_v8, %v795_v9  ;;  %v4392_v50 = vsub.s32 %v927_v54, %v4386_v32 }
 0x139   : > { %v606_v16 = vadd.f32 %v604_v28, %v594_v10  ;;  %v4396_v57 = vsub.s32 0, %v4386_v32 }
 0x13a   : > { %v637_v5 = vpop.permute.xlu1 %636  ;;  %v635_v7 = vpop.permute.xlu0 %634  ;;  %v613_v3 = vsel %vm496_vm0, %v611_v53, %v612_v4 }
 0x13b   : > { %v638_v26 = vsel %vm442_vm2, %v635_v7, %v637_v5  ;;  %v615_v29 = vadd.f32 %v613_v3, %v606_v16 }
 0x13d   : > { %v640_v36 = vadd.f32 %v638_v26, %v615_v29  ;;  %v3662_v26 = vld [vmem:[%s5333_s3 + $0x30] sm:$0xff]  }
 0x13e   : > { %v834_v13 = vpop.permute.xlu1 %833  ;;  %v832_v15 = vpop.permute.xlu0 %831 }
 0x13f   : > { %v835_v2 = vsel %vm442_vm2, %v832_v15, %v834_v13  ;;  %v3661_v15 = vld [vmem:[%s5333_s3 + $0x38] sm:$0xff]  }
 0x140   : > { %v837_v61 = vadd.f32 %v835_v2, %v816_v27 }
 0x142   : > { %v546_v24 = vpop.permute.xlu1 %545  ;;  %v544_v21 = vpop.permute.xlu0 %543  ;;  %v846_v23 = vadd.f32 %v4237_v18, %v837_v61  ;;  %v3901_v61 = vmov 0  }
 0x143   : > { %v547_v34 = vsel %vm442_vm2, %v544_v21, %v546_v24  ;;  %1704 = vmatprep.subr.bf16.mxu0 %v3901_v61  ;;  %2288 = vmatprep.mubr.bf16.mxu1 %v3901_v61 }
 0x144   : > { %v549_v12 = vadd.f32 %v547_v34, %v517_v20  ;;  %1705 = vmatpush1.bf16.msra.mxu0 %v3661_v15 }
 0x145   : > { %1706 = vmatprep.subr.bf16.mxu0 %v3901_v61 }
 0x146   : > { %v660_v19 = vpop.permute.xlu1 %659  ;;  %v658_v6 = vpop.permute.xlu0 %657 }
 0x147   : > { %v661_v11 = vsel %vm442_vm2, %v658_v6, %v660_v19 }
 0x148   : > { %v663_v30 = vadd.f32 %v661_v11, %v640_v36  ;;  %1707 = vmatpush1.bf16.msra.mxu0 %v3662_v26  ;;  %v3663_v36 = vld [vmem:[%s5333_s3 + $0x28] sm:$0xff]   ;;  %v3664_v11 = vld [vmem:[%s5333_s3 + $0x20] sm:$0xff]  }
 0x149   : > { %1708 = vmatprep.subr.bf16.mxu0 %v3901_v61 }
 0x14a   : > { %v664_v37 = vmax.f32 %v549_v12, %v663_v30  ;;  %v759_v56 = vpop.permute.xlu1 %758  ;;  %v757_v38 = vpop.permute.xlu0 %756  ;;  %v1255_v12 = vld [vmem:[#allocation2 + $0x1] sm:$0xff] }
 0x14b   : > { %v760_v39 = vsel %vm442_vm2, %v757_v38, %v759_v56  ;;  %v1263_v30 = vld [vmem:[#allocation2 + $0x2] sm:$0xff] }
 0x14c   : > { %v762_v41 = vadd.f32 %v760_v39, %v739_v59  ;;  %1709 = vmatpush1.bf16.msra.mxu0 %v3663_v36 }
 0x14d   : > { %1710 = vmatprep.subr.bf16.mxu0 %v3901_v61 }
 0x14e   : > { %v763_v43 = vmax.f32 %v664_v37, %v762_v41  ;;  %v864_v18 = vpop.permute.xlu1 %863  ;;  %v862_v60 = vpop.permute.xlu0 %861 }
 0x14f   : > { %v865_v17 = vsel %vm442_vm2, %v862_v60, %v864_v18  ;;  %v3665_v18 = vld [vmem:[%s5333_s3 + $0x18] sm:$0xff]  }
 0x150   : > { %v867_v46 = vadd.f32 %v865_v17, %v846_v23  ;;  %1711 = vmatpush1.bf16.msra.mxu0 %v3664_v11 }
 0x151   : > { %1712 = vmatprep.subr.bf16.mxu0 %v3901_v61 }
 0x152   : > { %v887_v52 = vpop.permute.xlu1 %886  ;;  %v885_v33 = vpop.permute.xlu0 %884 }
 0x153   : > { %v888_v20 = vsel %vm442_vm2, %v885_v33, %v887_v52 }
 0x154   : > { %v890_v40 = vadd.f32 %v888_v20, %v867_v46  ;;  %1713 = vmatpush1.bf16.msra.mxu0 %v3665_v18  ;;  %v3667_v46 = vld [vmem:[%s5333_s3 + $0x8] sm:$0xff]  }
 0x155   : > { %1714 = vmatprep.subr.bf16.mxu0 %v3901_v61 }
 0x156   : > { %v891_v49 = vmax.f32 %v763_v43, %v890_v40 }
 0x158   : > { %v899_v51 = vadd.f32 %v3319_v48, %v891_v49  ;;  %1715 = vmatpush1.bf16.msra.mxu0 %v3666_v1 }
 0x159   : > { %1716 = vmatprep.subr.bf16.mxu0 %v3901_v61 }
 0x15a   : > { %v900_v22 = vmax.f32 %v899_v51, 0.0 }
 0x15c   : > { %v924_v55 = vcombine.high %v900_v22, %v900_v22  ;;  %v931_v25 = vrot.slane %v900_v22, %v4392_v50  ;;  %1717 = vmatpush1.bf16.msra.mxu0 %v3667_v46  ;;  %v3668_v22 = vld [vmem:[%s5333_s3] sm:$0xff]  }
 0x15d   : > { %1718 = vmatprep.subr.bf16.mxu0 %v3901_v61 }
 0x15e   : > { %v938_v58 = vrot.slane %v924_v55, %v4392_v50  ;;  %v939_v14 = vcombine.high %v931_v25, %v931_v25  ;;  %v947_v47 = vrot.slane %v931_v25, %v4392_v50 }
 0x160   : > { %v940_v59 = vcombine.high %v938_v58, %v938_v58  ;;  %v954_v0 = vrot.slane %v938_v58, %v4392_v50  ;;  %v961_v62 = vrot.slane %v939_v14, %v4392_v50  ;;  %v969_v63 = vcombine.high %v947_v47, %v947_v47  ;;  %983 = vst.msk [vmem:[#allocation2 + $0x11] sm:$0x1] %vm982_vm3, %v947_v47  ;;  %v3669_v14 = vld [vmem:[%s5333_s3 + $0x40] sm:$0xff]  }
 0x161   : > { %v994_v5 = vrot.slane %v947_v47, %v4396_v57  ;;  %1719 = vmatpush1.bf16.msra.mxu0 %v3668_v22 }
 0x162   : > { %v968_v7 = vrot.slane %v940_v59, %v4392_v50  ;;  %v970_v42 = vcombine.high %v954_v0, %v954_v0  ;;  %v971_v8 = vcombine.high %v961_v62, %v961_v62  ;;  %984 = vst.msk [vmem:[#allocation2 + $0x21] sm:$0x1] %vm982_vm3, %v961_v62  ;;  %985 = vst.msk [vmem:[#allocation2 + $0x31] sm:$0x1] %vm982_vm3, %v969_v63  ;;  %1734 = vmatprep.subr.bf16.mxu0 %v3901_v61 }
 0x163   : > { %987 = vst.msk [vmem:[#allocation2 + $0x51] sm:$0x1] %vm982_vm3, %v954_v0  ;;  %1055 = vrot.lane.b32.xlu1 %v994_v5, %s3896_s27  ;;  %1023 = vrot.lane.b32.xlu0 %v994_v5, %s3893_s29  ;;  %v998_v9 = vrot.slane %v961_v62, %v4396_v57  ;;  %v1002_v28 = vrot.slane %v969_v63, %v4396_v57 }
 0x164   : > { %v972_v31 = vcombine.high %v968_v7, %v968_v7  ;;  %986 = vst.msk [vmem:[#allocation2 + $0x41] sm:$0x1] %vm982_vm3, %v971_v8  ;;  %988 = vst.msk [vmem:[#allocation2 + $0x61] sm:$0x1] %vm982_vm3, %v968_v7  ;;  %v1010_v53 = vrot.slane %v954_v0, %v4396_v57  ;;  %v1006_v4 = vrot.slane %v971_v8, %v4396_v57 }
 0x165   : > { %989 = vst.msk [vmem:[#allocation2 + $0x71] sm:$0x1] %vm982_vm3, %v970_v42  ;;  %v1014_v10 = vrot.slane %v968_v7, %v4396_v57  ;;  %v1018_v27 = vrot.slane %v970_v42, %v4396_v57  ;;  %1735 = vmatpush2.bf16.msra.mxu0 %v3669_v14 }
 0x166   : > { %990 = vst.msk [vmem:[#allocation2 + $0x81] sm:$0x1] %vm982_vm3, %v972_v31  ;;  %v1022_v13 = vrot.slane %v972_v31, %v4396_v57 }
 0x167   : > { %1119 = vrot.lane.b32.xlu1 %v994_v5, %s3897_s28  ;;  %1087 = vrot.lane.b32.xlu0 %v994_v5, %s3898_s30 }
 0x16b   : > { %1183 = vrot.lane.b32.xlu1 %v994_v5, %s3899_s11  ;;  %1151 = vrot.lane.b32.xlu0 %v994_v5, %s3900_s12 }
 0x16f   : > { %1215 = vrot.lane.b32.xlu0 %v994_v5, %s3892_s20  ;;  %1025 = vrot.lane.b32.xlu1 %v998_v9, %s3893_s29 }
 0x173   : > { %1057 = vrot.lane.b32.xlu0 %v998_v9, %s3896_s27  ;;  %1089 = vrot.lane.b32.xlu1 %v998_v9, %s3898_s30 }
 0x177   : > { %1121 = vrot.lane.b32.xlu0 %v998_v9, %s3897_s28  ;;  %1153 = vrot.lane.b32.xlu1 %v998_v9, %s3900_s12 }
 0x17b   : > { %1185 = vrot.lane.b32.xlu0 %v998_v9, %s3899_s11  ;;  %1217 = vrot.lane.b32.xlu1 %v998_v9, %s3892_s20 }
 0x17f   : > { %1027 = vrot.lane.b32.xlu0 %v1002_v28, %s3893_s29  ;;  %1059 = vrot.lane.b32.xlu1 %v1002_v28, %s3896_s27 }
 0x183   : > { %1091 = vrot.lane.b32.xlu0 %v1002_v28, %s3898_s30  ;;  %1123 = vrot.lane.b32.xlu1 %v1002_v28, %s3897_s28 }
 0x187   : > { %1155 = vrot.lane.b32.xlu0 %v1002_v28, %s3900_s12  ;;  %1187 = vrot.lane.b32.xlu1 %v1002_v28, %s3899_s11 }
 0x18b   : > { %1219 = vrot.lane.b32.xlu0 %v1002_v28, %s3892_s20  ;;  %1063 = vrot.lane.b32.xlu1 %v1010_v53, %s3896_s27 }
 0x18f   : > { %1127 = vrot.lane.b32.xlu1 %v1010_v53, %s3897_s28  ;;  %1031 = vrot.lane.b32.xlu0 %v1010_v53, %s3893_s29 }
 0x193   : > { %1191 = vrot.lane.b32.xlu1 %v1010_v53, %s3899_s11  ;;  %1095 = vrot.lane.b32.xlu0 %v1010_v53, %s3898_s30 }
 0x197   : > { %1029 = vrot.lane.b32.xlu1 %v1006_v4, %s3893_s29  ;;  %1159 = vrot.lane.b32.xlu0 %v1010_v53, %s3900_s12 }
 0x19b   : > { %1093 = vrot.lane.b32.xlu1 %v1006_v4, %s3898_s30  ;;  %1223 = vrot.lane.b32.xlu0 %v1010_v53, %s3892_s20 }
 0x19f   : > { %1157 = vrot.lane.b32.xlu1 %v1006_v4, %s3900_s12  ;;  %1061 = vrot.lane.b32.xlu0 %v1006_v4, %s3896_s27 }
 0x1a3   : > { %1221 = vrot.lane.b32.xlu1 %v1006_v4, %s3892_s20  ;;  %1125 = vrot.lane.b32.xlu0 %v1006_v4, %s3897_s28 }
 0x1a7   : > { %1189 = vrot.lane.b32.xlu0 %v1006_v4, %s3899_s11  ;;  %1033 = vrot.lane.b32.xlu1 %v1014_v10, %s3893_s29 }
 0x1ab   : > { %1065 = vrot.lane.b32.xlu0 %v1014_v10, %s3896_s27  ;;  %1097 = vrot.lane.b32.xlu1 %v1014_v10, %s3898_s30 }
 0x1af   : > { %1129 = vrot.lane.b32.xlu0 %v1014_v10, %s3897_s28  ;;  %1161 = vrot.lane.b32.xlu1 %v1014_v10, %s3900_s12 }
 0x1b3   : > { %1193 = vrot.lane.b32.xlu0 %v1014_v10, %s3899_s11  ;;  %1225 = vrot.lane.b32.xlu1 %v1014_v10, %s3892_s20 }
 0x1b7   : > { %1035 = vrot.lane.b32.xlu0 %v1018_v27, %s3893_s29  ;;  %1067 = vrot.lane.b32.xlu1 %v1018_v27, %s3896_s27 }
 0x1bb   : > { %1099 = vrot.lane.b32.xlu0 %v1018_v27, %s3898_s30  ;;  %1131 = vrot.lane.b32.xlu1 %v1018_v27, %s3897_s28 }
 0x1bf   : > { %1163 = vrot.lane.b32.xlu0 %v1018_v27, %s3900_s12  ;;  %1195 = vrot.lane.b32.xlu1 %v1018_v27, %s3899_s11 }
 0x1c3   : > { %1227 = vrot.lane.b32.xlu0 %v1018_v27, %s3892_s20  ;;  %1037 = vrot.lane.b32.xlu1 %v1022_v13, %s3893_s29 }
 0x1c7   : > { %1069 = vrot.lane.b32.xlu0 %v1022_v13, %s3896_s27  ;;  %1101 = vrot.lane.b32.xlu1 %v1022_v13, %s3898_s30 }
 0x1cb   : > { %1133 = vrot.lane.b32.xlu0 %v1022_v13, %s3897_s28  ;;  %1165 = vrot.lane.b32.xlu1 %v1022_v13, %s3900_s12 }
 0x1cf   : > { %1197 = vrot.lane.b32.xlu0 %v1022_v13, %s3899_s11  ;;  %1229 = vrot.lane.b32.xlu1 %v1022_v13, %s3892_s20 }
 0x1d5   : > { %v1056_v2 = vpop.permute.xlu1 %1055  ;;  %v1024_v16 = vpop.permute.xlu0 %1023 }
 0x1d6   : > { %1079 = vst.msk [vmem:[#allocation2 + $0x13] sm:$0x1] %vm982_vm3, %v1056_v2  ;;  %1047 = vst.msk [vmem:[#allocation2 + $0x12] sm:$0x1] %vm982_vm3, %v1024_v16 }
 0x1d9   : > { %v1120_v3 = vpop.permute.xlu1 %1119  ;;  %v1088_v24 = vpop.permute.xlu0 %1087 }
 0x1da   : > { %1143 = vst.msk [vmem:[#allocation2 + $0x15] sm:$0x1] %vm982_vm3, %v1120_v3  ;;  %1111 = vst.msk [vmem:[#allocation2 + $0x14] sm:$0x1] %vm982_vm3, %v1088_v24 }
 0x1dd   : > { %v1184_v21 = vpop.permute.xlu1 %1183  ;;  %v1152_v23 = vpop.permute.xlu0 %1151 }
 0x1de   : > { %1207 = vst.msk [vmem:[#allocation2 + $0x17] sm:$0x1] %vm982_vm3, %v1184_v21  ;;  %1175 = vst.msk [vmem:[#allocation2 + $0x16] sm:$0x1] %vm982_vm3, %v1152_v23 }
 0x1e1   : > { %v1216_v29 = vpop.permute.xlu0 %1215  ;;  %v1026_v34 = vpop.permute.xlu1 %1025 }
 0x1e2   : > { %1239 = vst.msk [vmem:[#allocation2 + $0x18] sm:$0x1] %vm982_vm3, %v1216_v29  ;;  %1048 = vst.msk [vmem:[#allocation2 + $0x22] sm:$0x1] %vm982_vm3, %v1026_v34 }
 0x1e5   : > { %v1058_v19 = vpop.permute.xlu0 %1057  ;;  %v1090_v6 = vpop.permute.xlu1 %1089  ;;  %v4532_v20 = vld [vmem:[#allocation2 + $0x10] sm:$0xff] }
 0x1e6   : > { %1080 = vst.msk [vmem:[#allocation2 + $0x23] sm:$0x1] %vm982_vm3, %v1058_v19  ;;  %1112 = vst.msk [vmem:[#allocation2 + $0x24] sm:$0x1] %vm982_vm3, %v1090_v6 }
 0x1e9   : > { %v1122_v37 = vpop.permute.xlu0 %1121  ;;  %v1154_v56 = vpop.permute.xlu1 %1153  ;;  %v1256_v38 = vld [vmem:[#allocation2 + $0x11] sm:$0xff] }
 0x1ea   : > { %v1264_v39 = vld [vmem:[#allocation2 + $0x12] sm:$0xff]  ;;  %1144 = vst.msk [vmem:[#allocation2 + $0x25] sm:$0x1] %vm982_vm3, %v1122_v37  ;;  %1176 = vst.msk [vmem:[#allocation2 + $0x26] sm:$0x1] %vm982_vm3, %v1154_v56  ;;  %v3521_v41 = vpack.i.bf16 %v1256_v38, %v1255_v12 }
 0x1eb   : > { %v3526_v43 = vpack.i.bf16 %v1264_v39, %v1263_v30 }
 0x1ec   : > { %3522 = vrot.lane.b32.xlu0 %v3521_v41, %s3892_s20 }
 0x1ed   : > { %3527 = vrot.lane.b32.xlu1 %v3526_v43, %s3899_s11  ;;  %v1186_v60 = vpop.permute.xlu0 %1185  ;;  %v1218_v17 = vpop.permute.xlu1 %1217 }
 0x1ee   : > { %1208 = vst.msk [vmem:[#allocation2 + $0x27] sm:$0x1] %vm982_vm3, %v1186_v60  ;;  %1240 = vst.msk [vmem:[#allocation2 + $0x28] sm:$0x1] %vm982_vm3, %v1218_v17 }
 0x1f1   : > { %v1028_v44 = vpop.permute.xlu0 %1027  ;;  %v1060_v45 = vpop.permute.xlu1 %1059 }
 0x1f2   : > { %1049 = vst.msk [vmem:[#allocation2 + $0x32] sm:$0x1] %vm982_vm3, %v1028_v44  ;;  %1081 = vst.msk [vmem:[#allocation2 + $0x33] sm:$0x1] %vm982_vm3, %v1060_v45 }
 0x1f5   : > { %v1092_v52 = vpop.permute.xlu0 %1091  ;;  %v1124_v33 = vpop.permute.xlu1 %1123  ;;  %v4534_v54 = vld [vmem:[#allocation2 + $0x20] sm:$0xff] }
 0x1f6   : > { %v1280_v40 = vld [vmem:[#allocation2 + $0x21] sm:$0xff]  ;;  %1113 = vst.msk [vmem:[#allocation2 + $0x34] sm:$0x1] %vm982_vm3, %v1092_v52  ;;  %1145 = vst.msk [vmem:[#allocation2 + $0x35] sm:$0x1] %vm982_vm3, %v1124_v33  ;;  %v3531_v48 = vpack.i.bf16 %v4534_v54, %v4532_v20 }
 0x1f7   : > { %v3536_v49 = vpack.i.bf16 %v1280_v40, %v1256_v38  ;;  %v1288_v51 = vld [vmem:[#allocation2 + $0x22] sm:$0xff] }
 0x1f8   : > { %3532 = vrot.lane.b32.xlu0 %v3531_v48, %s3900_s12  ;;  %v3541_v58 = vpack.i.bf16 %v1288_v51, %v1264_v39 }
 0x1f9   : > { %3537 = vrot.lane.b32.xlu1 %v3536_v49, %s3897_s28  ;;  %v1156_v55 = vpop.permute.xlu0 %1155  ;;  %v1188_v25 = vpop.permute.xlu1 %1187 }
 0x1fa   : > { %1177 = vst.msk [vmem:[#allocation2 + $0x36] sm:$0x1] %vm982_vm3, %v1156_v55  ;;  %1209 = vst.msk [vmem:[#allocation2 + $0x37] sm:$0x1] %vm982_vm3, %v1188_v25 }
 0x1fc   : > { %3542 = vrot.lane.b32.xlu0 %v3541_v58, %s3898_s30 }
 0x1fd   : > { %v1220_v47 = vpop.permute.xlu0 %1219  ;;  %v1064_v59 = vpop.permute.xlu1 %1063 }
 0x1fe   : > { %1241 = vst.msk [vmem:[#allocation2 + $0x38] sm:$0x1] %vm982_vm3, %v1220_v47  ;;  %1083 = vst.msk [vmem:[#allocation2 + $0x53] sm:$0x1] %vm982_vm3, %v1064_v59 }
 0x201   : > { %v1128_v0 = vpop.permute.xlu1 %1127  ;;  %v1032_v62 = vpop.permute.xlu0 %1031  ;;  %v4555_v63 = vld [vmem:[#allocation2 + $0x30] sm:$0xff] }
 0x202   : > { %1147 = vst.msk [vmem:[#allocation2 + $0x55] sm:$0x1] %vm982_vm3, %v1128_v0  ;;  %1051 = vst.msk [vmem:[#allocation2 + $0x52] sm:$0x1] %vm982_vm3, %v1032_v62  ;;  %v3546_v5 = vpack.i.bf16 %v4555_v63, %v4534_v54 }
 0x204   : > { %3547 = vrot.lane.b32.xlu1 %v3546_v5, %s3896_s27 }
 0x205   : > { %v1192_v7 = vpop.permute.xlu1 %1191  ;;  %v1096_v42 = vpop.permute.xlu0 %1095  ;;  %v1313_v8 = vld [vmem:[#allocation2 + $0x32] sm:$0xff] }
 0x206   : > { %v1305_v31 = vld [vmem:[#allocation2 + $0x31] sm:$0xff]  ;;  %1211 = vst.msk [vmem:[#allocation2 + $0x57] sm:$0x1] %vm982_vm3, %v1192_v7  ;;  %1115 = vst.msk [vmem:[#allocation2 + $0x54] sm:$0x1] %vm982_vm3, %v1096_v42  ;;  %v1606_v9 = vpack.c.bf16 %v1313_v8, %v1288_v51  ;;  %v3561_v10 = vpack.i.bf16 %v1313_v8, %v1288_v51 }
 0x207   : > { %v3551_v28 = vpack.i.bf16 %v1305_v31, %v1280_v40 }
 0x208   : > { %3330 = vmatprep.mubr.msk.bf16.mxu0 %vm901_vm1, %v1606_v9 }
 0x209   : > { %3552 = vrot.lane.b32.xlu0 %v3551_v28, %s3893_s29  ;;  %3557 = vrot.lane.b32.xlu1 %v3551_v28, %s3892_s20  ;;  %v1030_v53 = vpop.permute.xlu1 %1029  ;;  %v1160_v4 = vpop.permute.xlu0 %1159 }
 0x20a   : > { %1050 = vst.msk [vmem:[#allocation2 + $0x42] sm:$0x1] %vm982_vm3, %v1030_v53  ;;  %1179 = vst.msk [vmem:[#allocation2 + $0x56] sm:$0x1] %vm982_vm3, %v1160_v4 }
 0x20d   : > { %3562 = vrot.lane.b32.xlu0 %v3561_v10, %s3899_s11  ;;  %v1094_v27 = vpop.permute.xlu1 %1093  ;;  %v1224_v13 = vpop.permute.xlu0 %1223 }
 0x20e   : > { %1114 = vst.msk [vmem:[#allocation2 + $0x44] sm:$0x1] %vm982_vm3, %v1094_v27  ;;  %1243 = vst.msk [vmem:[#allocation2 + $0x58] sm:$0x1] %vm982_vm3, %v1224_v13 }
 0x211   : > { %v1158_v15 = vpop.permute.xlu1 %1157  ;;  %v1062_v2 = vpop.permute.xlu0 %1061  ;;  %v4594_v39 = vld [vmem:[#allocation2 + $0x50] sm:$0xff] }
 0x212   : > { %1178 = vst.msk [vmem:[#allocation2 + $0x46] sm:$0x1] %vm982_vm3, %v1158_v15  ;;  %1082 = vst.msk [vmem:[#allocation2 + $0x43] sm:$0x1] %vm982_vm3, %v1062_v2  ;;  %v1303_v15 = vld [vmem:[#allocation2 + $0x90] sm:$0xff] }
 0x215   : > { %v1222_v16 = vpop.permute.xlu1 %1221  ;;  %v1126_v3 = vpop.permute.xlu0 %1125  ;;  %v4588_v30 = vld [vmem:[#allocation2 + $0x52] sm:$0xff] }
 0x216   : > { %1242 = vst.msk [vmem:[#allocation2 + $0x48] sm:$0x1] %vm982_vm3, %v1222_v16  ;;  %1146 = vst.msk [vmem:[#allocation2 + $0x45] sm:$0x1] %vm982_vm3, %v1126_v3  ;;  %v1260_v17 = vld [vmem:[#allocation2 + $0x51] sm:$0xff] }
 0x219   : > { %v1190_v24 = vpop.permute.xlu0 %1189  ;;  %v1034_v21 = vpop.permute.xlu1 %1033 }
 0x21a   : > { %1210 = vst.msk [vmem:[#allocation2 + $0x47] sm:$0x1] %vm982_vm3, %v1190_v24  ;;  %1052 = vst.msk [vmem:[#allocation2 + $0x62] sm:$0x1] %vm982_vm3, %v1034_v21  ;;  %v1311_v24 = vld [vmem:[#allocation2 + $0x91] sm:$0xff] }
 0x21d   : > { %v1066_v23 = vpop.permute.xlu0 %1065  ;;  %v1098_v26 = vpop.permute.xlu1 %1097 }
 0x21e   : > { %1084 = vst.msk [vmem:[#allocation2 + $0x63] sm:$0x1] %vm982_vm3, %v1066_v23  ;;  %1116 = vst.msk [vmem:[#allocation2 + $0x64] sm:$0x1] %vm982_vm3, %v1098_v26 }
 0x221   : > { %v1130_v29 = vpop.permute.xlu0 %1129  ;;  %v1162_v34 = vpop.permute.xlu1 %1161  ;;  %v1282_v36 = vld [vmem:[#allocation2 + $0x41] sm:$0xff] }
 0x222   : > { %v4580_v19 = vld [vmem:[#allocation2 + $0x40] sm:$0xff]  ;;  %1148 = vst.msk [vmem:[#allocation2 + $0x65] sm:$0x1] %vm982_vm3, %v1130_v29  ;;  %1180 = vst.msk [vmem:[#allocation2 + $0x66] sm:$0x1] %vm982_vm3, %v1162_v34  ;;  %v3571_v11 = vpack.i.bf16 %v1282_v36, %v1305_v31  ;;  %v3591_v1 = vpack.i.bf16 %v1260_v17, %v1282_v36 }
 0x223   : > { %v4582_v6 = vld [vmem:[#allocation2 + $0x42] sm:$0xff]  ;;  %v3566_v12 = vpack.i.bf16 %v4580_v19, %v4555_v63  ;;  %v3581_v41 = vpack.i.bf16 %v4594_v39, %v4580_v19 }
 0x224   : > { %v1608_v37 = vpack.c.bf16 %v4588_v30, %v4582_v6  ;;  %3572 = vrot.lane.b32.xlu0 %v3571_v11, %s3897_s28  ;;  %v3576_v43 = vpack.i.bf16 %v4582_v6, %v1313_v8  ;;  %v3596_v33 = vpack.i.bf16 %v4588_v30, %v4582_v6  ;;  %v1247_v11 = vld [vmem:[#allocation2] sm:$0xff] }
 0x225   : > { %3567 = vrot.lane.b32.xlu1 %v3566_v12, %s3900_s12  ;;  %v1194_v56 = vpop.permute.xlu0 %1193  ;;  %v1226_v38 = vpop.permute.xlu1 %1225 }
 0x226   : > { %1212 = vst.msk [vmem:[#allocation2 + $0x67] sm:$0x1] %vm982_vm3, %v1194_v56  ;;  %1244 = vst.msk [vmem:[#allocation2 + $0x68] sm:$0x1] %vm982_vm3, %v1226_v38 }
 0x228   : > { %3582 = vrot.lane.b32.xlu0 %v3581_v41, %s3896_s27 }
 0x229   : > { %3577 = vrot.lane.b32.xlu1 %v3576_v43, %s3898_s30  ;;  %v1036_v18 = vpop.permute.xlu0 %1035  ;;  %v1068_v60 = vpop.permute.xlu1 %1067 }
 0x22a   : > { %1053 = vst.msk [vmem:[#allocation2 + $0x72] sm:$0x1] %vm982_vm3, %v1036_v18  ;;  %1085 = vst.msk [vmem:[#allocation2 + $0x73] sm:$0x1] %vm982_vm3, %v1068_v60 }
 0x22c   : > { %3592 = vrot.lane.b32.xlu0 %v3591_v1, %s3892_s20 }
 0x22d   : > { %3587 = vrot.lane.b32.xlu1 %v3591_v1, %s3893_s29  ;;  %v1100_v44 = vpop.permute.xlu0 %1099  ;;  %v1132_v45 = vpop.permute.xlu1 %1131  ;;  %v4607_v46 = vld [vmem:[#allocation2 + $0x60] sm:$0xff] }
 0x22e   : > { %1117 = vst.msk [vmem:[#allocation2 + $0x74] sm:$0x1] %vm982_vm3, %v1100_v44  ;;  %1149 = vst.msk [vmem:[#allocation2 + $0x75] sm:$0x1] %vm982_vm3, %v1132_v45  ;;  %v3601_v52 = vpack.i.bf16 %v4607_v46, %v4594_v39  ;;  %v4615_v40 = vld [vmem:[#allocation2 + $0x62] sm:$0xff] }
 0x22f   : > { %v1284_v48 = vld [vmem:[#allocation2 + $0x61] sm:$0xff]  ;;  %v3611_v22 = vpack.i.bf16 %v4615_v40, %v4588_v30 }
 0x230   : > { %3602 = vrot.lane.b32.xlu0 %v3601_v52, %s3900_s12  ;;  %v3606_v55 = vpack.i.bf16 %v1284_v48, %v1260_v17 }
 0x231   : > { %3597 = vrot.lane.b32.xlu1 %v3596_v33, %s3899_s11  ;;  %v1164_v49 = vpop.permute.xlu0 %1163  ;;  %v1196_v51 = vpop.permute.xlu1 %1195 }
 0x232   : > { %1181 = vst.msk [vmem:[#allocation2 + $0x76] sm:$0x1] %vm982_vm3, %v1164_v49  ;;  %1213 = vst.msk [vmem:[#allocation2 + $0x77] sm:$0x1] %vm982_vm3, %v1196_v51 }
 0x234   : > { %3612 = vrot.lane.b32.xlu0 %v3611_v22, %s3898_s30 }
 0x235   : > { %3607 = vrot.lane.b32.xlu1 %v3606_v55, %s3897_s28  ;;  %v1228_v25 = vpop.permute.xlu0 %1227  ;;  %v1038_v58 = vpop.permute.xlu1 %1037 }
 0x236   : > { %1245 = vst.msk [vmem:[#allocation2 + $0x78] sm:$0x1] %vm982_vm3, %v1228_v25  ;;  %1054 = vst.msk [vmem:[#allocation2 + $0x82] sm:$0x1] %vm982_vm3, %v1038_v58 }
 0x239   : > { %v1070_v14 = vpop.permute.xlu0 %1069  ;;  %v1102_v47 = vpop.permute.xlu1 %1101  ;;  %v4627_v59 = vld [vmem:[#allocation2 + $0x70] sm:$0xff] }
 0x23a   : > { %1086 = vst.msk [vmem:[#allocation2 + $0x83] sm:$0x1] %vm982_vm3, %v1070_v14  ;;  %1118 = vst.msk [vmem:[#allocation2 + $0x84] sm:$0x1] %vm982_vm3, %v1102_v47  ;;  %v3616_v0 = vpack.i.bf16 %v4627_v59, %v4607_v46 }
 0x23c   : > { %3617 = vrot.lane.b32.xlu1 %v3616_v0, %s3896_s27 }
 0x23d   : > { %v1134_v62 = vpop.permute.xlu0 %1133  ;;  %v1166_v5 = vpop.permute.xlu1 %1165  ;;  %v1309_v7 = vld [vmem:[#allocation2 + $0x71] sm:$0xff] }
 0x23e   : > { %v4634_v42 = vld [vmem:[#allocation2 + $0x72] sm:$0xff]  ;;  %1150 = vst.msk [vmem:[#allocation2 + $0x85] sm:$0x1] %vm982_vm3, %v1134_v62  ;;  %1182 = vst.msk [vmem:[#allocation2 + $0x86] sm:$0x1] %vm982_vm3, %v1166_v5  ;;  %v3621_v8 = vpack.i.bf16 %v1309_v7, %v1284_v48 }
 0x23f   : > { %v1610_v31 = vpack.c.bf16 %v4634_v42, %v4615_v40  ;;  %v3631_v53 = vpack.i.bf16 %v4634_v42, %v4615_v40 }
 0x240   : > { %3622 = vrot.lane.b32.xlu0 %v3621_v8, %s3893_s29  ;;  %3627 = vrot.lane.b32.xlu1 %v3621_v8, %s3892_s20  ;;  %s5344_s20 = sadd.s32 4294967295, %s3890_s16  }
 0x241   : > { %v1198_v9 = vpop.permute.xlu0 %1197  ;;  %v1230_v28 = vpop.permute.xlu1 %1229 }
 0x242   : > { %1214 = vst.msk [vmem:[#allocation2 + $0x87] sm:$0x1] %vm982_vm3, %v1198_v9  ;;  %1246 = vst.msk [vmem:[#allocation2 + $0x88] sm:$0x1] %vm982_vm3, %v1230_v28 }
 0x244   : > { %3632 = vrot.lane.b32.xlu0 %v3631_v53, %s3899_s11 }
 0x249   : > { %v1286_v4 = vld [vmem:[#allocation2 + $0x81] sm:$0xff] }
 0x24a   : > { %v1278_v10 = vld [vmem:[#allocation2 + $0x80] sm:$0xff]  ;;  %v3641_v27 = vpack.i.bf16 %v1286_v4, %v1309_v7  ;;  %v3656_v21 = vpack.i.bf16 %v1311_v24, %v1286_v4 }
 0x24b   : > { %v3636_v13 = vpack.i.bf16 %v1278_v10, %v4627_v59  ;;  %v4648_v2 = vld [vmem:[#allocation2 + $0x82] sm:$0xff]  ;;  %v3651_v16 = vpack.i.bf16 %v1303_v15, %v1278_v10 }
 0x24c   : > { %3642 = vrot.lane.b32.xlu0 %v3641_v27, %s3897_s28  ;;  %v3646_v3 = vpack.i.bf16 %v4648_v2, %v4634_v42 }
 0x24d   : > { %3637 = vrot.lane.b32.xlu1 %v3636_v13, %s3900_s12 }
 0x250   : > { %3652 = vrot.lane.b32.xlu0 %v3651_v16, %s3896_s27 }
 0x251   : > { %3647 = vrot.lane.b32.xlu1 %v3646_v3, %s3898_s30 }
 0x255   : > { %3657 = vrot.lane.b32.xlu1 %v3656_v21, %s3893_s29  ;;  %s3414_s29 = sshll.u32 %s5344_s20, 4  ;;  %s3836_s20 = scalar_lea.vmem %s3835_s25, 32 }
 0x256   : > { %s5293_s26 = scalar_lea.hbm %s5340_s10, %s3414_s29 }
 0x25e   : > { %v3523_v23 = vpop.permute.xlu0 %3522 }
 0x25f   : > { %v3528_v26 = vpop.permute.xlu1 %3527  ;;  %v3525_v34 = vunpack.i.h.bf16 %v3523_v23  ;;  %v3524_v36 = vunpack.i.l.bf16 %v3523_v23 }
 0x260   : > { %v3530_v12 = vunpack.i.h.bf16 %v3528_v26  ;;  %v3529_v56 = vunpack.i.l.bf16 %v3528_v26 }
 0x261   : > { %v1545_v41 = vsel %vm901_vm1, %v4532_v20, %v3525_v34  ;;  %v1544_v43 = vsel %vm901_vm1, %v1247_v11, %v3524_v36 }
 0x262   : > { %v1554_v1 = vsel %vm1552_vm5, %v1545_v41, %v3530_v12  ;;  %v1553_v44 = vsel %vm1552_vm5, %v1544_v43, %v3529_v56 }
 0x26a   : > { %v3533_v29 = vpop.permute.xlu0 %3532 }
 0x26b   : > { %v3538_v38 = vpop.permute.xlu1 %3537  ;;  %v3535_v18 = vunpack.i.h.bf16 %v3533_v29  ;;  %v3534_v60 = vunpack.i.l.bf16 %v3533_v29 }
 0x26c   : > { %v3540_v45 = vunpack.i.h.bf16 %v3538_v38  ;;  %v3539_v52 = vunpack.i.l.bf16 %v3538_v38 }
 0x26d   : > { %v1562_v48 = vsel %vm1561_vm6, %v1553_v44, %v3534_v60  ;;  %v1563_v49 = vsel %vm1561_vm6, %v1554_v1, %v3535_v18 }
 0x26e   : > { %v3543_v17 = vpop.permute.xlu0 %3542  ;;  %v1571_v25 = vsel %vm1570_vm7, %v1562_v48, %v3539_v52  ;;  %v1572_v58 = vsel %vm1570_vm7, %v1563_v49, %v3540_v45 }
 0x26f   : > { %v3545_v51 = vunpack.i.h.bf16 %v3543_v17  ;;  %v3544_v20 = vunpack.i.l.bf16 %v3543_v17 }
 0x271   : > { %v1580_v47 = vsel %vm1579_vm8, %v1571_v25, %v3544_v20  ;;  %v1581_v0 = vsel %vm1579_vm8, %v1572_v58, %v3545_v51 }
 0x276   : > { %v3548_v33 = vpop.permute.xlu1 %3547 }
 0x277   : > { %v3550_v22 = vunpack.i.h.bf16 %v3548_v33  ;;  %v3549_v55 = vunpack.i.l.bf16 %v3548_v33 }
 0x279   : > { %v1589_v7 = vsel %vm1588_vm9, %v1580_v47, %v3549_v55  ;;  %v1590_v8 = vsel %vm1588_vm9, %v1581_v0, %v3550_v22 }
 0x27b   : > { %v3553_v14 = vpop.permute.xlu0 %3552  ;;  %v3558_v4 = vpop.permute.xlu1 %3557 }
 0x27c   : > { %v3555_v62 = vunpack.i.h.bf16 %v3553_v14  ;;  %v3554_v5 = vunpack.i.l.bf16 %v3553_v14  ;;  %v3560_v27 = vunpack.i.h.bf16 %v3558_v4  ;;  %v3559_v13 = vunpack.i.l.bf16 %v3558_v4 }
 0x27e   : > { %v1597_v9 = vsel %vm442_vm2, %v1589_v7, %v3554_v5  ;;  %v1598_v28 = vsel %vm442_vm2, %v1590_v8, %v3555_v62  ;;  %v1547_v21 = vsel %vm901_vm1, %v4555_v63, %v3560_v27  ;;  %v1546_v23 = vsel %vm901_vm1, %v4534_v54, %v3559_v13 }
 0x27f   : > { %v1605_v53 = vpack.c.bf16 %v1598_v28, %v1597_v9  ;;  %v3563_v10 = vpop.permute.xlu0 %3562 }
 0x280   : > { %v3565_v15 = vunpack.i.h.bf16 %v3563_v10  ;;  %v3564_v16 = vunpack.i.l.bf16 %v3563_v10 }
 0x281   : > { %1737 = vmatmul.mubr.bf16.vlgmr.msra.gmra.mxu0 %v1605_v53 }
 0x282   : > { %3331 = vmatprep.mubr.msk.bf16.mxu0 %vm901_vm1, %v1608_v37  ;;  %v1555_v6 = vsel %vm1552_vm5, %v1546_v23, %v3564_v16  ;;  %v1556_v30 = vsel %vm1552_vm5, %v1547_v21, %v3565_v15 }
 0x296   : > { %v3573_v3 = vpop.permute.xlu0 %3572 }
 0x297   : > { %v3568_v24 = vpop.permute.xlu1 %3567  ;;  %v3575_v37 = vunpack.i.h.bf16 %v3573_v3  ;;  %v3574_v34 = vunpack.i.l.bf16 %v3573_v3 }
 0x298   : > { %v3570_v26 = vunpack.i.h.bf16 %v3568_v24  ;;  %v3569_v29 = vunpack.i.l.bf16 %v3568_v24 }
 0x29a   : > { %v1564_v36 = vsel %vm1561_vm6, %v1555_v6, %v3569_v29  ;;  %v1565_v11 = vsel %vm1561_vm6, %v1556_v30, %v3570_v26  ;;  %v3583_v12 = vpop.permute.xlu0 %3582  ;;  %v1319_v30 = vld [vmem:[#allocation2 + $0x92] sm:$0xff] }
 0x29b   : > { %v3578_v56 = vpop.permute.xlu1 %3577  ;;  %v3585_v63 = vunpack.i.h.bf16 %v3583_v12  ;;  %v3584_v43 = vunpack.i.l.bf16 %v3583_v12  ;;  %v1573_v54 = vsel %vm1570_vm7, %v1564_v36, %v3574_v34  ;;  %v1574_v18 = vsel %vm1570_vm7, %v1565_v11, %v3575_v37 }
 0x29c   : > { %v3580_v38 = vunpack.i.h.bf16 %v3578_v56  ;;  %v3579_v41 = vunpack.i.l.bf16 %v3578_v56  ;;  %v1612_v11 = vpack.c.bf16 %v1319_v30, %v4648_v2 }
 0x29e   : > { %v1582_v60 = vsel %vm1579_vm8, %v1573_v54, %v3579_v41  ;;  %v1583_v17 = vsel %vm1579_vm8, %v1574_v18, %v3580_v38  ;;  %v3593_v52 = vpop.permute.xlu0 %3592 }
 0x29f   : > { %v3588_v1 = vpop.permute.xlu1 %3587  ;;  %v1591_v33 = vsel %vm1588_vm9, %v1582_v60, %v3584_v43  ;;  %v1592_v48 = vsel %vm1588_vm9, %v1583_v17, %v3585_v63  ;;  %v3595_v25 = vunpack.i.h.bf16 %v3593_v52  ;;  %v3594_v58 = vunpack.i.l.bf16 %v3593_v52 }
 0x2a0   : > { %v3590_v44 = vunpack.i.h.bf16 %v3588_v1  ;;  %v3589_v45 = vunpack.i.l.bf16 %v3588_v1 }
 0x2a1   : > { %v1549_v62 = vsel %vm901_vm1, %v4594_v39, %v3595_v25  ;;  %v1548_v5 = vsel %vm901_vm1, %v4580_v19, %v3594_v58 }
 0x2a2   : > { %v1599_v49 = vsel %vm442_vm2, %v1591_v33, %v3589_v45  ;;  %v1600_v51 = vsel %vm442_vm2, %v1592_v48, %v3590_v44  ;;  %v3603_v55 = vpop.permute.xlu0 %3602 }
 0x2a3   : > { %v1607_v20 = vpack.c.bf16 %v1600_v51, %v1599_v49  ;;  %v3598_v22 = vpop.permute.xlu1 %3597  ;;  %v3605_v7 = vunpack.i.h.bf16 %v3603_v55  ;;  %v3604_v8 = vunpack.i.l.bf16 %v3603_v55 }
 0x2a4   : > { %v3600_v14 = vunpack.i.h.bf16 %v3598_v22  ;;  %v3599_v47 = vunpack.i.l.bf16 %v3598_v22 }
 0x2a5   : > { %1745 = vmatmul.mubr.bf16.gmra.mxu0 %v1607_v20 }
 0x2a6   : > { %3332 = vmatprep.mubr.msk.bf16.mxu0 %vm901_vm1, %v1610_v31  ;;  %v1558_v9 = vsel %vm1552_vm5, %v1549_v62, %v3600_v14  ;;  %v1557_v40 = vsel %vm1552_vm5, %v1548_v5, %v3599_v47  ;;  %v3613_v42 = vpop.permute.xlu0 %3612 }
 0x2a7   : > { %v3608_v0 = vpop.permute.xlu1 %3607  ;;  %v3615_v4 = vunpack.i.h.bf16 %v3613_v42  ;;  %v3614_v10 = vunpack.i.l.bf16 %v3613_v42  ;;  %v1566_v27 = vsel %vm1561_vm6, %v1557_v40, %v3604_v8  ;;  %v1567_v13 = vsel %vm1561_vm6, %v1558_v9, %v3605_v7 }
 0x2a8   : > { %v3610_v31 = vunpack.i.h.bf16 %v3608_v0  ;;  %v3609_v28 = vunpack.i.l.bf16 %v3608_v0 }
 0x2aa   : > { %v1575_v39 = vsel %vm1570_vm7, %v1566_v27, %v3609_v28  ;;  %v1576_v19 = vsel %vm1570_vm7, %v1567_v13, %v3610_v31  ;;  %v4734_v31 = vld [vmem:[%s5334_s4] ss:$0 sm:$0xff] }
 0x2ab   : > { %v1584_v24 = vsel %vm1579_vm8, %v1575_v39, %v3614_v10  ;;  %v1585_v21 = vsel %vm1579_vm8, %v1576_v19, %v3615_v4 }
 0x2ae   : > { %v3618_v53 = vpop.permute.xlu1 %3617 }
 0x2af   : > { %v3620_v15 = vunpack.i.h.bf16 %v3618_v53  ;;  %v3619_v16 = vunpack.i.l.bf16 %v3618_v53 }
 0x2b1   : > { %v1593_v29 = vsel %vm1588_vm9, %v1584_v24, %v3619_v16  ;;  %v1594_v6 = vsel %vm1588_vm9, %v1585_v21, %v3620_v15 }
 0x2b2   : > { %v3623_v3 = vpop.permute.xlu0 %3622  ;;  %v3628_v12 = vpop.permute.xlu1 %3627 }
 0x2b3   : > { %v3625_v23 = vunpack.i.h.bf16 %v3623_v3  ;;  %v3624_v26 = vunpack.i.l.bf16 %v3623_v3  ;;  %v3630_v38 = vunpack.i.h.bf16 %v3628_v12  ;;  %v3629_v41 = vunpack.i.l.bf16 %v3628_v12 }
 0x2b4   : > { %v3902_v3 = vmov 1983009808  }
 0x2b5   : > { %v1601_v37 = vsel %vm442_vm2, %v1593_v29, %v3624_v26  ;;  %v1602_v34 = vsel %vm442_vm2, %v1594_v6, %v3625_v23  ;;  %v1551_v60 = vsel %vm901_vm1, %v4627_v59, %v3630_v38  ;;  %v1550_v17 = vsel %vm901_vm1, %v4607_v46, %v3629_v41  ;;  %v3670_v38 = vld [vmem:[%s5335_s5 + $0xe4] ss:$16 sps:$4 sm:$0xff]   ;;  %v3672_v41 = vld [vmem:[%s5335_s5 + $0xe0] ss:$16 sps:$4 sm:$0xff]  }
 0x2b6   : > { %v1609_v36 = vpack.c.bf16 %v1602_v34, %v1601_v37  ;;  %v3633_v56 = vpop.permute.xlu0 %3632  ;;  %v1787_v24 = vunpack.c.l.s4 %v3902_v3  ;;  %2256 = vmatprep.subr.bf16.mxu1 %v3670_v38 }
 0x2b7   : > { %v3635_v63 = vunpack.i.h.bf16 %v3633_v56  ;;  %v3634_v43 = vunpack.i.l.bf16 %v3633_v56  ;;  %2257 = vmatpush1.bf16.msra.mxu1 %v3672_v41 }
 0x2b8   : > { %1753 = vmatmul.mubr.bf16.gmra.mxu0 %v1609_v36  ;;  %v1788_v29 = vunpack.c.0.s8 %v1787_v24 }
 0x2b9   : > { %3333 = vmatprep.mubr.msk.bf16.mxu0 %vm901_vm1, %v1612_v11  ;;  %v1559_v2 = vsel %vm1552_vm5, %v1550_v17, %v3634_v43  ;;  %v1560_v45 = vsel %vm1552_vm5, %v1551_v60, %v3635_v63  ;;  %v3673_v63 = vld [vmem:[%s5335_s5 + $0xc4] ss:$16 sps:$4 sm:$0xff]   ;;  %v3675_v60 = vld [vmem:[%s5335_s5 + $0xc0] ss:$16 sps:$4 sm:$0xff]  }
 0x2ba   : > { %v4743_v36 = vsub.s32 %v1788_v29, %v4386_v32  ;;  %2258 = vmatprep.subr.bf16.mxu1 %v3673_v63 }
 0x2bb   : > { %2259 = vmatpush1.bf16.msra.mxu1 %v3675_v60 }
 0x2be   : > { %v3643_v54 = vpop.permute.xlu0 %3642 }
 0x2bf   : > { %v3638_v18 = vpop.permute.xlu1 %3637  ;;  %v3645_v52 = vunpack.i.h.bf16 %v3643_v54  ;;  %v3644_v33 = vunpack.i.l.bf16 %v3643_v54 }
 0x2c0   : > { %v3640_v1 = vunpack.i.h.bf16 %v3638_v18  ;;  %v3639_v44 = vunpack.i.l.bf16 %v3638_v18 }
 0x2c2   : > { %v1569_v48 = vsel %vm1561_vm6, %v1560_v45, %v3640_v1  ;;  %v1568_v49 = vsel %vm1561_vm6, %v1559_v2, %v3639_v44  ;;  %v3653_v51 = vpop.permute.xlu0 %3652  ;;  %v3676_v45 = vld [vmem:[%s5335_s5 + $0xa4] ss:$16 sps:$4 sm:$0xff]  }
 0x2c3   : > { %v3648_v20 = vpop.permute.xlu1 %3647  ;;  %v3655_v59 = vunpack.i.h.bf16 %v3653_v51  ;;  %v3654_v25 = vunpack.i.l.bf16 %v3653_v51  ;;  %v1577_v46 = vsel %vm1570_vm7, %v1568_v49, %v3644_v33  ;;  %v1578_v58 = vsel %vm1570_vm7, %v1569_v48, %v3645_v52  ;;  %v3678_v49 = vld [vmem:[%s5335_s5 + $0xa0] ss:$16 sps:$4 sm:$0xff]   ;;  %2260 = vmatprep.subr.bf16.mxu1 %v3676_v45 }
 0x2c4   : > { %v3650_v22 = vunpack.i.h.bf16 %v3648_v20  ;;  %v3649_v55 = vunpack.i.l.bf16 %v3648_v20  ;;  %2261 = vmatpush1.bf16.msra.mxu1 %v3678_v49 }
 0x2c6   : > { %v1586_v14 = vsel %vm1579_vm8, %v1577_v46, %v3649_v55  ;;  %v1587_v47 = vsel %vm1579_vm8, %v1578_v58, %v3650_v22 }
 0x2c7   : > { %v3658_v0 = vpop.permute.xlu1 %3657  ;;  %v1595_v7 = vsel %vm1588_vm9, %v1586_v14, %v3654_v25  ;;  %v1596_v8 = vsel %vm1588_vm9, %v1587_v47, %v3655_v59 }
 0x2c8   : > { %v3660_v62 = vunpack.i.h.bf16 %v3658_v0  ;;  %v3659_v5 = vunpack.i.l.bf16 %v3658_v0 }
 0x2ca   : > { %v1603_v9 = vsel %vm442_vm2, %v1595_v7, %v3659_v5  ;;  %v1604_v40 = vsel %vm442_vm2, %v1596_v8, %v3660_v62 }
 0x2cb   : > { %v1611_v42 = vpack.c.bf16 %v1604_v40, %v1603_v9 }
 0x2cd   : > { %1761 = vmatmul.mubr.bf16.gmra.mxu0 %v1611_v42 }
 0x2ce   : > { %2573 = vmatprep.mubr.bf16.mxu0 %v3901_v61 }
 0x341   : > { %v1738_v28 = vpop.f32.mrf.mxu0 }
 0x342   : > { %v1739_v4 = vadd.f32 %v4734_v31, %v1738_v28 }
 0x343   : > { %v1740_v53 = vpop.f32.mrf.mxu0 }
 0x344   : > { %v1769_v39 = vmax.f32 %v1739_v4, 0.0  ;;  %v3679_v53 = vld [vmem:[%s5335_s5 + $0x84] ss:$16 sps:$4 sm:$0xff]   ;;  %v3681_v4 = vld [vmem:[%s5335_s5 + $0x80] ss:$16 sps:$4 sm:$0xff]  }
 0x345   : > { %v1741_v10 = vpop.f32.mrf.mxu0  ;;  %2262 = vmatprep.subr.bf16.mxu1 %v3679_v53 }
 0x346   : > { %v1742_v27 = vadd.f32 %v4734_v31, %v1741_v10  ;;  %v3682_v10 = vld [vmem:[%s5335_s5 + $0x64] ss:$16 sps:$4 sm:$0xff]   ;;  %2263 = vmatpush1.bf16.msra.mxu1 %v3681_v4 }
 0x347   : > { %v1743_v13 = vpop.f32.mrf.mxu0  ;;  %2264 = vmatprep.subr.bf16.mxu1 %v3682_v10  ;;  %v4833_v4 = vld [vmem:[%s5336_s6 + $0xe4] ss:$16 sps:$4 sm:$0xff]   ;;  %v4838_v10 = vld [vmem:[%s5336_s6 + $0xe0] ss:$16 sps:$4 sm:$0xff]  }
 0x348   : > { %v1770_v19 = vmax.f32 %v1742_v27, 0.0  ;;  %2541 = vmatprep.subr.bf16.mxu0 %v4833_v4 }
 0x349   : > { %2542 = vmatpush1.bf16.msra.mxu0 %v4838_v10 }
 0x34a   : > { %v4738_v15 = vmax.f32 %v1769_v39, %v1770_v19  ;;  %v3684_v19 = vld [vmem:[%s5335_s5 + $0x60] ss:$16 sps:$4 sm:$0xff]  }
 0x34b   : > { %2265 = vmatpush1.bf16.msra.mxu1 %v3684_v19  ;;  %v4862_v19 = vld [vmem:[%s5336_s6 + $0xa0] ss:$16 sps:$4 sm:$0xff]  }
 0x365   : > { %v1746_v16 = vpop.f32.mrf.mxu0 }
 0x366   : > { %v1747_v23 = vadd.f32 %v4734_v31, %v1746_v16 }
 0x367   : > { %v1748_v21 = vpop.f32.mrf.mxu0 }
 0x368   : > { %v1771_v37 = vmax.f32 %v1747_v23, 0.0  ;;  %v3685_v23 = vld [vmem:[%s5335_s5 + $0x44] ss:$16 sps:$4 sm:$0xff]  }
 0x369   : > { %v1749_v26 = vpop.f32.mrf.mxu0  ;;  %2266 = vmatprep.subr.bf16.mxu1 %v3685_v23  ;;  %v4893_v23 = vld [vmem:[%s5336_s6 + $0x44] ss:$16 sps:$4 sm:$0xff]  }
 0x36a   : > { %v1750_v6 = vadd.f32 %v4734_v31, %v1749_v26 }
 0x36b   : > { %v1751_v30 = vpop.f32.mrf.mxu0 }
 0x36c   : > { %v1772_v34 = vmax.f32 %v1750_v6, 0.0  ;;  %v3687_v30 = vld [vmem:[%s5335_s5 + $0x40] ss:$16 sps:$4 sm:$0xff]  }
 0x36d   : > { %2267 = vmatpush1.bf16.msra.mxu1 %v3687_v30  ;;  %v4917_v30 = vld [vmem:[%s5336_s6 + $0x4] ss:$16 sps:$4 sm:$0xff]  }
 0x36e   : > { %v1778_v11 = vmax.f32 %v1771_v37, %v1772_v34 }
 0x370   : > { %v1802_v12 = vcombine.high %v1778_v11, %v1778_v11  ;;  %v1809_v56 = vrot.slane %v1778_v11, %v4743_v36 }
 0x372   : > { %v1816_v43 = vrot.slane %v1802_v12, %v4743_v36  ;;  %v1817_v54 = vcombine.high %v1809_v56, %v1809_v56  ;;  %v3338_v18 = vrot.slane %v1809_v56, 9 }
 0x374   : > { %v1818_v17 = vcombine.high %v1816_v43, %v1816_v43  ;;  %v3339_v1 = vrot.slane %v1817_v54, 9  ;;  %v3340_v44 = vrot.slane %v1816_v43, 9  ;;  %v1921_v2 = vmax.f32 %v1809_v56, %v3338_v18  ;;  %v3688_v56 = vld [vmem:[%s5335_s5 + $0x24] ss:$16 sps:$4 sm:$0xff]   ;;  %v3690_v18 = vld [vmem:[%s5335_s5 + $0x20] ss:$16 sps:$4 sm:$0xff]  }
 0x375   : > { %2268 = vmatprep.subr.bf16.mxu1 %v3688_v56 }
 0x376   : > { %v1922_v52 = vmax.f32 %v1817_v54, %v3339_v1  ;;  %v1923_v33 = vmax.f32 %v1816_v43, %v3340_v44  ;;  %v3341_v48 = vrot.slane %v1818_v17, 9  ;;  %v1967_v51 = vrot.slane %v1921_v2, %v4396_v57  ;;  %v3691_v1 = vld [vmem:[%s5335_s5 + $0x4] ss:$16 sps:$4 sm:$0xff]   ;;  %2269 = vmatpush1.bf16.msra.mxu1 %v3690_v18 }
 0x377   : > { %2270 = vmatprep.subr.bf16.mxu1 %v3691_v1 }
 0x378   : > { %v1924_v20 = vmax.f32 %v1818_v17, %v3341_v48  ;;  %v1971_v22 = vrot.slane %v1922_v52, %v4396_v57  ;;  %v1975_v55 = vrot.slane %v1923_v33, %v4396_v57  ;;  %v1754_v59 = vpop.f32.mrf.mxu0  ;;  %v3693_v52 = vld [vmem:[%s5335_s5] ss:$16 sps:$4 sm:$0xff]  }
 0x379   : > { %v1755_v47 = vadd.f32 %v4734_v31, %v1754_v59 }
 0x37a   : > { %v1979_v25 = vrot.slane %v1924_v20, %v4396_v57  ;;  %v1980_v46 = vsel %vm1953_vm10, %v1971_v22, %v1967_v51  ;;  %v1756_v58 = vpop.f32.mrf.mxu0  ;;  %2271 = vmatpush1.bf16.msra.mxu1 %v3693_v52  ;;  %v3696_v22 = vld [vmem:[%s5335_s5 + $0xec] ss:$16 sps:$4 sm:$0xff]  }
 0x37b   : > { %v1981_v14 = vsel %vm1955_vm11, %v1975_v55, %v1980_v46  ;;  %v1773_v8 = vmax.f32 %v1755_v47, 0.0  ;;  %2297 = vmatprep.subr.bf16.mxu1 %v3696_v22 }
 0x37c   : > { %v1982_v0 = vsel %vm1957_vm12, %v1979_v25, %v1981_v14  ;;  %v1757_v62 = vpop.f32.mrf.mxu0 }
 0x37d   : > { %1983 = vrot.lane.b32.xlu0 %v1982_v0, %s3899_s11  ;;  %v1758_v5 = vadd.f32 %v4734_v31, %v1757_v62 }
 0x37e   : > { %v1759_v7 = vpop.f32.mrf.mxu0 }
 0x37f   : > { %v1774_v9 = vmax.f32 %v1758_v5, 0.0 }
 0x381   : > { %v1779_v40 = vmax.f32 %v1773_v8, %v1774_v9 }
 0x383   : > { %v1819_v42 = vcombine.high %v1779_v40, %v1779_v40  ;;  %v1826_v28 = vrot.slane %v1779_v40, %v4743_v36 }
 0x385   : > { %v1833_v27 = vrot.slane %v1819_v42, %v4743_v36  ;;  %v1834_v13 = vcombine.high %v1826_v28, %v1826_v28  ;;  %v3342_v39 = vrot.slane %v1826_v28, 9 }
 0x387   : > { %v1835_v16 = vcombine.high %v1833_v27, %v1833_v27  ;;  %v3343_v3 = vrot.slane %v1834_v13, 9  ;;  %v3344_v24 = vrot.slane %v1833_v27, 9  ;;  %v1925_v21 = vmax.f32 %v1826_v28, %v3342_v39  ;;  %v4857_v39 = vld [vmem:[%s5336_s6 + $0xa4] ss:$16 sps:$4 sm:$0xff]  }
 0x389   : > { %v1926_v26 = vmax.f32 %v1834_v13, %v3343_v3  ;;  %v1927_v29 = vmax.f32 %v1833_v27, %v3344_v24  ;;  %v3345_v6 = vrot.slane %v1835_v16, 9  ;;  %v1993_v37 = vrot.slane %v1925_v21, %v4396_v57  ;;  %v4845_v27 = vld [vmem:[%s5336_s6 + $0xc4] ss:$16 sps:$4 sm:$0xff]   ;;  %v4850_v13 = vld [vmem:[%s5336_s6 + $0xc0] ss:$16 sps:$4 sm:$0xff]  }
 0x38a   : > { %2543 = vmatprep.subr.bf16.mxu0 %v4845_v27  ;;  %v4874_v3 = vld [vmem:[%s5336_s6 + $0x80] ss:$16 sps:$4 sm:$0xff]   ;;  %v4881_v24 = vld [vmem:[%s5336_s6 + $0x64] ss:$16 sps:$4 sm:$0xff]  }
 0x38b   : > { %v1928_v34 = vmax.f32 %v1835_v16, %v3345_v6  ;;  %v1997_v11 = vrot.slane %v1926_v26, %v4396_v57  ;;  %v2001_v12 = vrot.slane %v1927_v29, %v4396_v57  ;;  %2544 = vmatpush1.bf16.msra.mxu0 %v4850_v13  ;;  %v4869_v16 = vld [vmem:[%s5336_s6 + $0x84] ss:$16 sps:$4 sm:$0xff]   ;;  %v4886_v21 = vld [vmem:[%s5336_s6 + $0x60] ss:$16 sps:$4 sm:$0xff]  }
 0x38c   : > { %2545 = vmatprep.subr.bf16.mxu0 %v4857_v39  ;;  %v4898_v26 = vld [vmem:[%s5336_s6 + $0x40] ss:$16 sps:$4 sm:$0xff]   ;;  %v4905_v29 = vld [vmem:[%s5336_s6 + $0x24] ss:$16 sps:$4 sm:$0xff]  }
 0x38d   : > { %v1762_v38 = vpop.f32.mrf.mxu0  ;;  %v2005_v41 = vrot.slane %v1928_v34, %v4396_v57  ;;  %v2006_v63 = vsel %vm1953_vm10, %v1997_v11, %v1993_v37  ;;  %v4910_v6 = vld [vmem:[%s5336_s6 + $0x20] ss:$16 sps:$4 sm:$0xff]   ;;  %v1792_v34 = vrot.slane %v4738_v15, %v4743_v36  ;;  %v1785_v11 = vcombine.high %v4738_v15, %v4738_v15 }
 0x38e   : > { %v2007_v54 = vsel %vm1955_vm11, %v2001_v12, %v2006_v63  ;;  %v1763_v60 = vadd.f32 %v4734_v31, %v1762_v38  ;;  %v4922_v37 = vld [vmem:[%s5336_s6] ss:$16 sps:$4 sm:$0xff]  }
 0x38f   : > { %v1764_v43 = vpop.f32.mrf.mxu0  ;;  %v2008_v17 = vsel %vm1957_vm12, %v2005_v41, %v2007_v54  ;;  %2546 = vmatpush1.bf16.msra.mxu0 %v4862_v19  ;;  %v1800_v12 = vcombine.high %v1792_v34, %v1792_v34  ;;  %v1799_v56 = vrot.slane %v1785_v11, %v4743_v36  ;;  %v3334_v63 = vrot.slane %v1792_v34, 9  ;;  %v5020_v11 = vld [vmem:[%s5336_s6 + $0xcc] ss:$16 sps:$4 sm:$0xff]  }
 0x390   : > { %2009 = vrot.lane.b32.xlu1 %v2008_v17, %s3897_s28  ;;  %v1775_v33 = vmax.f32 %v1763_v60, 0.0  ;;  %2547 = vmatprep.subr.bf16.mxu0 %v4869_v16  ;;  %s406_s28 = scalar_lea.vmem [#allocation5], %s4065_s21 }
 0x391   : > { %v1765_v44 = vpop.f32.mrf.mxu0  ;;  %v3335_v38 = vrot.slane %v1800_v12, 9  ;;  %v1801_v41 = vcombine.high %v1799_v56, %v1799_v56  ;;  %v3336_v43 = vrot.slane %v1799_v56, 9  ;;  %v1917_v18 = vmax.f32 %v1792_v34, %v3334_v63  ;;  %v5014_v34 = vld [vmem:[%s5336_s6 + $0xe8] ss:$16 sps:$4 sm:$0xff]   ;;  %s3223_s30 = sshll.u32 %s406_s28, 4  ;;  %s3224_s30 = int_to_ptr.vmem [resolvable:$true] %s3223_s30 }
 0x392   : > { %v1766_v2 = vadd.f32 %v4734_v31, %v1765_v44  ;;  %v5051_v63 = vld [vmem:[%s5336_s6 + $0x88] ss:$16 sps:$4 sm:$0xff]   ;;  %p3837_p2 = scmp.lt.s32.totalorder %s3224_s30, %s3835_s25 }
 0x393   : > { %v1767_v45 = vpop.f32.mrf.mxu0  ;;  %2548 = vmatpush1.bf16.msra.mxu0 %v4874_v3  ;;  %v1918_v54 = vmax.f32 %v1800_v12, %v3335_v38  ;;  %v3337_v60 = vrot.slane %v1801_v41, 9  ;;  %v1919_v17 = vmax.f32 %v1799_v56, %v3336_v43  ;;  %v1940_v44 = vrot.slane %v1917_v18, %v4396_v57  ;;  %v5026_v12 = vld [vmem:[%s5336_s6 + $0xc8] ss:$16 sps:$4 sm:$0xff]   ;;  %v5033_v56 = vld [vmem:[%s5336_s6 + $0xac] ss:$16 sps:$4 sm:$0xff]  }
 0x394   : > { %v1776_v48 = vmax.f32 %v1766_v2, 0.0  ;;  %2549 = vmatprep.subr.bf16.mxu0 %v4881_v24  ;;  %v5039_v38 = vld [vmem:[%s5336_s6 + $0xa8] ss:$16 sps:$4 sm:$0xff]   ;;  %v5057_v43 = vld [vmem:[%s5336_s6 + $0x6c] ss:$16 sps:$4 sm:$0xff]  }
 0x395   : > { %v1944_v1 = vrot.slane %v1918_v54, %v4396_v57  ;;  %v1920_v2 = vmax.f32 %v1801_v41, %v3337_v60  ;;  %v1948_v45 = vrot.slane %v1919_v17, %v4396_v57  ;;  %v5045_v41 = vld [vmem:[%s5336_s6 + $0x8c] ss:$16 sps:$4 sm:$0xff]   ;;  %v5063_v54 = vld [vmem:[%s5336_s6 + $0x68] ss:$16 sps:$4 sm:$0xff]  }
 0x396   : > { %v1780_v49 = vmax.f32 %v1775_v33, %v1776_v48  ;;  %v5069_v18 = vld [vmem:[%s5336_s6 + $0x4c] ss:$16 sps:$4 sm:$0xff]   ;;  %v5075_v60 = vld [vmem:[%s5336_s6 + $0x48] ss:$16 sps:$4 sm:$0xff]  }
 0x397   : > { %2550 = vmatpush1.bf16.msra.mxu0 %v4886_v21  ;;  %v1954_v15 = vsel %vm1953_vm10, %v1944_v1, %v1940_v44  ;;  %v1952_v52 = vrot.slane %v1920_v2, %v4396_v57  ;;  %v5081_v17 = vld [vmem:[%s5336_s6 + $0x2c] ss:$16 sps:$4 sm:$0xff]   ;;  %v5087_v1 = vld [vmem:[%s5336_s6 + $0x28] ss:$16 sps:$4 sm:$0xff]  }
 0x398   : > { %v1836_v51 = vcombine.high %v1780_v49, %v1780_v49  ;;  %v1843_v20 = vrot.slane %v1780_v49, %v4743_v36  ;;  %2551 = vmatprep.subr.bf16.mxu0 %v4893_v23  ;;  %v5093_v44 = vld [vmem:[%s5336_s6 + $0xc] ss:$16 sps:$4 sm:$0xff]   ;;  %v5099_v2 = vld [vmem:[%s5336_s6 + $0x8] ss:$16 sps:$4 sm:$0xff]  }
 0x39a   : > { %v1850_v31 = vrot.slane %v1836_v51, %v4743_v36  ;;  %v1851_v55 = vcombine.high %v1843_v20, %v1843_v20  ;;  %v3346_v59 = vrot.slane %v1843_v20, 9  ;;  %v1956_v36 = vsel %vm1955_vm11, %v1948_v45, %v1954_v15 }
 0x39b   : > { %2552 = vmatpush1.bf16.msra.mxu0 %v4898_v26  ;;  %v1958_v49 = vsel %vm1957_vm12, %v1952_v52, %v1956_v36 }
 0x39c   : > { %v1852_v25 = vcombine.high %v1850_v31, %v1850_v31  ;;  %v3347_v46 = vrot.slane %v1851_v55, 9  ;;  %v3348_v58 = vrot.slane %v1850_v31, 9  ;;  %v1929_v14 = vmax.f32 %v1843_v20, %v3346_v59  ;;  %2553 = vmatprep.subr.bf16.mxu0 %v4905_v29 }
 0x39e   : > { %v1930_v47 = vmax.f32 %v1851_v55, %v3347_v46  ;;  %v1931_v0 = vmax.f32 %v1850_v31, %v3348_v58  ;;  %v3349_v62 = vrot.slane %v1852_v25, 9  ;;  %v2019_v5 = vrot.slane %v1929_v14, %v4396_v57  ;;  %v3694_v55 = vld [vmem:[%s5335_s5 + $0xe8] ss:$16 sps:$4 sm:$0xff]   ;;  %v3702_v58 = vld [vmem:[%s5335_s5 + $0xac] ss:$16 sps:$4 sm:$0xff]  }
 0x39f   : > { %2554 = vmatpush1.bf16.msra.mxu0 %v4910_v6  ;;  %v3697_v46 = vld [vmem:[%s5335_s5 + $0xc8] ss:$16 sps:$4 sm:$0xff]  }
 0x3a0   : > { %v1932_v7 = vmax.f32 %v1852_v25, %v3349_v62  ;;  %v2023_v8 = vrot.slane %v1930_v47, %v4396_v57  ;;  %v2027_v9 = vrot.slane %v1931_v0, %v4396_v57  ;;  %2555 = vmatprep.subr.bf16.mxu0 %v4917_v30  ;;  %v3699_v25 = vld [vmem:[%s5335_s5 + $0xcc] ss:$16 sps:$4 sm:$0xff]   ;;  %v3700_v14 = vld [vmem:[%s5335_s5 + $0xa8] ss:$16 sps:$4 sm:$0xff]  }
 0x3a1   : > { %v3705_v47 = vld [vmem:[%s5335_s5 + $0x8c] ss:$16 sps:$4 sm:$0xff]   ;;  %v3703_v0 = vld [vmem:[%s5335_s5 + $0x88] ss:$16 sps:$4 sm:$0xff]  }
 0x3a2   : > { %v2031_v40 = vrot.slane %v1932_v7, %v4396_v57  ;;  %v2032_v42 = vsel %vm1953_vm10, %v2023_v8, %v2019_v5  ;;  %v3708_v62 = vld [vmem:[%s5335_s5 + $0x6c] ss:$16 sps:$4 sm:$0xff]   ;;  %v3706_v5 = vld [vmem:[%s5335_s5 + $0x68] ss:$16 sps:$4 sm:$0xff]  }
 0x3a3   : > { %v2033_v28 = vsel %vm1955_vm11, %v2027_v9, %v2032_v42  ;;  %2556 = vmatpush1.bf16.msra.mxu0 %v4922_v37  ;;  %v3711_v7 = vld [vmem:[%s5335_s5 + $0x4c] ss:$16 sps:$4 sm:$0xff]   ;;  %v3709_v8 = vld [vmem:[%s5335_s5 + $0x48] ss:$16 sps:$4 sm:$0xff]  }
 0x3a4   : > { %v2034_v53 = vsel %vm1957_vm12, %v2031_v40, %v2033_v28  ;;  %2687 = vmatprep.subr.bf16.mxu0 %v4833_v4  ;;  %v3714_v9 = vld [vmem:[%s5335_s5 + $0x2c] ss:$16 sps:$4 sm:$0xff]   ;;  %v3712_v40 = vld [vmem:[%s5335_s5 + $0x28] ss:$16 sps:$4 sm:$0xff]  }
 0x3a5   : > { %2035 = vrot.lane.b32.xlu0 %v2034_v53, %s3896_s27  ;;  %v3720_v42 = vld [vmem:[%s5335_s5 + $0xc] ss:$16 sps:$4 sm:$0xff]   ;;  %v3718_v28 = vld [vmem:[%s5335_s5 + $0x8] ss:$16 sps:$4 sm:$0xff]   ;;  %s3830_s27 = scalar_lea.vmem %s3224_s30, 16 }
 0x3a6   : > { %2574 = vmatmul.mubr.bf16.vlgmr.msra.gmra.mxu0 %v3901_v61  ;;  %v5009_v53 = vld [vmem:[%s5336_s6 + $0xec] ss:$16 sps:$4 sm:$0xff]   ;;  %p3831_p13 = scmp.ne.s32.totalorder %s3224_s30, %s3830_s27  ;;  %p3838_p3 = scmp.lt.s32.totalorder %s3836_s20, %s3830_s27 }
 0x3a7   : > { %2688 = vmatpush1.bf16.msra.mxu0 %v4838_v10  ;;  %2719 = vmatprep.mubr.bf16.mxu0 %v3901_v61 }
 0x3a8   : > { %2689 = vmatprep.subr.bf16.mxu0 %v4845_v27  ;;  %p3832_p0 = pnand %p3831_p13, %p3998_p6  ;;  %p3839_p4 = por %p3838_p3, %p3837_p2 }
 0x3aa   : > { %p3833_p1 = pneg %p3832_p0 }
 0x3ab   : > { %2690 = vmatpush1.bf16.msra.mxu0 %v4850_v13 }
 0x3ac   : > { %2691 = vmatprep.subr.bf16.mxu0 %v4857_v39  ;;  %p3840_p5 = pnand %p3839_p4, %p3833_p1 }
 0x3af   : > { %2692 = vmatpush1.bf16.msra.mxu0 %v4862_v19 }
 0x3b0   : > { %2693 = vmatprep.subr.bf16.mxu0 %v4869_v16 }
 0x3b3   : > { %2694 = vmatpush1.bf16.msra.mxu0 %v4874_v3 }
 0x3b4   : > { %2695 = vmatprep.subr.bf16.mxu0 %v4881_v24 }
 0x3b7   : > { %2696 = vmatpush1.bf16.msra.mxu0 %v4886_v21 }
 0x3b8   : > { %2697 = vmatprep.subr.bf16.mxu0 %v4893_v23 }
 0x3bb   : > { %2698 = vmatpush1.bf16.msra.mxu0 %v4898_v26 }
 0x3bc   : > { %2699 = vmatprep.subr.bf16.mxu0 %v4905_v29 }
 0x3bf   : > { %2700 = vmatpush1.bf16.msra.mxu0 %v4910_v6 }
 0x3c0   : > { %2701 = vmatprep.subr.bf16.mxu0 %v4917_v30 }
 0x3c3   : > { %2702 = vmatpush1.bf16.msra.mxu0 %v4922_v37 }
 0x3c4   : > { %2833 = vmatprep.subr.bf16.mxu0 %v4833_v4 }
 0x3ef   : > { %v1984_v33 = vpop.permute.xlu0 %1983 }
 0x3f0   : > { %v2038_v51 = vsel %vm1552_vm5, %v1958_v49, %v1984_v33  ;;  %v2074_v49 = vld [vmem:[%s5337_s7] sm:$0xf] }
 0x402   : > { %v2010_v48 = vpop.permute.xlu1 %2009 }
 0x403   : > { %v2039_v20 = vsel %vm1570_vm7, %v2038_v51, %v2010_v48  ;;  %v2082_v48 = vsub.s32 1, %v4386_v32  ;;  %v2079_v51 = vrot.slane %v2074_v49, %v4396_v57 }
 0x417   : > { %v2036_v22 = vpop.permute.xlu0 %2035 }
 0x418   : > { %v2040_v31 = vsel %vm1588_vm9, %v2039_v20, %v2036_v22  ;;  %v2083_v20 = vrot.slane %v2074_v49, %v2082_v48 }
 0x419   : > { %v2041_v59 = vpack.c.bf16 %v2040_v31, %v2040_v31 }
 0x41b   : > { %2289 = vmatmul.mubr.bf16.vlgmr.msra.gmra.mxu1 %v2041_v59 }
 0x41c   : > { %2298 = vmatpush1.bf16.msra.mxu1 %v3694_v55  ;;  %2329 = vmatprep.mubr.bf16.mxu1 %v3901_v61 }
 0x41d   : > { %2299 = vmatprep.subr.bf16.mxu1 %v3699_v25 }
 0x420   : > { %2300 = vmatpush1.bf16.msra.mxu1 %v3697_v46 }
 0x421   : > { %2301 = vmatprep.subr.bf16.mxu1 %v3702_v58 }
 0x424   : > { %2302 = vmatpush1.bf16.msra.mxu1 %v3700_v14  ;;  %v2086_v14 = vsub.s32 2, %v4386_v32 }
 0x425   : > { %2303 = vmatprep.subr.bf16.mxu1 %v3705_v47  ;;  %v2090_v47 = vsub.s32 3, %v4386_v32 }
 0x428   : > { %2304 = vmatpush1.bf16.msra.mxu1 %v3703_v0  ;;  %v2087_v0 = vrot.slane %v2074_v49, %v2086_v14 }
 0x429   : > { %2305 = vmatprep.subr.bf16.mxu1 %v3708_v62  ;;  %v2091_v62 = vrot.slane %v2074_v49, %v2090_v47 }
 0x42c   : > { %2306 = vmatpush1.bf16.msra.mxu1 %v3706_v5 }
 0x42d   : > { %2307 = vmatprep.subr.bf16.mxu1 %v3711_v7 }
 0x430   : > { %2308 = vmatpush1.bf16.msra.mxu1 %v3709_v8 }
 0x431   : > { %2309 = vmatprep.subr.bf16.mxu1 %v3714_v9 }
 0x434   : > { %2310 = vmatpush1.bf16.msra.mxu1 %v3712_v40 }
 0x435   : > { %2311 = vmatprep.subr.bf16.mxu1 %v3720_v42 }
 0x438   : > { %2312 = vmatpush1.bf16.msra.mxu1 %v3718_v28 }
 0x439   : > { %2582 = vmatprep.subr.bf16.mxu1 %v5009_v53 }
 0x43b   : > { %2330 = vmatmul.mubr.bf16.vlgmr.msra.gmra.mxu1 %v2041_v59 }
 0x43c   : > { %2583 = vmatpush1.bf16.msra.mxu1 %v5014_v34  ;;  %2614 = vmatprep.mubr.bf16.mxu1 %v3901_v61 }
 0x43d   : > { %2584 = vmatprep.subr.bf16.mxu1 %v5020_v11 }
 0x440   : > { %2585 = vmatpush1.bf16.msra.mxu1 %v5026_v12 }
 0x441   : > { %2586 = vmatprep.subr.bf16.mxu1 %v5033_v56 }
 0x444   : > { %2587 = vmatpush1.bf16.msra.mxu1 %v5039_v38 }
 0x445   : > { %2588 = vmatprep.subr.bf16.mxu1 %v5045_v41 }
 0x448   : > { %2589 = vmatpush1.bf16.msra.mxu1 %v5051_v63 }
 0x449   : > { %2590 = vmatprep.subr.bf16.mxu1 %v5057_v43 }
 0x44c   : > { %2591 = vmatpush1.bf16.msra.mxu1 %v5063_v54 }
 0x44d   : > { %2592 = vmatprep.subr.bf16.mxu1 %v5069_v18 }
 0x450   : > { %2593 = vmatpush1.bf16.msra.mxu1 %v5075_v60 }
 0x451   : > { %2594 = vmatprep.subr.bf16.mxu1 %v5081_v17 }
 0x454   : > { %2595 = vmatpush1.bf16.msra.mxu1 %v5087_v1 }
 0x455   : > { %2596 = vmatprep.subr.bf16.mxu1 %v5093_v44 }
 0x458   : > { %2597 = vmatpush1.bf16.msra.mxu1 %v5099_v2 }
 0x459   : > { %2728 = vmatprep.subr.bf16.mxu1 %v5009_v53 }
 0x45b   : > { %2615 = vmatmul.mubr.bf16.vlgmr.msra.gmra.mxu1 %v3901_v61 }
 0x45c   : > { %2729 = vmatpush1.bf16.msra.mxu1 %v5014_v34  ;;  %2760 = vmatprep.mubr.bf16.mxu1 %v3901_v61 }
 0x45d   : > { %2730 = vmatprep.subr.bf16.mxu1 %v5020_v11 }
 0x460   : > { %2731 = vmatpush1.bf16.msra.mxu1 %v5026_v12 }
 0x461   : > { %2732 = vmatprep.subr.bf16.mxu1 %v5033_v56 }
 0x464   : > { %2733 = vmatpush1.bf16.msra.mxu1 %v5039_v38 }
 0x465   : > { %2734 = vmatprep.subr.bf16.mxu1 %v5045_v41 }
 0x466   : > { %v2575_v45 = vpop.f32.mrf.mxu0 }
 0x468   : > { %2735 = vmatpush1.bf16.msra.mxu1 %v5051_v63  ;;  %v2577_v15 = vpop.f32.mrf.mxu0 }
 0x469   : > { %2736 = vmatprep.subr.bf16.mxu1 %v5057_v43  ;;  %v2627_v52 = vcombine.low %v2575_v45, %v2577_v15 }
 0x46a   : > { %v2579_v36 = vpop.f32.mrf.mxu0 }
 0x46c   : > { %2737 = vmatpush1.bf16.msra.mxu1 %v5063_v54  ;;  %v2580_v33 = vpop.f32.mrf.mxu0 }
 0x46d   : > { %2738 = vmatprep.subr.bf16.mxu1 %v5069_v18  ;;  %v2635_v33 = vrot.slane %v2627_v52, %v4392_v50 }
 0x470   : > { %2739 = vmatpush1.bf16.msra.mxu1 %v5075_v60 }
 0x471   : > { %2740 = vmatprep.subr.bf16.mxu1 %v5081_v17 }
 0x474   : > { %2741 = vmatpush1.bf16.msra.mxu1 %v5087_v1 }
 0x475   : > { %2742 = vmatprep.subr.bf16.mxu1 %v5093_v44 }
 0x478   : > { %2743 = vmatpush1.bf16.msra.mxu1 %v5099_v2 }
 0x479   : > { %2874 = vmatprep.subr.bf16.mxu1 %v5009_v53 }
 0x4db   : > { %v2290_v22 = vpop.f32.mrf.mxu1 }
 0x4dc   : > { %v2291_v55 = vadd.f32 %v2290_v22, %v2079_v51 }
 0x4dd   : > { %v2292_v31 = vpop.f32.mrf.mxu1 }
 0x4de   : > { %v2293_v59 = vadd.f32 %v2292_v31, %v2083_v20 }
 0x4df   : > { %v2294_v25 = vpop.f32.mrf.mxu1 }
 0x4e0   : > { %v2342_v46 = vcombine.low %v2291_v55, %v2293_v59 }
 0x4e1   : > { %v2295_v58 = vpop.f32.mrf.mxu1 }
 0x4e2   : > { %2346 = vst [vmem:[#allocation3] sm:$0xff] %v2342_v46 }
 0x4fb   : > { %v2331_v5 = vpop.f32.mrf.mxu1 }
 0x4fc   : > { %v2332_v8 = vadd.f32 %v2331_v5, %v2087_v0 }
 0x4fd   : > { %v2333_v7 = vpop.f32.mrf.mxu1 }
 0x4fe   : > { %v2334_v9 = vadd.f32 %v2333_v7, %v2091_v62 }
 0x4ff   : > { %v2335_v57 = vpop.f32.mrf.mxu1 }
 0x500   : > { %v2343_v40 = vcombine.low %v2332_v8, %v2334_v9 }
 0x501   : > { %v2336_v42 = vpop.f32.mrf.mxu1 }
 0x502   : > { %2347 = vst [vmem:[#allocation3 + $0x8] sm:$0xff] %v2343_v40 }
 0x509   : > { %v2380_v20 = vld [vmem:[#allocation3] ss:$4 sm:$0xf] }
 0x51b   : > { %v2616_v28 = vpop.f32.mrf.mxu1 }
 0x51d   : > { %v2618_v45 = vpop.f32.mrf.mxu1 }
 0x51e   : > { %v2628_v15 = vcombine.low %v2616_v28, %v2618_v45 }
 0x51f   : > { %v2620_v36 = vpop.f32.mrf.mxu1 }
 0x520   : > { %v2642_v48 = vrot.slane %v2628_v15, %v4392_v50 }
 0x521   : > { %v2621_v51 = vpop.f32.mrf.mxu1 }
 0x522   : > { %v2643_v32 = vcombine.low %v2635_v33, %v2642_v48 }
 0x524   : > { %v2650_v49 = vrot.slane %v2643_v32, %v4392_v50 }
 0x526   : > { %v2652_v22 = vadd.f32 %v2650_v49, %v2380_v20 }
 0x528   : > { %v2653_v31 = vsub.f32 0.0, %v2652_v22  ;;  %v2660_v55 = vrot.slane %v2652_v22, 1  ;;  %v2671_v58 = vrot.slane %v2652_v22, 3  ;;  %v2668_v52 = vrot.slane %v2652_v22, 2 }
 0x52a   : > { %v2654_v59 = vmul.f32 1.442695, %v2653_v31  ;;  %v2662_v25 = vsub.f32 0.0, %v2660_v55  ;;  %v2673_v14 = vsub.f32 0.0, %v2671_v58 }
 0x52c   : > { %3766 = vpow2.f32 %v2654_v59  ;;  %v2663_v46 = vmul.f32 1.442695, %v2662_v25  ;;  %v2674_v47 = vmul.f32 1.442695, %v2673_v14 }
 0x52e   : > { %3768 = vpow2.f32 %v2663_v46 }
 0x52f   : > { %3770 = vpow2.f32 %v2674_v47 }
 0x539   : > { %v3767_v0 = vpop.eup %3766 }
 0x53a   : > { %v2656_v62 = vadd.f32 1.0, %v3767_v0 }
 0x53b   : > { %v3769_v5 = vpop.eup %3768 }
 0x53c   : > { %3772 = vrcp.f32 %v2656_v62  ;;  %v2665_v7 = vadd.f32 1.0, %v3769_v5  ;;  %v3771_v8 = vpop.eup %3770 }
 0x53d   : > { %3774 = vtanh.f32 %v2668_v52  ;;  %v2676_v42 = vadd.f32 1.0, %v3771_v8 }
 0x53e   : > { %3776 = vrcp.f32 %v2665_v7 }
 0x53f   : > { %3778 = vrcp.f32 %v2676_v42 }
 0x549   : > { %v3773_v9 = vpop.eup %3772 }
 0x54a   : > { %v3775_v57 = vpop.eup %3774 }
 0x54b   : > { %v3777_v40 = vpop.eup %3776  ;;  %v2680_v45 = vmul.f32 %v3775_v57, %v3773_v9 }
 0x54c   : > { %v2679_v28 = vmul.f32 0.0, %v3777_v40  ;;  %v3779_v36 = vpop.eup %3778 }
 0x54e   : > { %v5132_v15 = vadd.f32 %v2680_v45, %v2679_v28 }
 0x550   : > { %3780 = vtanh.f32 %v5132_v15 }
 0x55d   : > { %v3781_v33 = vpop.eup %3780 }
 0x55e   : > { %v2683_v48 = vmul.f32 %v3781_v33, %v3779_v36 }
 0x560   : > { %v2686_v51 = vpack.c.bf16 %v2683_v48, %v2683_v48 }
 0x562   : > { %2720 = vmatmul.mubr.bf16.vlgmr.msra.gmra.mxu0 %v2686_v51  ;;  %2761 = vmatmul.mubr.bf16.vlgmr.msra.gmra.mxu1 %v2686_v51 }
 0x563   : > { %2834 = vmatpush1.bf16.msra.mxu0 %v4838_v10  ;;  %2875 = vmatpush1.bf16.msra.mxu1 %v5014_v34 }
 0x564   : > { %2835 = vmatprep.subr.bf16.mxu0 %v4845_v27  ;;  %2876 = vmatprep.subr.bf16.mxu1 %v5020_v11 }
 0x565   : > { %2865 = vmatprep.mubr.bf16.mxu0 %v3901_v61  ;;  %2906 = vmatprep.mubr.bf16.mxu1 %v3901_v61 }
 0x567   : > { %2836 = vmatpush1.bf16.msra.mxu0 %v4850_v13  ;;  %2877 = vmatpush1.bf16.msra.mxu1 %v5026_v12 }
 0x568   : > { %2837 = vmatprep.subr.bf16.mxu0 %v4857_v39  ;;  %2878 = vmatprep.subr.bf16.mxu1 %v5033_v56 }
 0x56b   : > { %2838 = vmatpush1.bf16.msra.mxu0 %v4862_v19  ;;  %2879 = vmatpush1.bf16.msra.mxu1 %v5039_v38 }
 0x56c   : > { %2839 = vmatprep.subr.bf16.mxu0 %v4869_v16  ;;  %2880 = vmatprep.subr.bf16.mxu1 %v5045_v41 }
 0x56f   : > { %2840 = vmatpush1.bf16.msra.mxu0 %v4874_v3  ;;  %2881 = vmatpush1.bf16.msra.mxu1 %v5051_v63 }
 0x570   : > { %2841 = vmatprep.subr.bf16.mxu0 %v4881_v24  ;;  %2882 = vmatprep.subr.bf16.mxu1 %v5057_v43 }
 0x573   : > { %2842 = vmatpush1.bf16.msra.mxu0 %v4886_v21  ;;  %2883 = vmatpush1.bf16.msra.mxu1 %v5063_v54 }
 0x574   : > { %2843 = vmatprep.subr.bf16.mxu0 %v4893_v23  ;;  %2884 = vmatprep.subr.bf16.mxu1 %v5069_v18 }
 0x577   : > { %2844 = vmatpush1.bf16.msra.mxu0 %v4898_v26  ;;  %2885 = vmatpush1.bf16.msra.mxu1 %v5075_v60 }
 0x578   : > { %2845 = vmatprep.subr.bf16.mxu0 %v4905_v29  ;;  %2886 = vmatprep.subr.bf16.mxu1 %v5081_v17 }
 0x57b   : > { %2846 = vmatpush1.bf16.msra.mxu0 %v4910_v6  ;;  %2887 = vmatpush1.bf16.msra.mxu1 %v5087_v1 }
 0x57c   : > { %2847 = vmatprep.subr.bf16.mxu0 %v4917_v30  ;;  %2888 = vmatprep.subr.bf16.mxu1 %v5093_v44 }
 0x57f   : > { %2848 = vmatpush1.bf16.msra.mxu0 %v4922_v37  ;;  %2889 = vmatpush1.bf16.msra.mxu1 %v5099_v2 }
 0x580   : > { %2979 = vmatprep.subr.bf16.mxu0 %v4833_v4  ;;  %3020 = vmatprep.subr.bf16.mxu1 %v5009_v53  ;;  %v2685_v4 = vld [vmem:[#allocation3 + $0x1] ss:$4 sm:$0xf] }
 0x622   : > { %v2721_v32 = vpop.f32.mrf.mxu0  ;;  %v2762_v49 = vpop.f32.mrf.mxu1 }
 0x624   : > { %v2723_v20 = vpop.f32.mrf.mxu0  ;;  %v2764_v22 = vpop.f32.mrf.mxu1 }
 0x625   : > { %v2773_v31 = vcombine.low %v2721_v32, %v2723_v20  ;;  %v2774_v55 = vcombine.low %v2762_v49, %v2764_v22 }
 0x626   : > { %v2725_v59 = vpop.f32.mrf.mxu0  ;;  %v2766_v25 = vpop.f32.mrf.mxu1 }
 0x627   : > { %v2781_v46 = vrot.slane %v2773_v31, %v4392_v50  ;;  %v2788_v58 = vrot.slane %v2774_v55, %v4392_v50 }
 0x628   : > { %v2726_v14 = vpop.f32.mrf.mxu0  ;;  %v2767_v47 = vpop.f32.mrf.mxu1 }
 0x629   : > { %v2789_v0 = vcombine.low %v2781_v46, %v2788_v58 }
 0x62b   : > { %v2796_v52 = vrot.slane %v2789_v0, %v4392_v50 }
 0x62d   : > { %v2798_v62 = vadd.f32 %v2796_v52, %v2685_v4 }
 0x62f   : > { %v2799_v53 = vsub.f32 0.0, %v2798_v62  ;;  %v2806_v5 = vrot.slane %v2798_v62, 1  ;;  %v2817_v57 = vrot.slane %v2798_v62, 3  ;;  %v2814_v45 = vrot.slane %v2798_v62, 2 }
 0x631   : > { %v2800_v7 = vmul.f32 1.442695, %v2799_v53  ;;  %v2808_v8 = vsub.f32 0.0, %v2806_v5  ;;  %v2819_v40 = vsub.f32 0.0, %v2817_v57  ;;  %v3136_v57 = vld [vmem:[%s5338_s8 + $0x70] sm:$0xff] }
 0x633   : > { %3782 = vpow2.f32 %v2800_v7  ;;  %v2809_v9 = vmul.f32 1.442695, %v2808_v8  ;;  %v2820_v42 = vmul.f32 1.442695, %v2819_v40  ;;  %v3135_v40 = vld [vmem:[%s5338_s8 + $0x68] sm:$0xff] }
 0x635   : > { %3784 = vpow2.f32 %v2809_v9  ;;  %v3137_v9 = vld [vmem:[%s5338_s8 + $0x78] sm:$0xff] }
 0x636   : > { %3786 = vpow2.f32 %v2820_v42  ;;  %v3134_v42 = vld [vmem:[%s5338_s8 + $0x60] sm:$0xff] }
 0x640   : > { %v3783_v28 = vpop.eup %3782 }
 0x641   : > { %v2802_v36 = vadd.f32 1.0, %v3783_v28  ;;  %v3133_v28 = vld [vmem:[%s5338_s8 + $0x58] sm:$0xff] }
 0x642   : > { %v3785_v33 = vpop.eup %3784 }
 0x643   : > { %3788 = vrcp.f32 %v2802_v36  ;;  %v2811_v48 = vadd.f32 1.0, %v3785_v33  ;;  %v3787_v51 = vpop.eup %3786  ;;  %v3131_v36 = vld [vmem:[%s5338_s8 + $0x48] sm:$0xff]  ;;  %v3130_v33 = vld [vmem:[%s5338_s8 + $0x40] sm:$0xff] }
 0x644   : > { %3790 = vtanh.f32 %v2814_v45  ;;  %v2822_v22 = vadd.f32 1.0, %v3787_v51  ;;  %v3132_v45 = vld [vmem:[%s5338_s8 + $0x50] sm:$0xff] }
 0x645   : > { %3792 = vrcp.f32 %v2811_v48  ;;  %v3129_v48 = vld [vmem:[%s5338_s8 + $0x38] sm:$0xff]  ;;  %v3128_v51 = vld [vmem:[%s5338_s8 + $0x30] sm:$0xff] }
 0x646   : > { %3794 = vrcp.f32 %v2822_v22  ;;  %v3124_v22 = vld [vmem:[%s5338_s8 + $0x10] sm:$0xff] }
 0x650   : > { %v3789_v32 = vpop.eup %3788 }
 0x651   : > { %v3791_v49 = vpop.eup %3790 }
 0x652   : > { %v3793_v20 = vpop.eup %3792  ;;  %v2826_v55 = vmul.f32 %v3791_v49, %v3789_v32  ;;  %v3127_v32 = vld [vmem:[%s5338_s8 + $0x28] sm:$0xff]  ;;  %v3126_v49 = vld [vmem:[%s5338_s8 + $0x20] sm:$0xff] }
 0x653   : > { %v2825_v31 = vmul.f32 %v3793_v20, %v5132_v15  ;;  %v3795_v25 = vpop.eup %3794  ;;  %v3125_v20 = vld [vmem:[%s5338_s8 + $0x18] sm:$0xff] }
 0x655   : > { %v5173_v59 = vadd.f32 %v2826_v55, %v2825_v31  ;;  %v3123_v31 = vld [vmem:[%s5338_s8 + $0x8] sm:$0xff]  ;;  %v3122_v55 = vld [vmem:[%s5338_s8] sm:$0xff] }
 0x657   : > { %3796 = vtanh.f32 %v5173_v59 }
 0x664   : > { %v3797_v46 = vpop.eup %3796 }
 0x665   : > { %v2829_v58 = vmul.f32 %v3797_v46, %v3795_v25 }
 0x667   : > { %v2832_v14 = vpack.c.bf16 %v2829_v58, %v2829_v58 }
 0x669   : > { %2866 = vmatmul.mubr.bf16.vlgmr.msra.gmra.mxu0 %v2832_v14  ;;  %2907 = vmatmul.mubr.bf16.vlgmr.msra.gmra.mxu1 %v2832_v14 }
 0x66a   : > { %2980 = vmatpush1.bf16.msra.mxu0 %v4838_v10  ;;  %3021 = vmatpush1.bf16.msra.mxu1 %v5014_v34 }
 0x66b   : > { %2981 = vmatprep.subr.bf16.mxu0 %v4845_v27  ;;  %3022 = vmatprep.subr.bf16.mxu1 %v5020_v11 }
 0x66c   : > { %3011 = vmatprep.mubr.bf16.mxu0 %v3901_v61  ;;  %3052 = vmatprep.mubr.bf16.mxu1 %v3901_v61 }
 0x66e   : > { %2982 = vmatpush1.bf16.msra.mxu0 %v4850_v13  ;;  %3023 = vmatpush1.bf16.msra.mxu1 %v5026_v12 }
 0x66f   : > { %2983 = vmatprep.subr.bf16.mxu0 %v4857_v39  ;;  %3024 = vmatprep.subr.bf16.mxu1 %v5033_v56 }
 0x672   : > { %2984 = vmatpush1.bf16.msra.mxu0 %v4862_v19  ;;  %3025 = vmatpush1.bf16.msra.mxu1 %v5039_v38 }
 0x673   : > { %2985 = vmatprep.subr.bf16.mxu0 %v4869_v16  ;;  %3026 = vmatprep.subr.bf16.mxu1 %v5045_v41 }
 0x676   : > { %2986 = vmatpush1.bf16.msra.mxu0 %v4874_v3  ;;  %3027 = vmatpush1.bf16.msra.mxu1 %v5051_v63 }
 0x677   : > { %2987 = vmatprep.subr.bf16.mxu0 %v4881_v24  ;;  %3028 = vmatprep.subr.bf16.mxu1 %v5057_v43 }
 0x67a   : > { %2988 = vmatpush1.bf16.msra.mxu0 %v4886_v21  ;;  %3029 = vmatpush1.bf16.msra.mxu1 %v5063_v54 }
 0x67b   : > { %2989 = vmatprep.subr.bf16.mxu0 %v4893_v23  ;;  %3030 = vmatprep.subr.bf16.mxu1 %v5069_v18 }
 0x67e   : > { %2990 = vmatpush1.bf16.msra.mxu0 %v4898_v26  ;;  %3031 = vmatpush1.bf16.msra.mxu1 %v5075_v60 }
 0x67f   : > { %2991 = vmatprep.subr.bf16.mxu0 %v4905_v29  ;;  %3032 = vmatprep.subr.bf16.mxu1 %v5081_v17 }
 0x682   : > { %2992 = vmatpush1.bf16.msra.mxu0 %v4910_v6  ;;  %3033 = vmatpush1.bf16.msra.mxu1 %v5087_v1 }
 0x683   : > { %2993 = vmatprep.subr.bf16.mxu0 %v4917_v30  ;;  %3034 = vmatprep.subr.bf16.mxu1 %v5093_v44  ;;  %v2831_v30 = vld [vmem:[#allocation3 + $0x2] ss:$4 sm:$0xf] }
 0x686   : > { %2994 = vmatpush1.bf16.msra.mxu0 %v4922_v37  ;;  %3035 = vmatpush1.bf16.msra.mxu1 %v5099_v2 }
 0x687   : > { %3435 = vmatprep.subr.mxu0 %v3894_v35 }
 0x729   : > { %v2867_v61 = vpop.f32.mrf.mxu0  ;;  %v2908_v10 = vpop.f32.mrf.mxu1 }
 0x72b   : > { %v2869_v27 = vpop.f32.mrf.mxu0  ;;  %v2910_v13 = vpop.f32.mrf.mxu1 }
 0x72c   : > { %v2919_v39 = vcombine.low %v2867_v61, %v2869_v27  ;;  %v2920_v19 = vcombine.low %v2908_v10, %v2910_v13 }
 0x72d   : > { %v2871_v16 = vpop.f32.mrf.mxu0  ;;  %v2912_v3 = vpop.f32.mrf.mxu1 }
 0x72e   : > { %v2927_v24 = vrot.slane %v2919_v39, %v4392_v50  ;;  %v2934_v21 = vrot.slane %v2920_v19, %v4392_v50 }
 0x72f   : > { %v2872_v23 = vpop.f32.mrf.mxu0  ;;  %v2913_v26 = vpop.f32.mrf.mxu1 }
 0x730   : > { %v2935_v29 = vcombine.low %v2927_v24, %v2934_v21  ;;  %v2977_v21 = vld [vmem:[#allocation3 + $0x3] ss:$4 sm:$0xf] }
 0x732   : > { %v2942_v6 = vrot.slane %v2935_v29, %v4392_v50 }
 0x734   : > { %v2944_v37 = vadd.f32 %v2942_v6, %v2831_v30 }
 0x736   : > { %v2945_v34 = vsub.f32 0.0, %v2944_v37  ;;  %v2952_v11 = vrot.slane %v2944_v37, 1  ;;  %v2963_v41 = vrot.slane %v2944_v37, 3  ;;  %v2960_v18 = vrot.slane %v2944_v37, 2 }
 0x738   : > { %v2946_v12 = vmul.f32 1.442695, %v2945_v34  ;;  %v2954_v56 = vsub.f32 0.0, %v2952_v11  ;;  %v2965_v63 = vsub.f32 0.0, %v2963_v41 }
 0x73a   : > { %3798 = vpow2.f32 %v2946_v12  ;;  %v2955_v38 = vmul.f32 1.442695, %v2954_v56  ;;  %v2966_v43 = vmul.f32 1.442695, %v2965_v63 }
 0x73c   : > { %3800 = vpow2.f32 %v2955_v38 }
 0x73d   : > { %3802 = vpow2.f32 %v2966_v43 }
 0x747   : > { %v3799_v54 = vpop.eup %3798 }
 0x748   : > { %v2948_v60 = vadd.f32 1.0, %v3799_v54 }
 0x749   : > { %v3801_v17 = vpop.eup %3800 }
 0x74a   : > { %3804 = vrcp.f32 %v2948_v60  ;;  %v2957_v1 = vadd.f32 1.0, %v3801_v17  ;;  %v3803_v44 = vpop.eup %3802 }
 0x74b   : > { %3806 = vtanh.f32 %v2960_v18  ;;  %v2968_v0 = vadd.f32 1.0, %v3803_v44 }
 0x74c   : > { %3808 = vrcp.f32 %v2957_v1 }
 0x74d   : > { %3810 = vrcp.f32 %v2968_v0  ;;  %v3138_v0 = vld [vmem:[%s5339_s9] sm:$0x1] }
 0x757   : > { %v3805_v2 = vpop.eup %3804 }
 0x758   : > { %v3807_v15 = vpop.eup %3806 }
 0x759   : > { %v3809_v47 = vpop.eup %3808  ;;  %v2972_v4 = vmul.f32 %v3807_v15, %v3805_v2 }
 0x75a   : > { %v2971_v52 = vmul.f32 %v3809_v47, %v5173_v59  ;;  %v3811_v53 = vpop.eup %3810 }
 0x75c   : > { %v5213_v62 = vadd.f32 %v2972_v4, %v2971_v52 }
 0x75e   : > { %3812 = vtanh.f32 %v5213_v62 }
 0x76b   : > { %v3813_v5 = vpop.eup %3812 }
 0x76c   : > { %v2975_v7 = vmul.f32 %v3813_v5, %v3811_v53 }
 0x76e   : > { %v2978_v8 = vpack.c.bf16 %v2975_v7, %v2975_v7 }
 0x770   : > { %3012 = vmatmul.mubr.bf16.vlgmr.msra.gmra.mxu0 %v2978_v8  ;;  %3053 = vmatmul.mubr.bf16.vlgmr.msra.gmra.mxu1 %v2978_v8 }
 0x771   : > { %3436 = vmatpush3.msra.mxu0 %v3137_v9  ;;  %3467 = vmatprep.mubr.msk.f32.mxu0 %vm3903_vm13, %v3894_v35 }
 0x772   : > { %3437 = vmatprep.subr.mxu0 %v3894_v35 }
 0x773   : > { %3438 = vmatpush3.msra.mxu0 %v3136_v57 }
 0x774   : > { %3439 = vmatprep.subr.mxu0 %v3894_v35 }
 0x775   : > { %3440 = vmatpush3.msra.mxu0 %v3135_v40 }
 0x776   : > { %3441 = vmatprep.subr.mxu0 %v3894_v35 }
 0x777   : > { %3442 = vmatpush3.msra.mxu0 %v3134_v42 }
 0x778   : > { %3443 = vmatprep.subr.mxu0 %v3894_v35 }
 0x779   : > { %3444 = vmatpush3.msra.mxu0 %v3133_v28 }
 0x77a   : > { %3445 = vmatprep.subr.mxu0 %v3894_v35 }
 0x77b   : > { %3446 = vmatpush3.msra.mxu0 %v3132_v45 }
 0x77c   : > { %3447 = vmatprep.subr.mxu0 %v3894_v35 }
 0x77d   : > { %3448 = vmatpush3.msra.mxu0 %v3131_v36 }
 0x77e   : > { %3449 = vmatprep.subr.mxu0 %v3894_v35 }
 0x77f   : > { %3450 = vmatpush3.msra.mxu0 %v3130_v33 }
 0x780   : > { %3451 = vmatprep.subr.mxu0 %v3894_v35 }
 0x781   : > { %3452 = vmatpush3.msra.mxu0 %v3129_v48 }
 0x782   : > { %3453 = vmatprep.subr.mxu0 %v3894_v35 }
 0x783   : > { %3454 = vmatpush3.msra.mxu0 %v3128_v51 }
 0x784   : > { %3455 = vmatprep.subr.mxu0 %v3894_v35 }
 0x785   : > { %3456 = vmatpush3.msra.mxu0 %v3127_v32 }
 0x786   : > { %3457 = vmatprep.subr.mxu0 %v3894_v35 }
 0x787   : > { %3458 = vmatpush3.msra.mxu0 %v3126_v49 }
 0x788   : > { %3459 = vmatprep.subr.mxu0 %v3894_v35 }
 0x789   : > { %3460 = vmatpush3.msra.mxu0 %v3125_v20 }
 0x78a   : > { %3461 = vmatprep.subr.mxu0 %v3894_v35 }
 0x78b   : > { %3462 = vmatpush3.msra.mxu0 %v3124_v22 }
 0x78c   : > { %3463 = vmatprep.subr.mxu0 %v3894_v35 }
 0x78d   : > { %3464 = vmatpush3.msra.mxu0 %v3123_v31 }
 0x78e   : > { %3465 = vmatprep.subr.mxu0 %v3894_v35 }
 0x78f   : > { %3466 = vmatpush3.msra.mxu0 %v3122_v55 }
 0x830   : > { %v3013_v59 = vpop.f32.mrf.mxu0  ;;  %v3054_v25 = vpop.f32.mrf.mxu1 }
 0x832   : > { %v3015_v46 = vpop.f32.mrf.mxu0  ;;  %v3056_v58 = vpop.f32.mrf.mxu1 }
 0x833   : > { %v3065_v14 = vcombine.low %v3013_v59, %v3015_v46  ;;  %v3066_v61 = vcombine.low %v3054_v25, %v3056_v58 }
 0x834   : > { %v3017_v10 = vpop.f32.mrf.mxu0  ;;  %v3058_v27 = vpop.f32.mrf.mxu1 }
 0x835   : > { %v3073_v13 = vrot.slane %v3065_v14, %v4392_v50  ;;  %v3080_v39 = vrot.slane %v3066_v61, %v4392_v50 }
 0x836   : > { %v3018_v19 = vpop.f32.mrf.mxu0  ;;  %v3059_v16 = vpop.f32.mrf.mxu1 }
 0x837   : > { %v3081_v3 = vcombine.low %v3073_v13, %v3080_v39 }
 0x839   : > { %v3088_v24 = vrot.slane %v3081_v3, %v4392_v50 }
 0x83b   : > { %v3090_v35 = vadd.f32 %v3088_v24, %v2977_v21 }
 0x83d   : > { %v3091_v23 = vsub.f32 0.0, %v3090_v35  ;;  %v3098_v26 = vrot.slane %v3090_v35, 1  ;;  %v3109_v37 = vrot.slane %v3090_v35, 3  ;;  %v3106_v56 = vrot.slane %v3090_v35, 2 }
 0x83f   : > { %v3092_v29 = vmul.f32 1.442695, %v3091_v23  ;;  %v3100_v6 = vsub.f32 0.0, %v3098_v26  ;;  %v3111_v34 = vsub.f32 0.0, %v3109_v37 }
 0x841   : > { %3814 = vpow2.f32 %v3092_v29  ;;  %v3101_v30 = vmul.f32 1.442695, %v3100_v6  ;;  %v3112_v11 = vmul.f32 1.442695, %v3111_v34 }
 0x843   : > { %3816 = vpow2.f32 %v3101_v30 }
 0x844   : > { %3818 = vpow2.f32 %v3112_v11 }
 0x84e   : > { %v3815_v12 = vpop.eup %3814 }
 0x84f   : > { %v3094_v38 = vadd.f32 1.0, %v3815_v12 }
 0x850   : > { %v3817_v41 = vpop.eup %3816 }
 0x851   : > { %3820 = vrcp.f32 %v3094_v38  ;;  %v3103_v63 = vadd.f32 1.0, %v3817_v41  ;;  %v3819_v50 = vpop.eup %3818 }
 0x852   : > { %3822 = vtanh.f32 %v3106_v56  ;;  %v3114_v60 = vadd.f32 1.0, %v3819_v50 }
 0x853   : > { %3824 = vrcp.f32 %v3103_v63 }
 0x854   : > { %3826 = vrcp.f32 %v3114_v60 }
 0x85e   : > { %v3821_v43 = vpop.eup %3820 }
 0x85f   : > { %v3823_v54 = vpop.eup %3822 }
 0x860   : > { %v3825_v18 = vpop.eup %3824  ;;  %v3118_v1 = vmul.f32 %v3823_v54, %v3821_v43 }
 0x861   : > { %v3117_v17 = vmul.f32 %v3825_v18, %v5213_v62  ;;  %v3827_v2 = vpop.eup %3826 }
 0x863   : > { %v3119_v44 = vadd.f32 %v3118_v1, %v3117_v17 }
 0x865   : > { %3828 = vtanh.f32 %v3119_v44 }
 0x872   : > { %v3829_v15 = vpop.eup %3828 }
 0x873   : > { %v3121_v47 = vmul.f32 %v3829_v15, %v3827_v2 }
 0x875   : > { %3468 = vmatmul.mubr.f32.vlgmr.msra.gmra.mxu0 %v3121_v47 }
 0x935   : > { %v3205_v52 = vpop.f32.mrf.mxu0 }
 0x936   : > { %v3206_v4 = vadd.f32 %v3205_v52, %v3138_v0 }
 0x937   : > { %v3469_v62 = vpop.f32.mrf.mxu0 }
 0x938   : > { %3209 = vst [vmem:[%s406_s28] sm:$0x1] %v3206_v4 }
 0x939   : > { %3843 = shalt.err (!%p3840_p5)
}
 0x93a   : > { %s3844_s29 = scalar_lea.hbm %s5293_s26, 16  ;;  %s3848_s12 = scalar_lea.hbm %s5340_s10, 32 }
 0x93b   : > { %p3845_p7 = scmp.ne.s32.totalorder %s5293_s26, %s3844_s29  ;;  %p3849_p12 = scmp.lt.s32.totalorder %s5293_s26, %s5340_s10 }
 0x93c   : > { %p3850_p13 = scmp.lt.s32.totalorder %s3848_s12, %s3844_s29 }
 0x93d   : > { %p3846_p10 = pnand %p3845_p7, %p3998_p6 }
 0x93e   : > { %p3851_p0 = por %p3850_p13, %p3849_p12 }
 0x93f   : > { %p3847_p11 = pneg %p3846_p10 }
 0x941   : > { %p3852_p1 = pnand %p3851_p0, %p3847_p11 }
 0x943   : > { %3855 = shalt.err (!%p3852_p1)
}
 0x944   : > { %3470 = dma.vmem_to_hbm [thread:$0]  (%p3998_p6), %s3224_s30, 16, %s5293_s26, %s3211_s18  }
 0x945 PF: > { %s3235_s27 = sand.u32 1, %s3878_s13   ;;  %p3473_p2 = pnand %p3286_p9, %p4002_p8 }
 0x946   : > { %s3236_s25 = scalar_lea.sflag [#allocation6], %s3235_s27 }
 0x947   : > { %p3474_p3 = pneg %p3473_p2 }
 0x949   : > { %3873 = dma.done.wait (%p3474_p3), %s3236_s25, 16  }
 0x94a   : > { %3875 = vsyncadd (%p3474_p3), %s3236_s25, 4294967280  ;;  %p20_p4 = scmp.ge.s32.totalorder %s3983_s19, 4   ;;  %s5345_s13 = smov %s3882_s14 }
 0x94b   : > { %s5346_s14 = smov %s3886_s15  ;;  %s5347_s15 = smov %s3996_s22 }
 0x94c   : > { %s5348_s16 = smov %s3983_s19  ;;  %22 = sbr.rel (!%p20_p4) target bundleno = 3 (0x3), region = 131 }
 0x951   :  { %3240 = vsyncpa [#allocation6], 1 }
 0x952   :  { %3242 = vsyncpa [#allocation6 + $0x1], 1 }

</bundles_post_ra>
